<compile_context>
chip_gen: v5e
topology: v5e:2x2
jax: 0.10.0
libtpu: 0.0.40
codegen_flags: <defaults>
</compile_context>

<pallas_src>
import functools

import jax
import jax.numpy as jnp
from jax.experimental import pallas as pl
from jax.experimental.pallas import tpu as pltpu

NEG_INF = -1e9  # additive "never attend" value for cross-window score entries


# ----------------------------- Pallas kernel --------------------------------
def window_attention_kernel(x_ref, wqkv_ref, bqkv_ref, bias_ref, wproj_ref,
                            bproj_ref, o_ref, qkv_ref, acc_ref, *,
                            num_heads, head_dim):
    # x_ref    : (M, C)    bf16/f32  M = Wt * N rows of this window block
    # wqkv_ref : (C, 3C)   bf16      head-major columns [h: q|k|v], Q pre-scaled
    # bqkv_ref : (1, 3C)   f32       same order / scaling
    # bias_ref : (H, M, M) f32       block-diagonal: rpb + window mask on the
    #                                diagonal (N, N) blocks, NEG_INF elsewhere
    # wproj_ref: (C, C)    bf16      rows in original head order
    # bproj_ref: (1, C)    f32
    # qkv_ref  : (M, 3C)   f32 VMEM scratch (stages the QKV activations)
    # acc_ref  : (M, C)    f32 VMEM scratch (output accumulator)
    H, hd = num_heads, head_dim

    # Fused QKV projection on the MXU (f32 accumulation), staged in VMEM so
    # nothing (M, 3C)-sized stays live in vregs across the head loop.
    xb = x_ref[...].astype(jnp.bfloat16)
    qkv_ref[...] = (jnp.dot(xb, wqkv_ref[...],
                            preferred_element_type=jnp.float32)
                    + bqkv_ref[0])
    acc_ref[...] = jnp.zeros_like(acc_ref)

    for h in range(H):                       # short static loop over heads
        # One contiguous (M, 3*hd) lane slice per head (head-major packing).
        qkvh = qkv_ref[:, 3 * h * hd:3 * (h + 1) * hd]
        qh = qkvh[:, :hd].astype(jnp.bfloat16)            # (M, hd), scale folded
        kh = qkvh[:, hd:2 * hd].astype(jnp.bfloat16)      # (M, hd)
        vh = qkvh[:, 2 * hd:].astype(jnp.bfloat16)        # (M, hd)

        # Dense block attention: (M, M) scores; cross-window pairs are killed
        # by the block-diagonal bias, so the math matches per-window softmax.
        s = jax.lax.dot_general(qh, kh, (((1,), (1,)), ((), ())),
                                preferred_element_type=jnp.float32)  # q @ k^T
        s = s + bias_ref[h]

        # Numerically stable softmax in f32 (portable across v5e/v6e/v7x);
        # the reciprocal goes to the EUP slot.
        s = s - jnp.max(s, axis=-1, keepdims=True)
        p = jnp.exp(s)
        p = p * pl.reciprocal(jnp.sum(p, axis=-1, keepdims=True), approx=True)

        # attn @ v with a full M-deep contraction, then fold this head straight
        # into the output projection (no lane-dim concatenate).
        oh = jnp.dot(p.astype(jnp.bfloat16), vh,
                     preferred_element_type=jnp.float32)             # (M, hd)
        acc_ref[...] += jnp.dot(oh.astype(jnp.bfloat16),
                                wproj_ref[h * hd:(h + 1) * hd, :],
                                preferred_element_type=jnp.float32)

    o_ref[...] = (acc_ref[...] + bproj_ref[0]).astype(o_ref.dtype)


# ------------------------------ wrapper --------------------------------------
def _choose_windows_per_block(B_, nW, N):
    """Pick Wt (multiple of nW dividing B_) so the dense tile M = Wt*N is
    sublane-pack aligned, lands near the 128-256-row sweet spot, and leaves
    >= 2 grid steps (two v7x TensorCores) when that does not cost tile
    quality."""
    B = B_ // nW
    best, best_key = nW, None
    for b in range(1, B + 1):
        if B % b:
            continue
        Wt = nW * b
        M = Wt * N
        n_blocks = B_ // Wt
        key = (
            M % 16 == 0 or Wt == B_,             # bf16 sublane pack (or full array)
            128 <= M <= 256,                     # dense-attention sweet spot
            -abs(M - 128) if M <= 256 else -M,   # near 128; bias is O(M^2)
            n_blocks >= 2,                       # keep both v7x TCs busy if free
        )
        if best_key is None or key > best_key:
            best, best_key = Wt, key
    return best


def window_attention(x, wqkv, bqkv, rpb, mask, wproj, bproj, *, num_heads,
                     scale, windows_per_block=None):
    B_, N, C = x.shape
    H = num_heads
    hd = C // H
    if mask is None:
        mask = jnp.zeros((1, N, N), dtype=jnp.float32)
    nW = mask.shape[0]
    assert B_ % nW == 0

    Wt = (_choose_windows_per_block(B_, nW, N) if windows_per_block is None
          else windows_per_block)
    assert Wt % nW == 0 and B_ % Wt == 0
    M = Wt * N
    full_block = (Wt == B_)
    x_bf16 = (M % 16 == 0) or full_block
    if not x_bf16 and M % 8 != 0:
        # Fall back to a single full-array block (always layout-legal).
        Wt, M, full_block, x_bf16 = B_, B_ * N, True, True
    num_blocks = B_ // Wt
    assert full_block or M % (16 if x_bf16 else 8) == 0

    # Fold the qk scale into the Q projection, then re-pack columns head-major
    # ([h: q(hd) | k(hd) | v(hd)]) so the kernel takes one contiguous lane
    # slice per head.
    wqkv = wqkv.at[:, :C].multiply(scale)
    bqkv = bqkv.at[:C].multiply(scale)
    lane = jnp.arange(hd)
    perm = jnp.concatenate([s * C + h * hd + lane
                            for h in range(H) for s in range(3)])
    wqkv_hm = wqkv[:, perm]
    bqkv_hm = bqkv[perm]

    # Block-diagonal dense bias shared by every grid step: diagonal (N, N)
    # blocks hold rel-pos bias + the shifted-window mask (window j in a block
    # uses mask[j % nW], valid because Wt % nW == 0); everything else is
    # NEG_INF so cross-window attention underflows to exactly 0 after softmax.
    per_win = (rpb[:, None, :, :] + mask[None, :, :, :]).astype(jnp.float32)
    per_win = jnp.tile(per_win, (1, Wt // nW, 1, 1))          # (H, Wt, N, N)
    bias = jnp.full((H, Wt, N, Wt, N), NEG_INF, jnp.float32)
    widx = jnp.arange(Wt)
    bias = bias.at[:, widx, :, widx, :].set(
        jnp.transpose(per_win, (1, 0, 2, 3)))
    bias = bias.reshape(H, M, M)

    # bf16 for everything feeding the MXU; biases stay f32.
    x2 = x.reshape(B_ * N, C)
    if x_bf16:
        x2 = x2.astype(jnp.bfloat16)
    wqkv_b = wqkv_hm.astype(jnp.bfloat16)
    wproj_b = wproj.astype(jnp.bfloat16)
    bqkv2 = bqkv_hm.reshape(1, 3 * C).astype(jnp.float32)
    bproj2 = bproj.reshape(1, C).astype(jnp.float32)

    kernel = functools.partial(window_attention_kernel, num_heads=H,
                               head_dim=hd)

    # Advisory cost estimate (grid-invariant operands counted once).
    out_bytes = x.dtype.itemsize
    x_bytes = 2 if x_bf16 else out_bytes
    flops = num_blocks * (2 * M * C * 3 * C          # qkv projection
                          + H * 4 * M * M * hd       # q@k^T and attn@v (dense)
                          + 2 * M * C * C)           # output projection
    transcendentals = num_blocks * H * M * M         # softmax exp
    bytes_accessed = (B_ * N * C * (x_bytes + out_bytes)
                      + H * M * M * 4
                      + C * 3 * C * 2 + C * C * 2 + 3 * C * 4 + C * 4)

    # Explicit VMEM budget: double-buffered x/out blocks + resident constants
    # + scratch, with headroom; kept well under v7x's 64 MiB.
    resident = H * M * M * 4 + C * 3 * C * 2 + C * C * 2 + 3 * C * 4 + C * 4
    io_blocks = 2 * M * C * (x_bytes + out_bytes)
    scratch = M * 3 * C * 4 + M * C * 4
    vmem_limit = int(min(max(2 * (io_blocks + resident + scratch),
                             16 * 1024 * 1024),
                         48 * 1024 * 1024))

    out2 = pl.pallas_call(
        kernel,
        out_shape=jax.ShapeDtypeStruct((B_ * N, C), x.dtype),
        grid_spec=pltpu.PrefetchScalarGridSpec(
            num_scalar_prefetch=0,
            grid=(num_blocks,),
            in_specs=[
                pl.BlockSpec((M, C), lambda i: (i, 0)),              # x
                pl.BlockSpec((C, 3 * C), lambda i: (0, 0)),          # W_qkv
                pl.BlockSpec((1, 3 * C), lambda i: (0, 0)),          # b_qkv
                pl.BlockSpec((H, M, M), lambda i: (0, 0, 0)),        # dense bias
                pl.BlockSpec((C, C), lambda i: (0, 0)),              # W_proj
                pl.BlockSpec((1, C), lambda i: (0, 0)),              # b_proj
            ],
            out_specs=pl.BlockSpec((M, C), lambda i: (i, 0)),
            scratch_shapes=[pltpu.VMEM((M, 3 * C), jnp.float32),     # qkv stage
                            pltpu.VMEM((M, C), jnp.float32)],        # accumulator
        ),
        compiler_params=pltpu.CompilerParams(
            dimension_semantics=("parallel",),
            vmem_limit_bytes=vmem_limit),
        cost_estimate=pl.CostEstimate(flops=flops,
                                      transcendentals=transcendentals,
                                      bytes_accessed=bytes_accessed),
    )(x2, wqkv_b, bqkv2, bias, wproj_b, bproj2)
    return out2.reshape(B_, N, C)


# ---------------------- relative position index (glue) -----------------------
def make_relative_position_index(Wh, Ww):
    coords_h = jnp.arange(Wh)
    coords_w = jnp.arange(Ww)
    coords = jnp.stack(jnp.meshgrid(coords_h, coords_w, indexing="ij"))  # (2,Wh,Ww)
    coords_flat = coords.reshape(2, -1)                                  # (2, N)
    rel = coords_flat[:, :, None] - coords_flat[:, None, :]              # (2, N, N)
    rel = rel.transpose(1, 2, 0)                                         # (N, N, 2)
    rel = rel.at[:, :, 0].add(Wh - 1)
    rel = rel.at[:, :, 1].add(Ww - 1)
    rel = rel.at[:, :, 0].multiply(2 * Ww - 1)
    return rel.sum(-1)                                                   # (N, N)


# ----------------------------- pure-JAX reference ----------------------------
def reference(x, wqkv, bqkv, rpb, mask, wproj, bproj, *, num_heads, scale):
    B_, N, C = x.shape
    hd = C // num_heads
    nW = mask.shape[0]
    qkv = x @ wqkv + bqkv                                     # (B_, N, 3C)
    qkv = qkv.reshape(B_, N, 3, num_heads, hd).transpose(2, 0, 3, 1, 4)
    q, k, v = qkv[0], qkv[1], qkv[2]                          # (B_, H, N, hd)
    attn = (q * scale) @ jnp.swapaxes(k, -2, -1)              # (B_, H, N, N)
    attn = attn + rpb[None]
    attn = attn.reshape(B_ // nW, nW, num_heads, N, N) + mask[None, :, None]
    attn = attn.reshape(B_, num_heads, N, N)
    attn = jax.nn.softmax(attn, axis=-1)
    out = (attn @ v).transpose(0, 2, 1, 3).reshape(B_, N, C)
    return out @ wproj + bproj


# --------------------------------- main ---------------------------------------
if __name__ == "__main__":
    # Small shapes consistent with the module: dim=32, window 4x4, 4 heads.
    dim = 32
    window_size = (4, 4)
    num_heads = 4
    head_dim = dim // num_heads
    scale = head_dim ** (-0.5)
    N = window_size[0] * window_size[1]       # 16 tokens per window
    B = 2
    nW = 4                                    # number of windows per image
    B_ = B * nW                               # 8 windows -> one (128, 32) block

    key = jax.random.PRNGKey(0)
    k_x, k_tbl, k_wqkv, k_bqkv, k_wproj, k_bproj, k_mask = jax.random.split(key, 7)

    x = jax.random.normal(k_x, (B_, N, dim), dtype=jnp.float32)

    # Parameters (deterministic synthetic init; Linear weights as (in, out)).
    wqkv = jax.random.normal(k_wqkv, (dim, 3 * dim), dtype=jnp.float32) * 0.05
    bqkv = jax.random.normal(k_bqkv, (3 * dim,), dtype=jnp.float32) * 0.05
    wproj = jax.random.normal(k_wproj, (dim, dim), dtype=jnp.float32) * 0.05
    bproj = jax.random.normal(k_bproj, (dim,), dtype=jnp.float32) * 0.05

    # relative_position_bias_table ~ trunc_normal(std=0.02)
    table_size = (2 * window_size[0] - 1) * (2 * window_size[1] - 1)
    rpb_table = 0.02 * jax.random.truncated_normal(
        k_tbl, -2.0, 2.0, (table_size, num_heads), dtype=jnp.float32)

    # Gather table -> (num_heads, N, N)  (glue, done in plain JAX)
    rpi = make_relative_position_index(*window_size)            # (N, N)
    rpb = rpb_table[rpi.reshape(-1)].reshape(N, N, num_heads).transpose(2, 0, 1)

    # Additive window mask (0 / -100), shape (nW, N, N) — shifted-window style.
    mask = jnp.where(
        jax.random.bernoulli(k_mask, 0.25, (nW, N, N)), -100.0, 0.0
    ).astype(jnp.float32)

    out = window_attention(x, wqkv, bqkv, rpb, mask, wproj, bproj,
                           num_heads=num_heads, scale=scale)
    out = jax.block_until_ready(out)

    ref = reference(x, wqkv, bqkv, rpb, mask, wproj, bproj,
                    num_heads=num_heads, scale=scale)
    assert out.shape == (B_, N, dim)
    # bf16 matmul inputs + approx reciprocal -> compare vs f32 reference with a
    # tolerance that comfortably bounds the quantization error at these scales.
    assert jnp.allclose(out, ref, rtol=2e-2, atol=2e-2), "mismatch vs reference"

    print("KERNEL_OK")
</pallas_src>

<mosaic_0001>
module attributes {stable_mosaic.version = 11 : i64} {
  func.func @window_attention_kernel(%arg0: i32, %arg1: memref<128x32xbf16, #tpu.memory_space<vmem>>, %arg2: memref<32x96xbf16, #tpu.memory_space<vmem>>, %arg3: memref<1x96xf32, #tpu.memory_space<vmem>>, %arg4: memref<4x128x128xf32, #tpu.memory_space<vmem>>, %arg5: memref<32x32xbf16, #tpu.memory_space<vmem>>, %arg6: memref<1x32xf32, #tpu.memory_space<vmem>>, %arg7: memref<128x32xf32, #tpu.memory_space<vmem>>, %arg8: memref<128x96xf32, #tpu.memory_space<vmem>>, %arg9: memref<128x32xf32, #tpu.memory_space<vmem>>) attributes {dimension_semantics = [#tpu.dimension_semantics<parallel>], iteration_bounds = array<i64: 1>, scalar_prefetch = 0 : i64, scratch_operands = 2 : i64, tpu.core_type = #tpu.core_type<tc>, window_params = [{transform_indices = @transform_0, window_bounds = array<i64: 128, 32>}, {pipeline_mode = #tpu.pipeline_mode<synchronous>, transform_indices = @transform_1, window_bounds = array<i64: 32, 96>}, {pipeline_mode = #tpu.pipeline_mode<synchronous>, transform_indices = @transform_2, window_bounds = array<i64: 1, 96>}, {pipeline_mode = #tpu.pipeline_mode<synchronous>, transform_indices = @transform_3, window_bounds = array<i64: 4, 128, 128>}, {pipeline_mode = #tpu.pipeline_mode<synchronous>, transform_indices = @transform_4, window_bounds = array<i64: 32, 32>}, {pipeline_mode = #tpu.pipeline_mode<synchronous>, transform_indices = @transform_5, window_bounds = array<i64: 1, 32>}, {transform_indices = @transform_6, window_bounds = array<i64: 128, 32>}]} {
    %c0 = arith.constant 0 : index
    %c0_0 = arith.constant 0 : index
    %0 = vector.load %arg1[%c0, %c0_0] : memref<128x32xbf16, #tpu.memory_space<vmem>>, vector<128x32xbf16>
    %c0_1 = arith.constant 0 : index
    %c0_2 = arith.constant 0 : index
    %1 = vector.load %arg2[%c0_1, %c0_2] : memref<32x96xbf16, #tpu.memory_space<vmem>>, vector<32x96xbf16>
    %cst = arith.constant dense<0.000000e+00> : vector<128x96xf32>
    %2 = tpu.matmul %0, %1, %cst {dimension_numbers = #tpu.dot_dimension_numbers<[1], [0], [0], [1], [0, 0, 1, 1], [], []>} : vector<128x32xbf16>, vector<32x96xbf16>, vector<128x96xf32> -> vector<128x96xf32>
    %c0_3 = arith.constant 0 : index
    %c0_4 = arith.constant 0 : index
    %3 = vector.load %arg3[%c0_3, %c0_4] : memref<1x96xf32, #tpu.memory_space<vmem>>, vector<1x96xf32>
    %4 = vector.shape_cast %3 : vector<1x96xf32> to vector<96xf32>
    %5 = vector.shape_cast %4 : vector<96xf32> to vector<1x96xf32>
    %6 = vector.broadcast %5 : vector<1x96xf32> to vector<128x96xf32>
    %7 = arith.addf %2, %6 : vector<128x96xf32>
    %c0_5 = arith.constant 0 : index
    %c0_6 = arith.constant 0 : index
    %8 = vector.load %arg8[%c0_5, %c0_6] : memref<128x96xf32, #tpu.memory_space<vmem>>, vector<128x96xf32>
    tpu.vector_store %arg8[%c0_5, %c0_6], %7 {strides = array<i32>} : memref<128x96xf32, #tpu.memory_space<vmem>>, vector<128x96xf32>,
    %cst_7 = arith.constant 0.000000e+00 : f32
    %9 = vector.broadcast %cst_7 : f32 to vector<128x32xf32>
    %c0_8 = arith.constant 0 : index
    %c0_9 = arith.constant 0 : index
    %10 = vector.load %arg9[%c0_8, %c0_9] : memref<128x32xf32, #tpu.memory_space<vmem>>, vector<128x32xf32>
    tpu.vector_store %arg9[%c0_8, %c0_9], %9 {strides = array<i32>} : memref<128x32xf32, #tpu.memory_space<vmem>>, vector<128x32xf32>,
    %c0_10 = arith.constant 0 : index
    %c0_11 = arith.constant 0 : index
    %11 = vector.load %arg8[%c0_10, %c0_11] : memref<128x96xf32, #tpu.memory_space<vmem>>, vector<128x24xf32>
    %12 = vector.extract_strided_slice %11 {offsets = [0, 0], sizes = [128, 8], strides = [1, 1]} : vector<128x24xf32> to vector<128x8xf32>
    %13 = arith.truncf %12 : vector<128x8xf32> to vector<128x8xbf16>
    %14 = vector.extract_strided_slice %11 {offsets = [0, 8], sizes = [128, 8], strides = [1, 1]} : vector<128x24xf32> to vector<128x8xf32>
    %15 = arith.truncf %14 : vector<128x8xf32> to vector<128x8xbf16>
    %16 = vector.extract_strided_slice %11 {offsets = [0, 16], sizes = [128, 8], strides = [1, 1]} : vector<128x24xf32> to vector<128x8xf32>
    %17 = arith.truncf %16 : vector<128x8xf32> to vector<128x8xbf16>
    %cst_12 = arith.constant dense<0.000000e+00> : vector<128x128xf32>
    %18 = tpu.matmul %13, %15, %cst_12 {dimension_numbers = #tpu.dot_dimension_numbers<[1], [1], [0], [0], [0, 0, 1, 0], [], []>} : vector<128x8xbf16>, vector<128x8xbf16>, vector<128x128xf32> -> vector<128x128xf32>
    %c0_13 = arith.constant 0 : index
    %c0_14 = arith.constant 0 : index
    %c0_15 = arith.constant 0 : index
    %19 = vector.load %arg4[%c0_13, %c0_14, %c0_15] : memref<4x128x128xf32, #tpu.memory_space<vmem>>, vector<1x128x128xf32>
    %20 = vector.shape_cast %19 : vector<1x128x128xf32> to vector<128x128xf32>
    %21 = arith.addf %18, %20 : vector<128x128xf32>
    %cst_16 = arith.constant dense<0xFF800000> : vector<128xf32>
    %22 = vector.multi_reduction <maximumf>, %21, %cst_16 [1] : vector<128x128xf32> to vector<128xf32>
    %23 = vector.shape_cast %22 : vector<128xf32> to vector<128x1xf32>
    %24 = vector.broadcast %23 : vector<128x1xf32> to vector<128x128xf32>
    %25 = arith.subf %21, %24 : vector<128x128xf32>
    %26 = math.exp %25 : vector<128x128xf32>
    %cst_17 = arith.constant dense<0.000000e+00> : vector<128xf32>
    %27 = vector.multi_reduction <add>, %26, %cst_17 [1] : vector<128x128xf32> to vector<128xf32>
    %28 = vector.shape_cast %27 : vector<128xf32> to vector<128x1xf32>
    %29 = tpu.reciprocal %28 {approx = true} : vector<128x1xf32> -> vector<128x1xf32>
    %30 = vector.broadcast %29 : vector<128x1xf32> to vector<128x128xf32>
    %31 = arith.mulf %26, %30 : vector<128x128xf32>
    %32 = arith.truncf %31 : vector<128x128xf32> to vector<128x128xbf16>
    %cst_18 = arith.constant dense<0.000000e+00> : vector<128x8xf32>
    %33 = tpu.matmul %32, %17, %cst_18 {dimension_numbers = #tpu.dot_dimension_numbers<[1], [0], [0], [1], [0, 0, 1, 1], [], []>} : vector<128x128xbf16>, vector<128x8xbf16>, vector<128x8xf32> -> vector<128x8xf32>
    %c0_19 = arith.constant 0 : index
    %c0_20 = arith.constant 0 : index
    %34 = vector.load %arg9[%c0_19, %c0_20] : memref<128x32xf32, #tpu.memory_space<vmem>>, vector<128x32xf32>
    %35 = arith.truncf %33 : vector<128x8xf32> to vector<128x8xbf16>
    %c0_21 = arith.constant 0 : index
    %c0_22 = arith.constant 0 : index
    %36 = vector.load %arg5[%c0_21, %c0_22] : memref<32x32xbf16, #tpu.memory_space<vmem>>, vector<8x32xbf16>
    %cst_23 = arith.constant dense<0.000000e+00> : vector<128x32xf32>
    %37 = tpu.matmul %35, %36, %cst_23 {dimension_numbers = #tpu.dot_dimension_numbers<[1], [0], [0], [1], [0, 0, 1, 1], [], []>} : vector<128x8xbf16>, vector<8x32xbf16>, vector<128x32xf32> -> vector<128x32xf32>
    %38 = arith.addf %34, %37 : vector<128x32xf32>
    %c0_24 = arith.constant 0 : index
    %c0_25 = arith.constant 0 : index
    %39 = vector.load %arg9[%c0_24, %c0_25] : memref<128x32xf32, #tpu.memory_space<vmem>>, vector<128x32xf32>
    tpu.vector_store %arg9[%c0_24, %c0_25], %38 {strides = array<i32>} : memref<128x32xf32, #tpu.memory_space<vmem>>, vector<128x32xf32>,
    %c0_26 = arith.constant 0 : index
    %c24 = arith.constant 24 : index
    %40 = vector.load %arg8[%c0_26, %c24] : memref<128x96xf32, #tpu.memory_space<vmem>>, vector<128x24xf32>
    %41 = vector.extract_strided_slice %40 {offsets = [0, 0], sizes = [128, 8], strides = [1, 1]} : vector<128x24xf32> to vector<128x8xf32>
    %42 = arith.truncf %41 : vector<128x8xf32> to vector<128x8xbf16>
    %43 = vector.extract_strided_slice %40 {offsets = [0, 8], sizes = [128, 8], strides = [1, 1]} : vector<128x24xf32> to vector<128x8xf32>
    %44 = arith.truncf %43 : vector<128x8xf32> to vector<128x8xbf16>
    %45 = vector.extract_strided_slice %40 {offsets = [0, 16], sizes = [128, 8], strides = [1, 1]} : vector<128x24xf32> to vector<128x8xf32>
    %46 = arith.truncf %45 : vector<128x8xf32> to vector<128x8xbf16>
    %cst_27 = arith.constant dense<0.000000e+00> : vector<128x128xf32>
    %47 = tpu.matmul %42, %44, %cst_27 {dimension_numbers = #tpu.dot_dimension_numbers<[1], [1], [0], [0], [0, 0, 1, 0], [], []>} : vector<128x8xbf16>, vector<128x8xbf16>, vector<128x128xf32> -> vector<128x128xf32>
    %c1 = arith.constant 1 : index
    %c0_28 = arith.constant 0 : index
    %c0_29 = arith.constant 0 : index
    %48 = vector.load %arg4[%c1, %c0_28, %c0_29] : memref<4x128x128xf32, #tpu.memory_space<vmem>>, vector<1x128x128xf32>
    %49 = vector.shape_cast %48 : vector<1x128x128xf32> to vector<128x128xf32>
    %50 = arith.addf %47, %49 : vector<128x128xf32>
    %cst_30 = arith.constant dense<0xFF800000> : vector<128xf32>
    %51 = vector.multi_reduction <maximumf>, %50, %cst_30 [1] : vector<128x128xf32> to vector<128xf32>
    %52 = vector.shape_cast %51 : vector<128xf32> to vector<128x1xf32>
    %53 = vector.broadcast %52 : vector<128x1xf32> to vector<128x128xf32>
    %54 = arith.subf %50, %53 : vector<128x128xf32>
    %55 = math.exp %54 : vector<128x128xf32>
    %cst_31 = arith.constant dense<0.000000e+00> : vector<128xf32>
    %56 = vector.multi_reduction <add>, %55, %cst_31 [1] : vector<128x128xf32> to vector<128xf32>
    %57 = vector.shape_cast %56 : vector<128xf32> to vector<128x1xf32>
    %58 = tpu.reciprocal %57 {approx = true} : vector<128x1xf32> -> vector<128x1xf32>
    %59 = vector.broadcast %58 : vector<128x1xf32> to vector<128x128xf32>
    %60 = arith.mulf %55, %59 : vector<128x128xf32>
    %61 = arith.truncf %60 : vector<128x128xf32> to vector<128x128xbf16>
    %cst_32 = arith.constant dense<0.000000e+00> : vector<128x8xf32>
    %62 = tpu.matmul %61, %46, %cst_32 {dimension_numbers = #tpu.dot_dimension_numbers<[1], [0], [0], [1], [0, 0, 1, 1], [], []>} : vector<128x128xbf16>, vector<128x8xbf16>, vector<128x8xf32> -> vector<128x8xf32>
    %c0_33 = arith.constant 0 : index
    %c0_34 = arith.constant 0 : index
    %63 = vector.load %arg9[%c0_33, %c0_34] : memref<128x32xf32, #tpu.memory_space<vmem>>, vector<128x32xf32>
    %64 = arith.truncf %62 : vector<128x8xf32> to vector<128x8xbf16>
    %c8 = arith.constant 8 : index
    %c0_35 = arith.constant 0 : index
    %65 = vector.load %arg5[%c8, %c0_35] : memref<32x32xbf16, #tpu.memory_space<vmem>>, vector<8x32xbf16>
    %cst_36 = arith.constant dense<0.000000e+00> : vector<128x32xf32>
    %66 = tpu.matmul %64, %65, %cst_36 {dimension_numbers = #tpu.dot_dimension_numbers<[1], [0], [0], [1], [0, 0, 1, 1], [], []>} : vector<128x8xbf16>, vector<8x32xbf16>, vector<128x32xf32> -> vector<128x32xf32>
    %67 = arith.addf %63, %66 : vector<128x32xf32>
    %c0_37 = arith.constant 0 : index
    %c0_38 = arith.constant 0 : index
    %68 = vector.load %arg9[%c0_37, %c0_38] : memref<128x32xf32, #tpu.memory_space<vmem>>, vector<128x32xf32>
    tpu.vector_store %arg9[%c0_37, %c0_38], %67 {strides = array<i32>} : memref<128x32xf32, #tpu.memory_space<vmem>>, vector<128x32xf32>,
    %c0_39 = arith.constant 0 : index
    %c48 = arith.constant 48 : index
    %69 = vector.load %arg8[%c0_39, %c48] : memref<128x96xf32, #tpu.memory_space<vmem>>, vector<128x24xf32>
    %70 = vector.extract_strided_slice %69 {offsets = [0, 0], sizes = [128, 8], strides = [1, 1]} : vector<128x24xf32> to vector<128x8xf32>
    %71 = arith.truncf %70 : vector<128x8xf32> to vector<128x8xbf16>
    %72 = vector.extract_strided_slice %69 {offsets = [0, 8], sizes = [128, 8], strides = [1, 1]} : vector<128x24xf32> to vector<128x8xf32>
    %73 = arith.truncf %72 : vector<128x8xf32> to vector<128x8xbf16>
    %74 = vector.extract_strided_slice %69 {offsets = [0, 16], sizes = [128, 8], strides = [1, 1]} : vector<128x24xf32> to vector<128x8xf32>
    %75 = arith.truncf %74 : vector<128x8xf32> to vector<128x8xbf16>
    %cst_40 = arith.constant dense<0.000000e+00> : vector<128x128xf32>
    %76 = tpu.matmul %71, %73, %cst_40 {dimension_numbers = #tpu.dot_dimension_numbers<[1], [1], [0], [0], [0, 0, 1, 0], [], []>} : vector<128x8xbf16>, vector<128x8xbf16>, vector<128x128xf32> -> vector<128x128xf32>
    %c2 = arith.constant 2 : index
    %c0_41 = arith.constant 0 : index
    %c0_42 = arith.constant 0 : index
    %77 = vector.load %arg4[%c2, %c0_41, %c0_42] : memref<4x128x128xf32, #tpu.memory_space<vmem>>, vector<1x128x128xf32>
    %78 = vector.shape_cast %77 : vector<1x128x128xf32> to vector<128x128xf32>
    %79 = arith.addf %76, %78 : vector<128x128xf32>
    %cst_43 = arith.constant dense<0xFF800000> : vector<128xf32>
    %80 = vector.multi_reduction <maximumf>, %79, %cst_43 [1] : vector<128x128xf32> to vector<128xf32>
    %81 = vector.shape_cast %80 : vector<128xf32> to vector<128x1xf32>
    %82 = vector.broadcast %81 : vector<128x1xf32> to vector<128x128xf32>
    %83 = arith.subf %79, %82 : vector<128x128xf32>
    %84 = math.exp %83 : vector<128x128xf32>
    %cst_44 = arith.constant dense<0.000000e+00> : vector<128xf32>
    %85 = vector.multi_reduction <add>, %84, %cst_44 [1] : vector<128x128xf32> to vector<128xf32>
    %86 = vector.shape_cast %85 : vector<128xf32> to vector<128x1xf32>
    %87 = tpu.reciprocal %86 {approx = true} : vector<128x1xf32> -> vector<128x1xf32>
    %88 = vector.broadcast %87 : vector<128x1xf32> to vector<128x128xf32>
    %89 = arith.mulf %84, %88 : vector<128x128xf32>
    %90 = arith.truncf %89 : vector<128x128xf32> to vector<128x128xbf16>
    %cst_45 = arith.constant dense<0.000000e+00> : vector<128x8xf32>
    %91 = tpu.matmul %90, %75, %cst_45 {dimension_numbers = #tpu.dot_dimension_numbers<[1], [0], [0], [1], [0, 0, 1, 1], [], []>} : vector<128x128xbf16>, vector<128x8xbf16>, vector<128x8xf32> -> vector<128x8xf32>
    %c0_46 = arith.constant 0 : index
    %c0_47 = arith.constant 0 : index
    %92 = vector.load %arg9[%c0_46, %c0_47] : memref<128x32xf32, #tpu.memory_space<vmem>>, vector<128x32xf32>
    %93 = arith.truncf %91 : vector<128x8xf32> to vector<128x8xbf16>
    %c16 = arith.constant 16 : index
    %c0_48 = arith.constant 0 : index
    %94 = vector.load %arg5[%c16, %c0_48] : memref<32x32xbf16, #tpu.memory_space<vmem>>, vector<8x32xbf16>
    %cst_49 = arith.constant dense<0.000000e+00> : vector<128x32xf32>
    %95 = tpu.matmul %93, %94, %cst_49 {dimension_numbers = #tpu.dot_dimension_numbers<[1], [0], [0], [1], [0, 0, 1, 1], [], []>} : vector<128x8xbf16>, vector<8x32xbf16>, vector<128x32xf32> -> vector<128x32xf32>
    %96 = arith.addf %92, %95 : vector<128x32xf32>
    %c0_50 = arith.constant 0 : index
    %c0_51 = arith.constant 0 : index
    %97 = vector.load %arg9[%c0_50, %c0_51] : memref<128x32xf32, #tpu.memory_space<vmem>>, vector<128x32xf32>
    tpu.vector_store %arg9[%c0_50, %c0_51], %96 {strides = array<i32>} : memref<128x32xf32, #tpu.memory_space<vmem>>, vector<128x32xf32>,
    %c0_52 = arith.constant 0 : index
    %c72 = arith.constant 72 : index
    %98 = vector.load %arg8[%c0_52, %c72] : memref<128x96xf32, #tpu.memory_space<vmem>>, vector<128x24xf32>
    %99 = vector.extract_strided_slice %98 {offsets = [0, 0], sizes = [128, 8], strides = [1, 1]} : vector<128x24xf32> to vector<128x8xf32>
    %100 = arith.truncf %99 : vector<128x8xf32> to vector<128x8xbf16>
    %101 = vector.extract_strided_slice %98 {offsets = [0, 8], sizes = [128, 8], strides = [1, 1]} : vector<128x24xf32> to vector<128x8xf32>
    %102 = arith.truncf %101 : vector<128x8xf32> to vector<128x8xbf16>
    %103 = vector.extract_strided_slice %98 {offsets = [0, 16], sizes = [128, 8], strides = [1, 1]} : vector<128x24xf32> to vector<128x8xf32>
    %104 = arith.truncf %103 : vector<128x8xf32> to vector<128x8xbf16>
    %cst_53 = arith.constant dense<0.000000e+00> : vector<128x128xf32>
    %105 = tpu.matmul %100, %102, %cst_53 {dimension_numbers = #tpu.dot_dimension_numbers<[1], [1], [0], [0], [0, 0, 1, 0], [], []>} : vector<128x8xbf16>, vector<128x8xbf16>, vector<128x128xf32> -> vector<128x128xf32>
    %c3 = arith.constant 3 : index
    %c0_54 = arith.constant 0 : index
    %c0_55 = arith.constant 0 : index
    %106 = vector.load %arg4[%c3, %c0_54, %c0_55] : memref<4x128x128xf32, #tpu.memory_space<vmem>>, vector<1x128x128xf32>
    %107 = vector.shape_cast %106 : vector<1x128x128xf32> to vector<128x128xf32>
    %108 = arith.addf %105, %107 : vector<128x128xf32>
    %cst_56 = arith.constant dense<0xFF800000> : vector<128xf32>
    %109 = vector.multi_reduction <maximumf>, %108, %cst_56 [1] : vector<128x128xf32> to vector<128xf32>
    %110 = vector.shape_cast %109 : vector<128xf32> to vector<128x1xf32>
    %111 = vector.broadcast %110 : vector<128x1xf32> to vector<128x128xf32>
    %112 = arith.subf %108, %111 : vector<128x128xf32>
    %113 = math.exp %112 : vector<128x128xf32>
    %cst_57 = arith.constant dense<0.000000e+00> : vector<128xf32>
    %114 = vector.multi_reduction <add>, %113, %cst_57 [1] : vector<128x128xf32> to vector<128xf32>
    %115 = vector.shape_cast %114 : vector<128xf32> to vector<128x1xf32>
    %116 = tpu.reciprocal %115 {approx = true} : vector<128x1xf32> -> vector<128x1xf32>
    %117 = vector.broadcast %116 : vector<128x1xf32> to vector<128x128xf32>
    %118 = arith.mulf %113, %117 : vector<128x128xf32>
    %119 = arith.truncf %118 : vector<128x128xf32> to vector<128x128xbf16>
    %cst_58 = arith.constant dense<0.000000e+00> : vector<128x8xf32>
    %120 = tpu.matmul %119, %104, %cst_58 {dimension_numbers = #tpu.dot_dimension_numbers<[1], [0], [0], [1], [0, 0, 1, 1], [], []>} : vector<128x128xbf16>, vector<128x8xbf16>, vector<128x8xf32> -> vector<128x8xf32>
    %c0_59 = arith.constant 0 : index
    %c0_60 = arith.constant 0 : index
    %121 = vector.load %arg9[%c0_59, %c0_60] : memref<128x32xf32, #tpu.memory_space<vmem>>, vector<128x32xf32>
    %122 = arith.truncf %120 : vector<128x8xf32> to vector<128x8xbf16>
    %c24_61 = arith.constant 24 : index
    %c0_62 = arith.constant 0 : index
    %123 = vector.load %arg5[%c24_61, %c0_62] : memref<32x32xbf16, #tpu.memory_space<vmem>>, vector<8x32xbf16>
    %cst_63 = arith.constant dense<0.000000e+00> : vector<128x32xf32>
    %124 = tpu.matmul %122, %123, %cst_63 {dimension_numbers = #tpu.dot_dimension_numbers<[1], [0], [0], [1], [0, 0, 1, 1], [], []>} : vector<128x8xbf16>, vector<8x32xbf16>, vector<128x32xf32> -> vector<128x32xf32>
    %125 = arith.addf %121, %124 : vector<128x32xf32>
    %c0_64 = arith.constant 0 : index
    %c0_65 = arith.constant 0 : index
    %126 = vector.load %arg9[%c0_64, %c0_65] : memref<128x32xf32, #tpu.memory_space<vmem>>, vector<128x32xf32>
    tpu.vector_store %arg9[%c0_64, %c0_65], %125 {strides = array<i32>} : memref<128x32xf32, #tpu.memory_space<vmem>>, vector<128x32xf32>,
    %c0_66 = arith.constant 0 : index
    %c0_67 = arith.constant 0 : index
    %127 = vector.load %arg9[%c0_66, %c0_67] : memref<128x32xf32, #tpu.memory_space<vmem>>, vector<128x32xf32>
    %c0_68 = arith.constant 0 : index
    %c0_69 = arith.constant 0 : index
    %128 = vector.load %arg6[%c0_68, %c0_69] : memref<1x32xf32, #tpu.memory_space<vmem>>, vector<1x32xf32>
    %129 = vector.shape_cast %128 : vector<1x32xf32> to vector<32xf32>
    %130 = vector.shape_cast %129 : vector<32xf32> to vector<1x32xf32>
    %131 = vector.broadcast %130 : vector<1x32xf32> to vector<128x32xf32>
    %132 = arith.addf %127, %131 : vector<128x32xf32>
    %c0_70 = arith.constant 0 : index
    %c0_71 = arith.constant 0 : index
    %133 = vector.load %arg7[%c0_70, %c0_71] : memref<128x32xf32, #tpu.memory_space<vmem>>, vector<128x32xf32>
    tpu.vector_store %arg7[%c0_70, %c0_71], %132 {strides = array<i32>} : memref<128x32xf32, #tpu.memory_space<vmem>>, vector<128x32xf32>,
    return
  }
  func.func @transform_0(%arg0: i32) -> (i32, i32) {
    %c0_i32 = arith.constant 0 : i32
    %c0_i32_0 = arith.constant 0 : i32
    return %arg0, %c0_i32 : i32, i32
  }
  func.func @transform_1(%arg0: i32) -> (i32, i32) {
    %c0_i32 = arith.constant 0 : i32
    %c0_i32_0 = arith.constant 0 : i32
    %c0_i32_1 = arith.constant 0 : i32
    return %c0_i32, %c0_i32_0 : i32, i32
  }
  func.func @transform_2(%arg0: i32) -> (i32, i32) {
    %c0_i32 = arith.constant 0 : i32
    %c0_i32_0 = arith.constant 0 : i32
    %c0_i32_1 = arith.constant 0 : i32
    return %c0_i32, %c0_i32_0 : i32, i32
  }
  func.func @transform_3(%arg0: i32) -> (i32, i32, i32) {
    %c0_i32 = arith.constant 0 : i32
    %c0_i32_0 = arith.constant 0 : i32
    %c0_i32_1 = arith.constant 0 : i32
    %c0_i32_2 = arith.constant 0 : i32
    return %c0_i32, %c0_i32_0, %c0_i32_1 : i32, i32, i32
  }
  func.func @transform_4(%arg0: i32) -> (i32, i32) {
    %c0_i32 = arith.constant 0 : i32
    %c0_i32_0 = arith.constant 0 : i32
    %c0_i32_1 = arith.constant 0 : i32
    return %c0_i32, %c0_i32_0 : i32, i32
  }
  func.func @transform_5(%arg0: i32) -> (i32, i32) {
    %c0_i32 = arith.constant 0 : i32
    %c0_i32_0 = arith.constant 0 : i32
    %c0_i32_1 = arith.constant 0 : i32
    return %c0_i32, %c0_i32_0 : i32, i32
  }
  func.func @transform_6(%arg0: i32) -> (i32, i32) {
    %c0_i32 = arith.constant 0 : i32
    %c0_i32_0 = arith.constant 0 : i32
    return %arg0, %c0_i32 : i32, i32
  }
}

</mosaic_0001>

<bundles_post_ra>
// kernel: tpu_custom_call.1
= control target key start
LH: loop header
LB: loop body
LE: loop exit
PB: predicated region body
PF: predicated region fallthrough
CT: control target
= control target key end

     0   :  { %11 = vsyncpa [#allocation5], 0  ;;  %s2832_s24 = smov [#allocation4]   ;;  %s2833_s26 = smov 128   ;;  %s3951_s0 = inlined_call_operand.vmem [shape: bf16[128,32], index: 0, kind: input, shape index: {}]   ;;  %s3952_s1 = inlined_call_operand.vmem [shape: bf16[32,96], index: 1, kind: input, shape index: {}]   ;;  %s3953_s2 = inlined_call_operand.vmem [shape: f32[1,96], index: 2, kind: input, shape index: {}]   ;;  %s3954_s3 = inlined_call_operand.hbm [shape: f32[4,128,128], index: 3, kind: input, shape index: {}]   ;;  %s3955_s4 = inlined_call_operand.vmem [shape: bf16[32,32], index: 4, kind: input, shape index: {}]   ;;  %s3956_s5 = inlined_call_operand.vmem [shape: f32[1,32], index: 5, kind: input, shape index: {}]   ;;  %s3957_s6 = inlined_call_operand.vmem [shape: f32[128,32], index: 6, kind: output, shape index: {}]  }
   0x1   :  { %s22_s23 = sshll.u32 %s3954_s3, 4  ;;  %s24_s25 = sshll.u32 %s2832_s24, 4  ;;  %s23_s23 = int_to_ptr.hbm [resolvable:$true] %s22_s23  ;;  %s25_s25 = int_to_ptr.vmem [resolvable:$true] %s24_s25 }
   0x2   :  { %s2834_s27 = smov 8  }
   0x3   :  { %30 = dma.hbm_to_vmem [thread:$0]  %s23_s23, 8192, %s25_s25, [#allocation5], %s2833_s26, %s2833_s26, %s2834_s27  }
   0x4   :  { %2830 = dma.done.wait [#allocation5], 8192  }
   0x5   :  { %2831 = vsyncadd [#allocation5], 4294959104  ;;  %v2530_v0 = vld [vmem:[%s3952_s1 + $0x8] sm:$0xff]  ;;  %v2529_v1 = vld [vmem:[%s3952_s1] sm:$0xff]  ;;  %vm116_vm0 = vcmask 261120   ;;  %vm190_vm1 = vcmask 785408  }
   0x6   :  { %147 = vmatpush.bf16.msra.mxu0 %v2530_v0  ;;  %v2521_v2 = vld [vmem:[%s3951_s0] sm:$0xff]  ;;  %v2522_v3 = vld [vmem:[%s3951_s0 + $0x8] sm:$0xff]  ;;  %v2523_v4 = vld [vmem:[%s3951_s0 + $0x10] sm:$0xff]  ;;  %vm287_vm2 = vcmask 64512   ;;  %s2837_s24 = smov 96   ;;  %vm659_vm3 = vcmask 1043456  }
   0x7   :  { %v2524_v5 = vld [vmem:[%s3951_s0 + $0x18] sm:$0xff]  ;;  %v2525_v6 = vld [vmem:[%s3951_s0 + $0x20] sm:$0xff]  ;;  %v2526_v7 = vld [vmem:[%s3951_s0 + $0x28] sm:$0xff]  ;;  %s2838_s27 = smov 104   ;;  %s2839_s28 = smov 88  }
   0x8   :  { %v2527_v8 = vld [vmem:[%s3951_s0 + $0x30] sm:$0xff]  ;;  %v2528_v9 = vld [vmem:[%s3951_s0 + $0x38] sm:$0xff]  ;;  %v2926_v10 = vld [vmem:[%s3953_s2] ss:$0 sm:$0xff]  ;;  %s2835_s0 = smov 120   ;;  %s2836_s2 = smov 112  }
   0x9   :  { %s2841_s29 = smov 72   ;;  %s2842_s8 = smov 48  }
   0xa   :  { %148 = vmatpush.bf16.msra.mxu0 %v2529_v1  ;;  %s2843_s3 = smov 80   ;;  %s2844_s9 = smov 56  }
   0xb   :  { %s2845_s10 = smov 64   ;;  %s2846_s11 = smov 40  }
   0xd   :  { %2449 = vmatmul.msk.bf16.vlgmr.msra.gmra.mxu0 %vm116_vm0, %v2521_v2 }
  0x1d   :  { %2450 = vmatmul.msk.bf16.gmra.mxu0 %vm116_vm0, %v2522_v3 }
  0x2d   :  { %2451 = vmatmul.msk.bf16.gmra.mxu0 %vm116_vm0, %v2523_v4 }
  0x3d   :  { %2452 = vmatmul.msk.bf16.gmra.mxu0 %vm116_vm0, %v2524_v5 }
  0x4d   :  { %2453 = vmatmul.msk.bf16.gmra.mxu0 %vm116_vm0, %v2525_v6 }
  0x5d   :  { %2454 = vmatmul.msk.bf16.gmra.mxu0 %vm116_vm0, %v2526_v7 }
  0x6d   :  { %2455 = vmatmul.msk.bf16.gmra.mxu0 %vm116_vm0, %v2527_v8 }
  0x7d   :  { %2456 = vmatmul.msk.bf16.gmra.mxu0 %vm116_vm0, %v2528_v9 }
  0x8a   :  { %v150_v11 = vpop.f32.mrf.mxu0 }
  0x8b   :  { %v151_v12 = vadd.f32 %v2926_v10, %v150_v11 }
  0x8d   :  { %191 = vst.msk [vmem:[#allocation2] sm:$0xff] %vm190_vm1, %v151_v12 }
  0x92   :  { %v152_v13 = vpop.f32.mrf.mxu0 }
  0x93   :  { %v153_v14 = vadd.f32 %v2926_v10, %v152_v13 }
  0x94   :  { %v223_v56 = vld [vmem:[#allocation2] sm:$0xff] }
  0x95   :  { %192 = vst.msk [vmem:[#allocation2 + $0x8] sm:$0xff] %vm190_vm1, %v153_v14 }
  0x9a   :  { %v155_v15 = vpop.f32.mrf.mxu0 }
  0x9b   :  { %v156_v16 = vadd.f32 %v2926_v10, %v155_v15 }
  0x9c   :  { %v224_v52 = vld [vmem:[#allocation2 + $0x8] sm:$0xff] }
  0x9d   :  { %193 = vst.msk [vmem:[#allocation2 + $0x10] sm:$0xff] %vm190_vm1, %v156_v16  ;;  %v2976_v58 = vpack.c.bf16 %v224_v52, %v223_v56 }
  0xa2   :  { %v157_v17 = vpop.f32.mrf.mxu0 }
  0xa3   :  { %v158_v18 = vadd.f32 %v2926_v10, %v157_v17 }
  0xa4   :  { %v225_v1 = vld [vmem:[#allocation2 + $0x10] sm:$0xff] }
  0xa5   :  { %194 = vst.msk [vmem:[#allocation2 + $0x18] sm:$0xff] %vm190_vm1, %v158_v18 }
  0xaa   :  { %v160_v19 = vpop.f32.mrf.mxu0 }
  0xab   :  { %v161_v20 = vadd.f32 %v2926_v10, %v160_v19 }
  0xac   :  { %v226_v0 = vld [vmem:[#allocation2 + $0x18] sm:$0xff] }
  0xad   :  { %195 = vst.msk [vmem:[#allocation2 + $0x20] sm:$0xff] %vm190_vm1, %v161_v20  ;;  %v2996_v2 = vpack.c.bf16 %v226_v0, %v225_v1 }
  0xb2   :  { %v162_v21 = vpop.f32.mrf.mxu0 }
  0xb3   :  { %v163_v22 = vadd.f32 %v2926_v10, %v162_v21 }
  0xb4   :  { %v227_v35 = vld [vmem:[#allocation2 + $0x20] sm:$0xff] }
  0xb5   :  { %196 = vst.msk [vmem:[#allocation2 + $0x28] sm:$0xff] %vm190_vm1, %v163_v22 }
  0xba   :  { %v165_v23 = vpop.f32.mrf.mxu0 }
  0xbb   :  { %v166_v24 = vadd.f32 %v2926_v10, %v165_v23 }
  0xbc   :  { %v228_v33 = vld [vmem:[#allocation2 + $0x28] sm:$0xff] }
  0xbd   :  { %197 = vst.msk [vmem:[#allocation2 + $0x30] sm:$0xff] %vm190_vm1, %v166_v24  ;;  %v2952_v36 = vpack.c.bf16 %v228_v33, %v227_v35  ;;  %v247_v24 = vld [vmem:[#allocation4] sm:$0xff] }
  0xc2   :  { %v167_v25 = vpop.f32.mrf.mxu0 }
  0xc3   :  { %v168_v26 = vadd.f32 %v2926_v10, %v167_v25 }
  0xc4   :  { %v229_v29 = vld [vmem:[#allocation2 + $0x30] sm:$0xff] }
  0xc5   :  { %198 = vst.msk [vmem:[#allocation2 + $0x38] sm:$0xff] %vm190_vm1, %v168_v26 }
  0xca   :  { %v170_v27 = vpop.f32.mrf.mxu0 }
  0xcb   :  { %v171_v28 = vadd.f32 %v2926_v10, %v170_v27  ;;  %v248_v27 = vld [vmem:[#allocation4 + $0x8] sm:$0xff] }
  0xcc   :  { %v230_v30 = vld [vmem:[#allocation2 + $0x38] sm:$0xff] }
  0xcd   :  { %199 = vst.msk [vmem:[#allocation2 + $0x40] sm:$0xff] %vm190_vm1, %v171_v28  ;;  %v2946_v31 = vpack.c.bf16 %v230_v30, %v229_v29  ;;  %v249_v30 = vld [vmem:[#allocation4 + $0x10] sm:$0xff] }
  0xcf   :  { %277 = vrot.lane.b32.xlu2 %v2946_v31, %s2835_s0 }
  0xd2   :  { %v172_v32 = vpop.f32.mrf.mxu0 }
  0xd3   :  { %v173_v34 = vadd.f32 %v2926_v10, %v172_v32 }
  0xd4   :  { %v231_v49 = vld [vmem:[#allocation2 + $0x40] sm:$0xff] }
  0xd5   :  { %200 = vst.msk [vmem:[#allocation2 + $0x48] sm:$0xff] %vm190_vm1, %v173_v34  ;;  %v250_v34 = vld [vmem:[#allocation4 + $0x18] sm:$0xff] }
  0xd7   :  { %275 = vrot.lane.b32.xlu2 %v2952_v36, %s2835_s0 }
  0xda   :  { %v175_v37 = vpop.f32.mrf.mxu0 }
  0xdb   :  { %v176_v38 = vadd.f32 %v2926_v10, %v175_v37 }
  0xdc   :  { %v232_v47 = vld [vmem:[#allocation2 + $0x48] sm:$0xff] }
  0xdd   :  { %201 = vst.msk [vmem:[#allocation2 + $0x50] sm:$0xff] %vm190_vm1, %v176_v38  ;;  %v2968_v50 = vpack.c.bf16 %v232_v47, %v231_v49  ;;  %v251_v38 = vld [vmem:[#allocation4 + $0x20] sm:$0xff] }
  0xe2   :  { %v177_v39 = vpop.f32.mrf.mxu0 }
  0xe3   :  { %v178_v40 = vadd.f32 %v2926_v10, %v177_v39 }
  0xe4   :  { %v233_v43 = vld [vmem:[#allocation2 + $0x50] sm:$0xff] }
  0xe5   :  { %202 = vst.msk [vmem:[#allocation2 + $0x58] sm:$0xff] %vm190_vm1, %v178_v40 }
  0xea   :  { %v180_v41 = vpop.f32.mrf.mxu0 }
  0xeb   :  { %v181_v42 = vadd.f32 %v2926_v10, %v180_v41  ;;  %v252_v41 = vld [vmem:[#allocation4 + $0x28] sm:$0xff] }
  0xec   :  { %v234_v44 = vld [vmem:[#allocation2 + $0x58] sm:$0xff] }
  0xed   :  { %203 = vst.msk [vmem:[#allocation2 + $0x60] sm:$0xff] %vm190_vm1, %v181_v42  ;;  %v2962_v45 = vpack.c.bf16 %v234_v44, %v233_v43  ;;  %v253_v44 = vld [vmem:[#allocation4 + $0x30] sm:$0xff] }
  0xef   :  { %281 = vrot.lane.b32.xlu1 %v2962_v45, %s2835_s0 }
  0xf2   :  { %v182_v46 = vpop.f32.mrf.mxu0 }
  0xf3   :  { %v183_v48 = vadd.f32 %v2926_v10, %v182_v46 }
  0xf4   :  { %v235_v54 = vld [vmem:[#allocation2 + $0x60] sm:$0xff] }
  0xf5   :  { %204 = vst.msk [vmem:[#allocation2 + $0x68] sm:$0xff] %vm190_vm1, %v183_v48  ;;  %v254_v48 = vld [vmem:[#allocation4 + $0x38] sm:$0xff] }
  0xf7   :  { %279 = vrot.lane.b32.xlu1 %v2968_v50, %s2835_s0 }
  0xfa   :  { %v185_v51 = vpop.f32.mrf.mxu0 }
  0xfb   :  { %v186_v53 = vadd.f32 %v2926_v10, %v185_v51 }
  0xfc   :  { %v236_v55 = vld [vmem:[#allocation2 + $0x68] sm:$0xff] }
  0xfd   :  { %205 = vst.msk [vmem:[#allocation2 + $0x70] sm:$0xff] %vm190_vm1, %v186_v53  ;;  %v2974_v57 = vpack.c.bf16 %v236_v55, %v235_v54  ;;  %v255_v53 = vld [vmem:[#allocation4 + $0x40] sm:$0xff] }
  0xff   :  { %549 = vrot.lane.b32.xlu2 %v2974_v57, %s2836_s2  ;;  %271 = vrot.lane.b32.xlu1 %v2976_v58, %s2835_s0 }
 0x102   :  { %v187_v59 = vpop.f32.mrf.mxu0 }
 0x103   :  { %v188_v60 = vadd.f32 %v2926_v10, %v187_v59 }
 0x104   :  { %v237_v61 = vld [vmem:[#allocation2 + $0x70] sm:$0xff] }
 0x105   :  { %206 = vst.msk [vmem:[#allocation2 + $0x78] sm:$0xff] %vm190_vm1, %v188_v60 }
 0x107   :  { %545 = vrot.lane.b32.xlu1 %v2968_v50, %s2836_s2 }
 0x10c   :  { %v238_v62 = vld [vmem:[#allocation2 + $0x78] sm:$0xff] }
 0x10d   :  { %v2986_v63 = vpack.c.bf16 %v238_v62, %v237_v61 }
 0x10f   :  { %285 = vrot.lane.b32.xlu0 %v2986_v63, %s2835_s0  ;;  %543 = vrot.lane.b32.xlu1 %v2946_v31, %s2836_s2 }
 0x117   :  { %283 = vrot.lane.b32.xlu0 %v2974_v57, %s2835_s0  ;;  %551 = vrot.lane.b32.xlu1 %v2986_v63, %s2836_s2 }
 0x11f   :  { %273 = vrot.lane.b32.xlu0 %v2996_v2, %s2835_s0 }
 0x127   :  { %547 = vrot.lane.b32.xlu0 %v2962_v45, %s2836_s2 }
 0x129   :  { %v278_v7 = vpop.permute.xlu2 %277 }
 0x12a   :  { %v322_v20 = vsel %vm287_vm2, %v278_v7, 0 }
 0x131   :  { %v276_v11 = vpop.permute.xlu2 %275 }
 0x132   :  { %v319_v21 = vsel %vm287_vm2, %v276_v11, 0 }
 0x159   :  { %v550_v15 = vpop.permute.xlu2 %549 }
 0x161   :  { %v282_v3 = vpop.permute.xlu1 %281 }
 0x162   :  { %v328_v17 = vsel %vm287_vm2, %v282_v3, 0 }
 0x169   :  { %v280_v4 = vpop.permute.xlu1 %279 }
 0x16a   :  { %v325_v19 = vsel %vm287_vm2, %v280_v4, 0 }
 0x171   :  { %v272_v5 = vpop.permute.xlu1 %271 }
 0x172   :  { %v313_v23 = vsel %vm287_vm2, %v272_v5, 0 }
 0x179   :  { %v546_v6 = vpop.permute.xlu1 %545 }
 0x181   :  { %v286_v8 = vpop.permute.xlu0 %285  ;;  %v544_v9 = vpop.permute.xlu1 %543 }
 0x182   :  { %v334_v10 = vsel %vm287_vm2, %v286_v8, 0 }
 0x183   :  { %336 = vmatpush.bf16.xpose.msra.mxu1 %v334_v10  ;;  %v258_v10 = vld [vmem:[#allocation4 + $0x58] sm:$0xff] }
 0x189   :  { %v284_v12 = vpop.permute.xlu0 %283  ;;  %v552_v13 = vpop.permute.xlu1 %551 }
 0x18a   :  { %561 = vmatpush.bf16.msra.mxu2 %v552_v13  ;;  %v331_v14 = vsel %vm287_vm2, %v284_v12, 0  ;;  %v259_v12 = vld [vmem:[#allocation4 + $0x60] sm:$0xff] }
 0x18b   :  { %337 = vmatpush.bf16.xpose.msra.mxu1 %v331_v14 }
 0x18e   :  { %562 = vmatpush.bf16.msra.mxu2 %v550_v15 }
 0x191   :  { %v274_v16 = vpop.permute.xlu0 %273 }
 0x192   :  { %v316_v22 = vsel %vm287_vm2, %v274_v16, 0 }
 0x193   :  { %338 = vmatpush.bf16.xpose.msra.mxu1 %v328_v17 }
 0x199   :  { %v548_v18 = vpop.permute.xlu0 %547 }
 0x19a   :  { %563 = vmatpush.bf16.msra.mxu2 %v548_v18 }
 0x19b   :  { %339 = vmatpush.bf16.xpose.msra.mxu1 %v325_v19 }
 0x19e   :  { %564 = vmatpush.bf16.msra.mxu2 %v546_v6 }
 0x1a2   :  { %565 = vmatpush.bf16.msra.mxu2 %v544_v9 }
 0x1a3   :  { %340 = vmatpush.bf16.xpose.msra.mxu1 %v322_v20 }
 0x1ab   :  { %341 = vmatpush.bf16.xpose.msra.mxu1 %v319_v21 }
 0x1b3   :  { %342 = vmatpush.bf16.xpose.msra.mxu1 %v316_v22 }
 0x1bb   :  { %343 = vmatpush.bf16.xpose.msra.mxu1 %v313_v23 }
 0x1c2   :  { %2457 = vmatmul.msk.bf16.vlgmr.msra.gmra.mxu1 %vm287_vm2, %v2976_v58 }
 0x1d2   :  { %2458 = vmatmul.msk.bf16.gmra.mxu1 %vm287_vm2, %v2996_v2 }
 0x1e2   :  { %2459 = vmatmul.msk.bf16.gmra.mxu1 %vm287_vm2, %v2952_v36 }
 0x1f2   :  { %2460 = vmatmul.msk.bf16.gmra.mxu1 %vm287_vm2, %v2946_v31 }
 0x202   :  { %2461 = vmatmul.msk.bf16.gmra.mxu1 %vm287_vm2, %v2968_v50 }
 0x212   :  { %2462 = vmatmul.msk.bf16.gmra.mxu1 %vm287_vm2, %v2962_v45 }
 0x222   :  { %2463 = vmatmul.msk.bf16.gmra.mxu1 %vm287_vm2, %v2974_v57 }
 0x232   :  { %2464 = vmatmul.msk.bf16.gmra.mxu1 %vm287_vm2, %v2986_v63 }
 0x23f   :  { %v345_v25 = vpop.f32.mrf.mxu1 }
 0x240   :  { %v346_v26 = vadd.f32 %v345_v25, %v247_v24 }
 0x242   :  { %385 = vmax.xlane.f32.xlu2 %v346_v26 }
 0x247   :  { %v347_v28 = vpop.f32.mrf.mxu1 }
 0x248   :  { %v348_v29 = vadd.f32 %v347_v28, %v248_v27  ;;  %v256_v28 = vld [vmem:[#allocation4 + $0x48] sm:$0xff] }
 0x24a   :  { %387 = vmax.xlane.f32.xlu0 %v348_v29 }
 0x24f   :  { %v350_v32 = vpop.f32.mrf.mxu1 }
 0x250   :  { %v3026_v33 = vadd.f32 %v350_v32, %v249_v30 }
 0x252   :  { %389 = vmax.xlane.f32.xlu1 %v3026_v33 }
 0x257   :  { %v352_v35 = vpop.f32.mrf.mxu1 }
 0x258   :  { %v353_v37 = vadd.f32 %v352_v35, %v250_v34 }
 0x25a   :  { %391 = vmax.xlane.f32.xlu2 %v353_v37 }
 0x25f   :  { %v355_v39 = vpop.f32.mrf.mxu1 }
 0x260   :  { %v3029_v40 = vadd.f32 %v355_v39, %v251_v38 }
 0x262   :  { %393 = vmax.xlane.f32.xlu2 %v3029_v40 }
 0x267   :  { %v357_v42 = vpop.f32.mrf.mxu1 }
 0x268   :  { %v358_v43 = vadd.f32 %v357_v42, %v252_v41 }
 0x26a   :  { %395 = vmax.xlane.f32.xlu0 %v358_v43 }
 0x26f   :  { %v360_v46 = vpop.f32.mrf.mxu1 }
 0x270   :  { %v3032_v47 = vadd.f32 %v360_v46, %v253_v44  ;;  %v262_v46 = vld [vmem:[#allocation4 + $0x78] sm:$0xff] }
 0x272   :  { %397 = vmax.xlane.f32.xlu0 %v3032_v47 }
 0x277   :  { %v362_v49 = vpop.f32.mrf.mxu1 }
 0x278   :  { %v363_v51 = vadd.f32 %v362_v49, %v254_v48  ;;  %v260_v48 = vld [vmem:[#allocation4 + $0x68] sm:$0xff] }
 0x27a   :  { %399 = vmax.xlane.f32.xlu2 %v363_v51 }
 0x27f   :  { %v365_v54 = vpop.f32.mrf.mxu1 }
 0x280   :  { %v3037_v59 = vadd.f32 %v365_v54, %v255_v53 }
 0x287   :  { %v367_v1 = vpop.f32.mrf.mxu1 }
 0x28f   :  { %v370_v6 = vpop.f32.mrf.mxu1 }
 0x292   :  { %541 = vrot.lane.b32.xlu2 %v2952_v36, %s2836_s2 }
 0x297   :  { %v372_v9 = vpop.f32.mrf.mxu1 }
 0x298   :  { %v3053_v11 = vadd.f32 %v372_v9, %v258_v10 }
 0x29f   :  { %v375_v13 = vpop.f32.mrf.mxu1 }
 0x2a0   :  { %v3056_v15 = vadd.f32 %v375_v13, %v259_v12 }
 0x2a7   :  { %v377_v30 = vpop.f32.mrf.mxu1 }
 0x2a8   :  { %v3083_v49 = vadd.f32 %v377_v30, %v260_v48 }
 0x2af   :  { %v380_v42 = vpop.f32.mrf.mxu1 }
 0x2b5   :  { %v386_v52 = vpop.xlane.xlu2 %385 }
 0x2b6   :  { %v417_v55 = vsub.f32 %v346_v26, %v386_v52 }
 0x2b8   :  { %v433_v56 = vmul.f32 1.442695, %v417_v55 }
 0x2ba   :  { %2550 = vpow2.f32 %v433_v56 }
 0x2bb   :  { %401 = vmax.xlane.f32.xlu2 %v3037_v59 }
 0x2bd   :  { %v388_v60 = vpop.xlane.xlu0 %387 }
 0x2be   :  { %v418_v61 = vsub.f32 %v348_v29, %v388_v60 }
 0x2c0   :  { %v3040_v62 = vpop.eup %2550  ;;  %v435_v0 = vmul.f32 1.442695, %v418_v61 }
 0x2c1   :  { %465 = vadd.xlane.f32.xlu1 %v3040_v62 }
 0x2c2   :  { %2552 = vpow2.f32 %v435_v0 }
 0x2c5   :  { %v390_v19 = vpop.xlane.xlu1 %389 }
 0x2c6   :  { %v419_v20 = vsub.f32 %v3026_v33, %v390_v19  ;;  %v368_v33 = vadd.f32 %v367_v1, %v256_v28 }
 0x2c8   :  { %v3043_v3 = vpop.eup %2552  ;;  %v437_v24 = vmul.f32 1.442695, %v419_v20 }
 0x2c9   :  { %467 = vadd.xlane.f32.xlu0 %v3043_v3 }
 0x2cd   :  { %v392_v4 = vpop.xlane.xlu2 %391 }
 0x2ce   :  { %v420_v5 = vsub.f32 %v353_v37, %v392_v4  ;;  %v257_v37 = vld [vmem:[#allocation4 + $0x50] sm:$0xff] }
 0x2cf   :  { %v3071_v41 = vadd.f32 %v370_v6, %v257_v37 }
 0x2d0   :  { %v439_v7 = vmul.f32 1.442695, %v420_v5 }
 0x2d2   :  { %2554 = vpow2.f32 %v439_v7 }
 0x2d5   :  { %v394_v14 = vpop.xlane.xlu2 %393 }
 0x2d6   :  { %v421_v34 = vsub.f32 %v3029_v40, %v394_v14  ;;  %v382_v40 = vpop.f32.mrf.mxu1 }
 0x2d8   :  { %v3046_v8 = vpop.eup %2554  ;;  %v441_v39 = vmul.f32 1.442695, %v421_v34 }
 0x2d9   :  { %471 = vadd.xlane.f32.xlu2 %v3046_v8 }
 0x2da   :  { %537 = vrot.lane.b32.xlu1 %v2976_v58, %s2836_s2 }
 0x2dd   :  { %539 = vrot.lane.b32.xlu0 %v2996_v2, %s2836_s2  ;;  %v396_v23 = vpop.xlane.xlu0 %395 }
 0x2de   :  { %v422_v25 = vsub.f32 %v358_v43, %v396_v23 }
 0x2e0   :  { %v443_v26 = vmul.f32 1.442695, %v422_v25 }
 0x2e1   :  { %407 = vmax.xlane.f32.xlu2 %v3053_v11 }
 0x2e5   :  { %v398_v27 = vpop.xlane.xlu0 %397 }
 0x2e6   :  { %v423_v32 = vsub.f32 %v3032_v47, %v398_v27  ;;  %v3080_v47 = vadd.f32 %v382_v40, %v262_v46 }
 0x2e8   :  { %v445_v35 = vmul.f32 1.442695, %v423_v32 }
 0x2e9   :  { %409 = vmax.xlane.f32.xlu2 %v3056_v15 }
 0x2ed   :  { %v400_v16 = vpop.xlane.xlu2 %399 }
 0x2ee   :  { %v424_v17 = vsub.f32 %v363_v51, %v400_v16  ;;  %v261_v51 = vld [vmem:[#allocation4 + $0x70] sm:$0xff] }
 0x2ef   :  { %v3086_v52 = vadd.f32 %v380_v42, %v261_v51 }
 0x2f0   :  { %v447_v18 = vmul.f32 1.442695, %v424_v17 }
 0x2f2   :  { %2556 = vpow2.f32 %v447_v18 }
 0x2f3   :  { %2558 = vpow2.f32 %v437_v24 }
 0x2f4   :  { %2560 = vpow2.f32 %v443_v26 }
 0x2f5   :  { %v542_v21 = vpop.permute.xlu2 %541  ;;  %2562 = vpow2.f32 %v445_v35 }
 0x2f6   :  { %566 = vmatpush.bf16.msra.mxu2 %v542_v21  ;;  %2564 = vpow2.f32 %v441_v39 }
 0x2f8   :  { %v3060_v22 = vpop.eup %2556 }
 0x2f9   :  { %479 = vadd.xlane.f32.xlu2 %v3060_v22  ;;  %v3063_v29 = vpop.eup %2558 }
 0x2fa   :  { %v3068_v38 = vpop.eup %2560 }
 0x2fb   :  { %v3074_v43 = vpop.eup %2562 }
 0x2fc   :  { %v3077_v44 = vpop.eup %2564 }
 0x304   :  { %469 = vadd.xlane.f32.xlu1 %v3063_v29 }
 0x307   :  { %403 = vmax.xlane.f32.xlu0 %v368_v33 }
 0x30c   :  { %475 = vadd.xlane.f32.xlu1 %v3068_v38 }
 0x30f   :  { %405 = vmax.xlane.f32.xlu0 %v3071_v41 }
 0x314   :  { %477 = vadd.xlane.f32.xlu1 %v3074_v43 }
 0x317   :  { %473 = vadd.xlane.f32.xlu0 %v3077_v44 }
 0x31c   :  { %415 = vmax.xlane.f32.xlu1 %v3080_v47 }
 0x31f   :  { %411 = vmax.xlane.f32.xlu0 %v3083_v49 }
 0x327   :  { %413 = vmax.xlane.f32.xlu0 %v3086_v52 }
 0x32e   :  { %v402_v53 = vpop.xlane.xlu2 %401 }
 0x32f   :  { %v425_v54 = vsub.f32 %v3037_v59, %v402_v53 }
 0x331   :  { %v449_v55 = vmul.f32 1.442695, %v425_v54 }
 0x333   :  { %2566 = vpow2.f32 %v449_v55 }
 0x334   :  { %v466_v61 = vpop.xlane.xlu1 %465 }
 0x339   :  { %v3090_v56 = vpop.eup %2566 }
 0x33a   :  { %481 = vadd.xlane.f32.xlu2 %v3090_v56 }
 0x33c   :  { %v468_v60 = vpop.xlane.xlu0 %467 }
 0x33d   :  { %2568 = vrcp.f32 %v468_v60 }
 0x33e   :  { %2570 = vrcp.f32 %v466_v61 }
 0x343   :  { %v2569_v1 = vpop.eup %2568 }
 0x344   :  { %v2571_v5 = vpop.eup %2570  ;;  %v514_v6 = vmul.f32 %v2569_v1, %v3043_v3 }
 0x345   :  { %v513_v59 = vmul.f32 %v2571_v5, %v3040_v62 }
 0x347   :  { %v529_v12 = vpack.c.bf16 %v514_v6, %v513_v59 }
 0x34c   :  { %v472_v0 = vpop.xlane.xlu2 %471  ;;  %v538_v7 = vpop.permute.xlu1 %537 }
 0x34f   :  { %v540_v4 = vpop.permute.xlu0 %539 }
 0x350   :  { %567 = vmatpush.bf16.msra.mxu2 %v540_v4 }
 0x354   :  { %v408_v9 = vpop.xlane.xlu2 %407  ;;  %568 = vmatpush.bf16.msra.mxu2 %v538_v7 }
 0x355   :  { %v428_v10 = vsub.f32 %v3053_v11, %v408_v9 }
 0x357   :  { %v455_v13 = vmul.f32 1.442695, %v428_v10  ;;  %569 = vmatmul.bf16.vlgmr.msra.gmra.mxu2 %v529_v12 }
 0x359   :  { %2572 = vpow2.f32 %v455_v13 }
 0x35a   :  { %2574 = vrcp.f32 %v472_v0 }
 0x35c   :  { %v410_v3 = vpop.xlane.xlu2 %409 }
 0x35d   :  { %v429_v21 = vsub.f32 %v3056_v15, %v410_v3 }
 0x35f   :  { %v3096_v14 = vpop.eup %2572  ;;  %v457_v26 = vmul.f32 1.442695, %v429_v21 }
 0x360   :  { %487 = vadd.xlane.f32.xlu2 %v3096_v14  ;;  %v2575_v19 = vpop.eup %2574 }
 0x361   :  { %v516_v24 = vmul.f32 %v2575_v19, %v3046_v8 }
 0x36c   :  { %v480_v54 = vpop.xlane.xlu2 %479 }
 0x377   :  { %v470_v16 = vpop.xlane.xlu1 %469 }
 0x378   :  { %2576 = vrcp.f32 %v470_v16 }
 0x37a   :  { %v404_v17 = vpop.xlane.xlu0 %403 }
 0x37b   :  { %v426_v18 = vsub.f32 %v368_v33, %v404_v17 }
 0x37d   :  { %v451_v62 = vmul.f32 1.442695, %v426_v18 }
 0x37e   :  { %v2577_v20 = vpop.eup %2576 }
 0x37f   :  { %2578 = vpow2.f32 %v451_v62  ;;  %v476_v11 = vpop.xlane.xlu1 %475  ;;  %v515_v23 = vmul.f32 %v2577_v20, %v3063_v29 }
 0x380   :  { %2580 = vpow2.f32 %v457_v26 }
 0x381   :  { %v530_v25 = vpack.c.bf16 %v516_v24, %v515_v23 }
 0x382   :  { %v406_v27 = vpop.xlane.xlu0 %405 }
 0x383   :  { %v427_v28 = vsub.f32 %v3071_v41, %v406_v27  ;;  %574 = vmatmul.bf16.gmra.mxu2 %v530_v25 }
 0x385   :  { %v3103_v30 = vpop.eup %2578  ;;  %v453_v32 = vmul.f32 1.442695, %v427_v28 }
 0x386   :  { %483 = vadd.xlane.f32.xlu0 %v3103_v30  ;;  %v3106_v29 = vpop.eup %2580 }
 0x387   :  { %2582 = vpow2.f32 %v453_v32  ;;  %v478_v15 = vpop.xlane.xlu1 %477 }
 0x388   :  { %2584 = vrcp.f32 %v476_v11 }
 0x38a   :  { %v474_v33 = vpop.xlane.xlu0 %473 }
 0x38b   :  { %2586 = vrcp.f32 %v474_v33 }
 0x38d   :  { %v3108_v8 = vpop.eup %2582 }
 0x38e   :  { %489 = vadd.xlane.f32.xlu0 %v3106_v29  ;;  %485 = vadd.xlane.f32.xlu1 %v3108_v8  ;;  %v2585_v34 = vpop.eup %2584 }
 0x38f   :  { %v416_v35 = vpop.xlane.xlu1 %415  ;;  %v518_v46 = vmul.f32 %v2585_v34, %v3068_v38 }
 0x390   :  { %v432_v37 = vsub.f32 %v3080_v47, %v416_v35 }
 0x391   :  { %v2587_v39 = vpop.eup %2586 }
 0x392   :  { %v463_v41 = vmul.f32 1.442695, %v432_v37  ;;  %v412_v42 = vpop.xlane.xlu0 %411  ;;  %v517_v40 = vmul.f32 %v2587_v39, %v3077_v44 }
 0x393   :  { %v430_v48 = vsub.f32 %v3083_v49, %v412_v42 }
 0x394   :  { %2588 = vpow2.f32 %v463_v41  ;;  %v531_v51 = vpack.c.bf16 %v518_v46, %v517_v40 }
 0x395   :  { %v459_v53 = vmul.f32 1.442695, %v430_v48  ;;  %2590 = vrcp.f32 %v478_v15 }
 0x396   :  { %579 = vmatmul.bf16.gmra.mxu2 %v531_v51 }
 0x397   :  { %2592 = vpow2.f32 %v459_v53 }
 0x398   :  { %2594 = vrcp.f32 %v480_v54 }
 0x39a   :  { %v3116_v55 = vpop.eup %2588  ;;  %v414_v47 = vpop.xlane.xlu0 %413 }
 0x39b   :  { %v431_v60 = vsub.f32 %v3086_v52, %v414_v47  ;;  %495 = vadd.xlane.f32.xlu0 %v3116_v55  ;;  %v2591_v44 = vpop.eup %2590 }
 0x39c   :  { %v519_v0 = vmul.f32 %v2591_v44, %v3074_v43  ;;  %v2840_v44 = vmov 0.0  }
 0x39d   :  { %v3120_v61 = vpop.eup %2592  ;;  %v461_v38 = vmul.f32 1.442695, %v431_v60  ;;  %207 = vst.msk [vmem:[#allocation3] sm:$0xff] %vm116_vm0, %v2840_v44 }
 0x39e   :  { %491 = vadd.xlane.f32.xlu1 %v3120_v61  ;;  %v2595_v49 = vpop.eup %2594  ;;  %208 = vst.msk [vmem:[#allocation3 + $0x8] sm:$0xff] %vm116_vm0, %v2840_v44 }
 0x39f   :  { %2596 = vpow2.f32 %v461_v38  ;;  %v520_v1 = vmul.f32 %v2595_v49, %v3060_v22  ;;  %v634_v22 = vld [vmem:[%s3955_s4] sm:$0xf]  ;;  %209 = vst.msk [vmem:[#allocation3 + $0x10] sm:$0xff] %vm116_vm0, %v2840_v44 }
 0x3a0   :  { %v661_v43 = vsel %vm659_vm3, %v634_v22, 0  ;;  %210 = vst.msk [vmem:[#allocation3 + $0x18] sm:$0xff] %vm116_vm0, %v2840_v44 }
 0x3a1   :  { %v532_v4 = vpack.c.bf16 %v520_v1, %v519_v0  ;;  %670 = vmatpush.bf16.msrb.mxu0 %v661_v43  ;;  %2532 = vmatpush.bf16.msra.mxu3 %v661_v43  ;;  %211 = vst.msk [vmem:[#allocation3 + $0x20] sm:$0xff] %vm116_vm0, %v2840_v44 }
 0x3a2   :  { %2531 = vmatpush.bf16.msrb.mxu2 %v661_v43  ;;  %212 = vst.msk [vmem:[#allocation3 + $0x28] sm:$0xff] %vm116_vm0, %v2840_v44 }
 0x3a3   :  { %213 = vst.msk [vmem:[#allocation3 + $0x30] sm:$0xff] %vm116_vm0, %v2840_v44 }
 0x3a4   :  { %214 = vst.msk [vmem:[#allocation3 + $0x38] sm:$0xff] %vm116_vm0, %v2840_v44 }
 0x3a5   :  { %v3125_v5 = vpop.eup %2596  ;;  %215 = vst.msk [vmem:[#allocation3 + $0x40] sm:$0xff] %vm116_vm0, %v2840_v44 }
 0x3a6   :  { %493 = vadd.xlane.f32.xlu2 %v3125_v5  ;;  %584 = vmatmul.bf16.gmra.mxu2 %v532_v4  ;;  %216 = vst.msk [vmem:[#allocation3 + $0x48] sm:$0xff] %vm116_vm0, %v2840_v44 }
 0x3a7   :  { %217 = vst.msk [vmem:[#allocation3 + $0x50] sm:$0xff] %vm116_vm0, %v2840_v44 }
 0x3a8   :  { %218 = vst.msk [vmem:[#allocation3 + $0x58] sm:$0xff] %vm116_vm0, %v2840_v44 }
 0x3a9   :  { %219 = vst.msk [vmem:[#allocation3 + $0x60] sm:$0xff] %vm116_vm0, %v2840_v44 }
 0x3aa   :  { %220 = vst.msk [vmem:[#allocation3 + $0x68] sm:$0xff] %vm116_vm0, %v2840_v44 }
 0x3ab   :  { %221 = vst.msk [vmem:[#allocation3 + $0x70] sm:$0xff] %vm116_vm0, %v2840_v44 }
 0x3ac   :  { %222 = vst.msk [vmem:[#allocation3 + $0x78] sm:$0xff] %vm116_vm0, %v2840_v44 }
 0x3ad   :  { %v482_v59 = vpop.xlane.xlu2 %481  ;;  %v619_v44 = vld [vmem:[#allocation3 + $0x48] sm:$0xff] }
 0x3ae   :  { %2598 = vrcp.f32 %v482_v59 }
 0x3af   :  { %819 = vrot.lane.b32.xlu0 %v2962_v45, %s2837_s24 }
 0x3b7   :  { %823 = vrot.lane.b32.xlu1 %v2986_v63, %s2837_s24  ;;  %815 = vrot.lane.b32.xlu0 %v2946_v31, %s2837_s24 }
 0x3be   :  { %821 = vrot.lane.b32.xlu2 %v2974_v57, %s2837_s24 }
 0x3bf   :  { %817 = vrot.lane.b32.xlu1 %v2968_v50, %s2837_s24  ;;  %809 = vrot.lane.b32.xlu0 %v2976_v58, %s2837_s24 }
 0x3c6   :  { %813 = vrot.lane.b32.xlu2 %v2952_v36, %s2837_s24 }
 0x3c7   :  { %811 = vrot.lane.b32.xlu1 %v2996_v2, %s2837_s24  ;;  %797 = vrot.lane.b32.xlu0 %v2952_v36, %s2838_s27 }
 0x3ce   :  { %793 = vrot.lane.b32.xlu2 %v2976_v58, %s2838_s27 }
 0x3cf   :  { %795 = vrot.lane.b32.xlu1 %v2996_v2, %s2838_s27  ;;  %803 = vrot.lane.b32.xlu0 %v2962_v45, %s2838_s27 }
 0x3d3   :  { %v488_v17 = vpop.xlane.xlu2 %487 }
 0x3d6   :  { %799 = vrot.lane.b32.xlu2 %v2946_v31, %s2838_s27 }
 0x3d7   :  { %801 = vrot.lane.b32.xlu1 %v2968_v50, %s2838_s27  ;;  %1088 = vrot.lane.b32.xlu0 %v2986_v63, %s2839_s28 }
 0x3da   :  { %v570_v52 = vpop.f32.mrf.mxu2 }
 0x3de   :  { %805 = vrot.lane.b32.xlu2 %v2974_v57, %s2838_s27 }
 0x3df   :  { %807 = vrot.lane.b32.xlu1 %v2986_v63, %s2838_s27  ;;  %1082 = vrot.lane.b32.xlu0 %v2968_v50, %s2839_s28  ;;  %v2599_v63 = vpop.eup %2598 }
 0x3e0   :  { %v521_v50 = vmul.f32 %v2599_v63, %v3090_v56 }
 0x3e2   :  { %v572_v6 = vpop.f32.mrf.mxu2 }
 0x3e3   :  { %v626_v7 = vpack.c.bf16 %v572_v6, %v570_v52 }
 0x3e5   :  { %2465 = vmatmul.msk.bf16.vlgmr.msrb.gmra.mxu0 %vm287_vm2, %v626_v7 }
 0x3e6   :  { %1086 = vrot.lane.b32.xlu2 %v2974_v57, %s2839_s28 }
 0x3e7   :  { %1084 = vrot.lane.b32.xlu1 %v2962_v45, %s2839_s28 }
 0x3ef   :  { %1080 = vrot.lane.b32.xlu1 %v2946_v31, %s2839_s28 }
 0x3f9   :  { %v484_v9 = vpop.xlane.xlu0 %483 }
 0x3fa   :  { %2600 = vrcp.f32 %v484_v9 }
 0x400   :  { %v2601_v10 = vpop.eup %2600 }
 0x401   :  { %v522_v12 = vmul.f32 %v2601_v10, %v3103_v30  ;;  %v486_v13 = vpop.xlane.xlu1 %485  ;;  %v490_v56 = vpop.xlane.xlu0 %489 }
 0x402   :  { %2602 = vrcp.f32 %v486_v13 }
 0x403   :  { %v533_v16 = vpack.c.bf16 %v522_v12, %v521_v50  ;;  %2604 = vrcp.f32 %v488_v17  ;;  %v610_v50 = vld [vmem:[#allocation3] sm:$0xff] }
 0x405   :  { %589 = vmatmul.bf16.gmra.mxu2 %v533_v16 }
 0x406   :  { %v575_v57 = vpop.f32.mrf.mxu2 }
 0x408   :  { %v2603_v45 = vpop.eup %2602 }
 0x409   :  { %v2605_v3 = vpop.eup %2604  ;;  %v523_v19 = vmul.f32 %v2603_v45, %v3108_v8 }
 0x40a   :  { %v524_v62 = vmul.f32 %v2605_v3, %v3096_v14 }
 0x40c   :  { %v534_v21 = vpack.c.bf16 %v524_v62, %v523_v19 }
 0x40e   :  { %v577_v31 = vpop.f32.mrf.mxu2  ;;  %v496_v23 = vpop.xlane.xlu0 %495 }
 0x40f   :  { %v627_v18 = vpack.c.bf16 %v577_v31, %v575_v57  ;;  %v611_v57 = vld [vmem:[#allocation3 + $0x8] sm:$0xff] }
 0x411   :  { %2466 = vmatmul.msk.bf16.gmra.mxu0 %vm287_vm2, %v627_v18  ;;  %v492_v20 = vpop.xlane.xlu1 %491  ;;  %v612_v18 = vld [vmem:[#allocation3 + $0x10] sm:$0xff] }
 0x412   :  { %2606 = vrcp.f32 %v492_v20 }
 0x413   :  { %2608 = vrcp.f32 %v490_v56 }
 0x415   :  { %594 = vmatmul.bf16.gmra.mxu2 %v534_v21  ;;  %v613_v21 = vld [vmem:[#allocation3 + $0x18] sm:$0xff] }
 0x418   :  { %v2607_v24 = vpop.eup %2606 }
 0x419   :  { %v494_v11 = vpop.xlane.xlu2 %493  ;;  %v2609_v25 = vpop.eup %2608  ;;  %v526_v26 = vmul.f32 %v2607_v24, %v3120_v61 }
 0x41a   :  { %v525_v28 = vmul.f32 %v2609_v25, %v3106_v29  ;;  %2610 = vrcp.f32 %v494_v11  ;;  %v580_v39 = vpop.f32.mrf.mxu2 }
 0x41b   :  { %2612 = vrcp.f32 %v496_v23 }
 0x41c   :  { %v535_v32 = vpack.c.bf16 %v526_v26, %v525_v28 }
 0x420   :  { %v2611_v34 = vpop.eup %2610 }
 0x421   :  { %v822_v27 = vpop.permute.xlu2 %821  ;;  %v820_v30 = vpop.permute.xlu0 %819  ;;  %v527_v37 = vmul.f32 %v2611_v34, %v3125_v5 }
 0x422   :  { %v2613_v35 = vpop.eup %2612  ;;  %v868_v46 = vsel %vm287_vm2, %v822_v27, 0  ;;  %v865_v47 = vsel %vm287_vm2, %v820_v30, 0  ;;  %v582_v60 = vpop.f32.mrf.mxu2 }
 0x423   :  { %v528_v29 = vmul.f32 %v2613_v35, %v3116_v55  ;;  %v628_v38 = vpack.c.bf16 %v582_v60, %v580_v39  ;;  %v615_v35 = vld [vmem:[#allocation3 + $0x28] sm:$0xff] }
 0x425   :  { %599 = vmatmul.bf16.gmra.mxu2 %v535_v32  ;;  %v536_v48 = vpack.c.bf16 %v528_v29, %v527_v37  ;;  %v616_v29 = vld [vmem:[#allocation3 + $0x30] sm:$0xff] }
 0x429   :  { %v814_v14 = vpop.permute.xlu2 %813  ;;  %v816_v15 = vpop.permute.xlu0 %815 }
 0x42a   :  { %v824_v33 = vpop.permute.xlu1 %823  ;;  %v585_v1 = vpop.f32.mrf.mxu2  ;;  %v859_v22 = vsel %vm287_vm2, %v816_v15, 0  ;;  %v856_v59 = vsel %vm287_vm2, %v814_v14, 0 }
 0x42b   :  { %v871_v8 = vsel %vm287_vm2, %v824_v33, 0  ;;  %v614_v33 = vld [vmem:[#allocation3 + $0x20] sm:$0xff] }
 0x42c   :  { %873 = vmatpush.bf16.xpose.msrb.mxu3 %v871_v8 }
 0x431   :  { %v3168_v41 = vpop.permute.xlu2 %793  ;;  %v810_v42 = vpop.permute.xlu0 %809 }
 0x432   :  { %v818_v40 = vpop.permute.xlu1 %817  ;;  %v587_v52 = vpop.f32.mrf.mxu2  ;;  %v850_v17 = vsel %vm287_vm2, %v810_v42, 0 }
 0x433   :  { %v862_v49 = vsel %vm287_vm2, %v818_v40, 0  ;;  %v629_v7 = vpack.c.bf16 %v587_v52, %v585_v1 }
 0x434   :  { %874 = vmatpush.bf16.xpose.msrb.mxu3 %v868_v46  ;;  %v617_v46 = vld [vmem:[#allocation3 + $0x38] sm:$0xff] }
 0x435   :  { %604 = vmatmul.bf16.gmra.mxu2 %v536_v48 }
 0x439   :  { %v3172_v51 = vpop.permute.xlu2 %799  ;;  %v3174_v53 = vpop.permute.xlu0 %797 }
 0x43a   :  { %v812_v54 = vpop.permute.xlu1 %811 }
 0x43b   :  { %v853_v63 = vsel %vm287_vm2, %v812_v54, 0 }
 0x43c   :  { %875 = vmatpush.bf16.xpose.msrb.mxu3 %v865_v47 }
 0x441   :  { %v3183_v55 = vpop.permute.xlu0 %803  ;;  %v3190_v0 = vpop.permute.xlu2 %805 }
 0x442   :  { %v3185_v61 = vpop.permute.xlu1 %795 }
 0x444   :  { %876 = vmatpush.bf16.xpose.msrb.mxu3 %v862_v49 }
 0x445   :  { %2467 = vmatmul.msk.bf16.vlgmr.msrb.gmra.mxu2 %vm287_vm2, %v628_v38 }
 0x449   :  { %v1089_v4 = vpop.permute.xlu0 %1088  ;;  %v1087_v43 = vpop.permute.xlu2 %1086 }
 0x44a   :  { %v3199_v5 = vpop.permute.xlu1 %801  ;;  %1098 = vmatpush.bf16.msra.mxu0 %v1089_v4 }
 0x44c   :  { %877 = vmatpush.bf16.xpose.msrb.mxu3 %v859_v22  ;;  %v622_v22 = vld [vmem:[#allocation3 + $0x60] sm:$0xff] }
 0x44e   :  { %1099 = vmatpush.bf16.msra.mxu0 %v1087_v43 }
 0x451   :  { %v1083_v10 = vpop.permute.xlu0 %1082 }
 0x452   :  { %v3204_v6 = vpop.permute.xlu1 %807 }
 0x454   :  { %878 = vmatpush.bf16.xpose.msrb.mxu3 %v856_v59 }
 0x455   :  { %2468 = vmatmul.msk.bf16.gmra.mxu2 %vm287_vm2, %v629_v7  ;;  %v623_v7 = vld [vmem:[#allocation3 + $0x68] sm:$0xff] }
 0x45a   :  { %v1085_v9 = vpop.permute.xlu1 %1084 }
 0x45b   :  { %1100 = vmatpush.bf16.msra.mxu0 %v1085_v9  ;;  %v624_v9 = vld [vmem:[#allocation3 + $0x70] sm:$0xff] }
 0x45c   :  { %879 = vmatpush.bf16.xpose.msrb.mxu3 %v853_v63 }
 0x45f   :  { %1101 = vmatpush.bf16.msra.mxu0 %v1083_v10 }
 0x462   :  { %v1081_v12 = vpop.permute.xlu1 %1080  ;;  %v672_v13 = vpop.f32.mrf.mxu0 }
 0x463   :  { %v712_v16 = vadd.f32 %v672_v13, %v610_v50  ;;  %1102 = vmatpush.bf16.msra.mxu0 %v1081_v12  ;;  %v625_v50 = vld [vmem:[#allocation3 + $0x78] sm:$0xff]  ;;  %v769_v13 = vld [vmem:[#allocation4 + $0x80] sm:$0xff] }
 0x464   :  { %880 = vmatpush.bf16.xpose.msrb.mxu3 %v850_v17 }
 0x465   :  { %728 = vst.msk [vmem:[#allocation3] sm:$0xff] %vm116_vm0, %v712_v16 }
 0x46a   :  { %v674_v45 = vpop.f32.mrf.mxu0 }
 0x46b   :  { %v713_v3 = vadd.f32 %v674_v45, %v611_v57  ;;  %v770_v57 = vld [vmem:[#allocation4 + $0x88] sm:$0xff] }
 0x46d   :  { %729 = vst.msk [vmem:[#allocation3 + $0x8] sm:$0xff] %vm116_vm0, %v713_v3 }
 0x488   :  { %v590_v31 = vpop.f32.mrf.mxu2 }
 0x48e   :  { %v677_v19 = vpop.f32.mrf.mxu0 }
 0x48f   :  { %v714_v62 = vadd.f32 %v677_v19, %v612_v18  ;;  %v772_v19 = vld [vmem:[#allocation4 + $0x98] sm:$0xff] }
 0x490   :  { %v592_v56 = vpop.f32.mrf.mxu2 }
 0x491   :  { %730 = vst.msk [vmem:[#allocation3 + $0x10] sm:$0xff] %vm116_vm0, %v714_v62  ;;  %v630_v20 = vpack.c.bf16 %v592_v56, %v590_v31  ;;  %v771_v31 = vld [vmem:[#allocation4 + $0x90] sm:$0xff] }
 0x493   :  { %2469 = vmatmul.msk.bf16.vlgmr.msra.gmra.mxu3 %vm287_vm2, %v630_v20  ;;  %v773_v20 = vld [vmem:[#allocation4 + $0xa0] sm:$0xff] }
 0x496   :  { %v679_v11 = vpop.f32.mrf.mxu0 }
 0x497   :  { %v715_v23 = vadd.f32 %v679_v11, %v613_v21 }
 0x498   :  { %v595_v24 = vpop.f32.mrf.mxu2 }
 0x499   :  { %731 = vst.msk [vmem:[#allocation3 + $0x18] sm:$0xff] %vm116_vm0, %v715_v23  ;;  %v774_v23 = vld [vmem:[#allocation4 + $0xa8] sm:$0xff] }
 0x4a0   :  { %v597_v25 = vpop.f32.mrf.mxu2 }
 0x4a1   :  { %v631_v26 = vpack.c.bf16 %v597_v25, %v595_v24 }
 0x4a3   :  { %2470 = vmatmul.msk.bf16.gmra.mxu3 %vm287_vm2, %v631_v26  ;;  %v775_v26 = vld [vmem:[#allocation4 + $0xb0] sm:$0xff] }
 0x4a8   :  { %v600_v27 = vpop.f32.mrf.mxu2 }
 0x4b0   :  { %v602_v28 = vpop.f32.mrf.mxu2 }
 0x4b1   :  { %v632_v30 = vpack.c.bf16 %v602_v28, %v600_v27 }
 0x4b3   :  { %2471 = vmatmul.msk.bf16.gmra.mxu3 %vm287_vm2, %v632_v30  ;;  %v776_v30 = vld [vmem:[#allocation4 + $0xb8] sm:$0xff] }
 0x4b8   :  { %v605_v32 = vpop.f32.mrf.mxu2 }
 0x4c0   :  { %v607_v14 = vpop.f32.mrf.mxu2 }
 0x4c1   :  { %v633_v15 = vpack.c.bf16 %v607_v14, %v605_v32 }
 0x4c3   :  { %2472 = vmatmul.msk.bf16.gmra.mxu3 %vm287_vm2, %v633_v15 }
 0x4c8   :  { %v682_v8 = vpop.f32.mrf.mxu2 }
 0x4c9   :  { %v716_v34 = vadd.f32 %v682_v8, %v614_v33  ;;  %v777_v33 = vld [vmem:[#allocation4 + $0xc0] sm:$0xff] }
 0x4cb   :  { %732 = vst.msk [vmem:[#allocation3 + $0x20] sm:$0xff] %vm116_vm0, %v716_v34 }
 0x4d0   :  { %v684_v37 = vpop.f32.mrf.mxu2 }
 0x4d1   :  { %v717_v39 = vadd.f32 %v684_v37, %v615_v35 }
 0x4d3   :  { %733 = vst.msk [vmem:[#allocation3 + $0x28] sm:$0xff] %vm116_vm0, %v717_v39  ;;  %2473 = vmatmul.msk.bf16.vlgmr.msrb.gmra.mxu3 %vm287_vm2, %v3168_v41  ;;  %v618_v41 = vld [vmem:[#allocation3 + $0x40] sm:$0xff] }
 0x4d8   :  { %v687_v42 = vpop.f32.mrf.mxu2 }
 0x4d9   :  { %v718_v40 = vadd.f32 %v687_v42, %v616_v29 }
 0x4db   :  { %734 = vst.msk [vmem:[#allocation3 + $0x30] sm:$0xff] %vm116_vm0, %v718_v40 }
 0x4e0   :  { %v689_v48 = vpop.f32.mrf.mxu2 }
 0x4e1   :  { %v719_v54 = vadd.f32 %v689_v48, %v617_v46 }
 0x4e3   :  { %735 = vst.msk [vmem:[#allocation3 + $0x38] sm:$0xff] %vm116_vm0, %v719_v54  ;;  %2474 = vmatmul.msk.bf16.gmra.mxu3 %vm287_vm2, %v3185_v61 }
 0x4f3   :  { %2475 = vmatmul.msk.bf16.gmra.mxu3 %vm287_vm2, %v3174_v53  ;;  %v620_v53 = vld [vmem:[#allocation3 + $0x50] sm:$0xff] }
 0x503   :  { %2476 = vmatmul.msk.bf16.gmra.mxu3 %vm287_vm2, %v3172_v51  ;;  %v621_v51 = vld [vmem:[#allocation3 + $0x58] sm:$0xff] }
 0x513   :  { %2477 = vmatmul.msk.bf16.gmra.mxu3 %vm287_vm2, %v3199_v5 }
 0x516   :  { %v692_v47 = vpop.f32.mrf.mxu3 }
 0x517   :  { %v720_v60 = vadd.f32 %v692_v47, %v618_v41 }
 0x519   :  { %736 = vst.msk [vmem:[#allocation3 + $0x40] sm:$0xff] %vm116_vm0, %v720_v60 }
 0x51e   :  { %v694_v38 = vpop.f32.mrf.mxu3 }
 0x51f   :  { %v721_v49 = vadd.f32 %v694_v38, %v619_v44 }
 0x521   :  { %737 = vst.msk [vmem:[#allocation3 + $0x48] sm:$0xff] %vm116_vm0, %v721_v49 }
 0x523   :  { %2478 = vmatmul.msk.bf16.gmra.mxu3 %vm287_vm2, %v3183_v55 }
 0x526   :  { %v697_v61 = vpop.f32.mrf.mxu3 }
 0x527   :  { %v722_v1 = vadd.f32 %v697_v61, %v620_v53  ;;  %v780_v53 = vld [vmem:[#allocation4 + $0xd8] sm:$0xff] }
 0x529   :  { %738 = vst.msk [vmem:[#allocation3 + $0x50] sm:$0xff] %vm116_vm0, %v722_v1 }
 0x52e   :  { %v699_v4 = vpop.f32.mrf.mxu3 }
 0x52f   :  { %v723_v5 = vadd.f32 %v699_v4, %v621_v51 }
 0x531   :  { %739 = vst.msk [vmem:[#allocation3 + $0x58] sm:$0xff] %vm116_vm0, %v723_v5 }
 0x533   :  { %2479 = vmatmul.msk.bf16.gmra.mxu3 %vm287_vm2, %v3190_v0 }
 0x536   :  { %v702_v43 = vpop.f32.mrf.mxu3 }
 0x537   :  { %v724_v52 = vadd.f32 %v702_v43, %v622_v22 }
 0x539   :  { %740 = vst.msk [vmem:[#allocation3 + $0x60] sm:$0xff] %vm116_vm0, %v724_v52 }
 0x53e   :  { %v704_v55 = vpop.f32.mrf.mxu3 }
 0x53f   :  { %v725_v59 = vadd.f32 %v704_v55, %v623_v7 }
 0x541   :  { %741 = vst.msk [vmem:[#allocation3 + $0x68] sm:$0xff] %vm116_vm0, %v725_v59 }
 0x543   :  { %2480 = vmatmul.msk.bf16.gmra.mxu3 %vm287_vm2, %v3204_v6 }
 0x546   :  { %v707_v63 = vpop.f32.mrf.mxu3 }
 0x547   :  { %v726_v10 = vadd.f32 %v707_v63, %v624_v9  ;;  %v784_v63 = vld [vmem:[#allocation4 + $0xf8] sm:$0xff] }
 0x549   :  { %742 = vst.msk [vmem:[#allocation3 + $0x70] sm:$0xff] %vm116_vm0, %v726_v10 }
 0x54e   :  { %v709_v0 = vpop.f32.mrf.mxu3 }
 0x54f   :  { %v727_v12 = vadd.f32 %v709_v0, %v625_v50 }
 0x551   :  { %743 = vst.msk [vmem:[#allocation3 + $0x78] sm:$0xff] %vm116_vm0, %v727_v12 }
 0x556   :  { %v882_v16 = vpop.f32.mrf.mxu3 }
 0x557   :  { %v883_v17 = vadd.f32 %v882_v16, %v769_v13 }
 0x559   :  { %922 = vmax.xlane.f32.xlu0 %v883_v17 }
 0x55e   :  { %v884_v45 = vpop.f32.mrf.mxu3 }
 0x55f   :  { %v885_v3 = vadd.f32 %v884_v45, %v770_v57  ;;  %v781_v57 = vld [vmem:[#allocation4 + $0xe0] sm:$0xff] }
 0x561   :  { %924 = vmax.xlane.f32.xlu2 %v885_v3 }
 0x566   :  { %v887_v6 = vpop.f32.mrf.mxu3 }
 0x567   :  { %v3246_v18 = vadd.f32 %v887_v6, %v771_v31 }
 0x569   :  { %926 = vmax.xlane.f32.xlu1 %v3246_v18 }
 0x56e   :  { %v889_v62 = vpop.f32.mrf.mxu3 }
 0x56f   :  { %v890_v56 = vadd.f32 %v889_v62, %v772_v19 }
 0x571   :  { %928 = vmax.xlane.f32.xlu0 %v890_v56 }
 0x576   :  { %v892_v21 = vpop.f32.mrf.mxu3 }
 0x577   :  { %v3249_v11 = vadd.f32 %v892_v21, %v773_v20  ;;  %v782_v21 = vld [vmem:[#allocation4 + $0xe8] sm:$0xff] }
 0x579   :  { %930 = vmax.xlane.f32.xlu2 %v3249_v11 }
 0x57e   :  { %v894_v24 = vpop.f32.mrf.mxu3 }
 0x57f   :  { %v895_v25 = vadd.f32 %v894_v24, %v774_v23 }
 0x581   :  { %932 = vmax.xlane.f32.xlu1 %v895_v25 }
 0x586   :  { %v897_v27 = vpop.f32.mrf.mxu3 }
 0x587   :  { %v898_v28 = vadd.f32 %v897_v27, %v775_v26 }
 0x589   :  { %934 = vmax.xlane.f32.xlu2 %v898_v28 }
 0x58e   :  { %v899_v32 = vpop.f32.mrf.mxu3 }
 0x58f   :  { %v3252_v14 = vadd.f32 %v899_v32, %v776_v30 }
 0x591   :  { %936 = vmax.xlane.f32.xlu0 %v3252_v14 }
 0x596   :  { %v902_v15 = vpop.f32.mrf.mxu3 }
 0x597   :  { %v3257_v34 = vadd.f32 %v902_v15, %v777_v33 }
 0x59e   :  { %v904_v37 = vpop.f32.mrf.mxu3 }
 0x5a5   :  { %1078 = vrot.lane.b32.xlu0 %v2952_v36, %s2839_s28 }
 0x5a6   :  { %v907_v48 = vpop.f32.mrf.mxu3 }
 0x5ae   :  { %v909_v54 = vpop.f32.mrf.mxu3 }
 0x5af   :  { %v3271_v4 = vadd.f32 %v909_v54, %v780_v53 }
 0x5b6   :  { %v912_v38 = vpop.f32.mrf.mxu3 }
 0x5b7   :  { %v3290_v31 = vadd.f32 %v912_v38, %v781_v57 }
 0x5be   :  { %v914_v5 = vpop.f32.mrf.mxu3 }
 0x5bf   :  { %v3300_v23 = vadd.f32 %v914_v5, %v782_v21 }
 0x5cc   :  { %v923_v8 = vpop.xlane.xlu0 %922 }
 0x5cd   :  { %v954_v35 = vsub.f32 %v883_v17, %v923_v8  ;;  %v778_v17 = vld [vmem:[#allocation4 + $0xc8] sm:$0xff] }
 0x5ce   :  { %v905_v45 = vadd.f32 %v904_v37, %v778_v17 }
 0x5cf   :  { %v970_v39 = vmul.f32 1.442695, %v954_v35  ;;  %938 = vmax.xlane.f32.xlu0 %v3257_v34 }
 0x5d1   :  { %2614 = vpow2.f32 %v970_v39 }
 0x5d4   :  { %v925_v29 = vpop.xlane.xlu2 %924 }
 0x5d5   :  { %v955_v42 = vsub.f32 %v885_v3, %v925_v29 }
 0x5d7   :  { %v3260_v40 = vpop.eup %2614  ;;  %v972_v46 = vmul.f32 1.442695, %v955_v42 }
 0x5d8   :  { %1002 = vadd.xlane.f32.xlu1 %v3260_v40 }
 0x5d9   :  { %2616 = vpow2.f32 %v972_v46 }
 0x5dc   :  { %v927_v44 = vpop.xlane.xlu1 %926 }
 0x5df   :  { %v3263_v36 = vpop.eup %2616 }
 0x5e0   :  { %1004 = vadd.xlane.f32.xlu2 %v3263_v36 }
 0x5e4   :  { %v929_v41 = vpop.xlane.xlu0 %928 }
 0x5e5   :  { %v957_v47 = vsub.f32 %v890_v56, %v929_v41 }
 0x5e7   :  { %v976_v60 = vmul.f32 1.442695, %v957_v47 }
 0x5e9   :  { %2618 = vpow2.f32 %v976_v60 }
 0x5ec   :  { %v931_v61 = vpop.xlane.xlu2 %930 }
 0x5ed   :  { %v958_v6 = vsub.f32 %v3249_v11, %v931_v61  ;;  %v783_v11 = vld [vmem:[#allocation4 + $0xf0] sm:$0xff] }
 0x5ef   :  { %v3266_v49 = vpop.eup %2618  ;;  %v978_v19 = vmul.f32 1.442695, %v958_v6 }
 0x5f0   :  { %1008 = vadd.xlane.f32.xlu0 %v3266_v49 }
 0x5f1   :  { %1074 = vrot.lane.b32.xlu1 %v2976_v58, %s2839_s28  ;;  %v917_v58 = vpop.f32.mrf.mxu3 }
 0x5f2   :  { %v3303_v24 = vadd.f32 %v917_v58, %v783_v11 }
 0x5f4   :  { %v933_v1 = vpop.xlane.xlu1 %932 }
 0x5f5   :  { %v959_v51 = vsub.f32 %v895_v25, %v933_v1 }
 0x5f7   :  { %v980_v22 = vmul.f32 1.442695, %v959_v51 }
 0x5f8   :  { %1076 = vrot.lane.b32.xlu2 %v2996_v2, %s2839_s28  ;;  %944 = vmax.xlane.f32.xlu0 %v3271_v4  ;;  %v956_v2 = vsub.f32 %v3246_v18, %v927_v44  ;;  %v779_v18 = vld [vmem:[#allocation4 + $0xd0] sm:$0xff] }
 0x5f9   :  { %2620 = vpow2.f32 %v980_v22  ;;  %v919_v9 = vpop.f32.mrf.mxu3  ;;  %v908_v62 = vadd.f32 %v907_v48, %v779_v18 }
 0x5fa   :  { %v3283_v10 = vadd.f32 %v919_v9, %v784_v63  ;;  %v974_v0 = vmul.f32 1.442695, %v956_v2 }
 0x5fc   :  { %v935_v43 = vpop.xlane.xlu2 %934 }
 0x5fd   :  { %v960_v52 = vsub.f32 %v898_v28, %v935_v43 }
 0x5ff   :  { %v3276_v7 = vpop.eup %2620  ;;  %v982_v55 = vmul.f32 1.442695, %v960_v52 }
 0x600   :  { %1012 = vadd.xlane.f32.xlu0 %v3276_v7 }
 0x601   :  { %2622 = vpow2.f32 %v982_v55 }
 0x602   :  { %2624 = vpow2.f32 %v974_v0 }
 0x604   :  { %v937_v50 = vpop.xlane.xlu0 %936 }
 0x605   :  { %v961_v16 = vsub.f32 %v3252_v14, %v937_v50 }
 0x607   :  { %v3279_v59 = vpop.eup %2622  ;;  %v984_v3 = vmul.f32 1.442695, %v961_v16 }
 0x608   :  { %1014 = vadd.xlane.f32.xlu0 %v3279_v59  ;;  %v3286_v13 = vpop.eup %2624 }
 0x609   :  { %2626 = vpow2.f32 %v984_v3 }
 0x60a   :  { %2628 = vpow2.f32 %v978_v19 }
 0x60f   :  { %v3294_v56 = vpop.eup %2626 }
 0x610   :  { %952 = vmax.xlane.f32.xlu0 %v3283_v10  ;;  %v3297_v20 = vpop.eup %2628 }
 0x617   :  { %v1079_v12 = vpop.permute.xlu0 %1078 }
 0x618   :  { %1103 = vmatpush.bf16.msra.mxu0 %v1079_v12 }
 0x61b   :  { %1006 = vadd.xlane.f32.xlu1 %v3286_v13 }
 0x621   :  { %940 = vmax.xlane.f32.xlu2 %v905_v45 }
 0x623   :  { %946 = vmax.xlane.f32.xlu1 %v3290_v31 }
 0x629   :  { %942 = vmax.xlane.f32.xlu2 %v908_v62 }
 0x62b   :  { %1016 = vadd.xlane.f32.xlu1 %v3294_v56 }
 0x631   :  { %1010 = vadd.xlane.f32.xlu2 %v3297_v20 }
 0x639   :  { %948 = vmax.xlane.f32.xlu2 %v3300_v23 }
 0x641   :  { %950 = vmax.xlane.f32.xlu2 %v3303_v24 }
 0x642   :  { %v939_v25 = vpop.xlane.xlu0 %938 }
 0x643   :  { %v962_v26 = vsub.f32 %v3257_v34, %v939_v25 }
 0x645   :  { %v986_v27 = vmul.f32 1.442695, %v962_v26  ;;  %v1293_v26 = vld [vmem:[#allocation2 + $0x68] sm:$0xff] }
 0x647   :  { %2630 = vpow2.f32 %v986_v27 }
 0x64b   :  { %v1003_v32 = vpop.xlane.xlu1 %1002 }
 0x64d   :  { %v3307_v28 = vpop.eup %2630 }
 0x64e   :  { %1018 = vadd.xlane.f32.xlu1 %v3307_v28 }
 0x653   :  { %v1005_v30 = vpop.xlane.xlu2 %1004 }
 0x654   :  { %2632 = vrcp.f32 %v1005_v30  ;;  %v1295_v30 = vld [vmem:[#allocation2 + $0x78] sm:$0xff] }
 0x655   :  { %2634 = vrcp.f32 %v1003_v32  ;;  %v1294_v32 = vld [vmem:[#allocation2 + $0x70] sm:$0xff] }
 0x65a   :  { %v2633_v15 = vpop.eup %2632 }
 0x65b   :  { %v1077_v14 = vpop.permute.xlu2 %1076  ;;  %v2635_v33 = vpop.eup %2634  ;;  %v1051_v8 = vmul.f32 %v2633_v15, %v3263_v36 }
 0x65c   :  { %1104 = vmatpush.bf16.msra.mxu0 %v1077_v14  ;;  %v1050_v35 = vmul.f32 %v2635_v33, %v3260_v40  ;;  %v3348_v14 = vpack.c.bf16 %v1295_v30, %v1294_v32  ;;  %v1288_v33 = vld [vmem:[#allocation2 + $0x40] sm:$0xff] }
 0x65e   :  { %v1066_v39 = vpack.c.bf16 %v1051_v8, %v1050_v35  ;;  %v1823_v35 = vld [vmem:[#allocation2 + $0x38] sm:$0xff] }
 0x663   :  { %v1009_v37 = vpop.xlane.xlu0 %1008  ;;  %v1075_v34 = vpop.permute.xlu1 %1074 }
 0x664   :  { %1105 = vmatpush.bf16.msra.mxu0 %v1075_v34 }
 0x667   :  { %1106 = vmatmul.bf16.vlgmr.msra.gmra.mxu0 %v1066_v39  ;;  %v1827_v39 = vld [vmem:[#allocation2 + $0x58] sm:$0xff] }
 0x66b   :  { %v945_v29 = vpop.xlane.xlu0 %944 }
 0x66c   :  { %v965_v42 = vsub.f32 %v3271_v4, %v945_v29  ;;  %v1826_v29 = vld [vmem:[#allocation2 + $0x50] sm:$0xff] }
 0x66e   :  { %v992_v46 = vmul.f32 1.442695, %v965_v42  ;;  %v3368_v42 = vpack.c.bf16 %v1827_v39, %v1826_v29 }
 0x670   :  { %2636 = vpow2.f32 %v992_v46  ;;  %v1283_v46 = vld [vmem:[#allocation2 + $0x18] sm:$0xff] }
 0x671   :  { %2638 = vrcp.f32 %v1009_v37  ;;  %v1822_v37 = vld [vmem:[#allocation2 + $0x30] sm:$0xff] }
 0x672   :  { %v3362_v34 = vpack.c.bf16 %v1823_v35, %v1822_v37 }
 0x673   :  { %v1013_v54 = vpop.xlane.xlu0 %1012 }
 0x676   :  { %v3313_v48 = vpop.eup %2636 }
 0x677   :  { %1024 = vadd.xlane.f32.xlu1 %v3313_v48  ;;  %v2639_v36 = vpop.eup %2638 }
 0x678   :  { %v1053_v61 = vmul.f32 %v2639_v36, %v3266_v49  ;;  %v1817_v36 = vld [vmem:[#allocation2 + $0x8] sm:$0xff] }
 0x67b   :  { %v1015_v40 = vpop.xlane.xlu0 %1014 }
 0x683   :  { %v953_v52 = vpop.xlane.xlu0 %952 }
 0x684   :  { %v969_v9 = vsub.f32 %v3283_v10, %v953_v52 }
 0x686   :  { %v1000_v63 = vmul.f32 1.442695, %v969_v9 }
 0x68e   :  { %v1007_v41 = vpop.xlane.xlu1 %1006 }
 0x68f   :  { %2640 = vrcp.f32 %v1007_v41 }
 0x694   :  { %v941_v47 = vpop.xlane.xlu2 %940 }
 0x695   :  { %v2641_v60 = vpop.eup %2640  ;;  %v963_v44 = vsub.f32 %v905_v45, %v941_v47  ;;  %v1816_v47 = vld [vmem:[#allocation2] sm:$0xff] }
 0x696   :  { %v947_v38 = vpop.xlane.xlu1 %946  ;;  %v1052_v53 = vmul.f32 %v2641_v60, %v3286_v13  ;;  %v3380_v60 = vpack.c.bf16 %v1817_v36, %v1816_v47 }
 0x697   :  { %v988_v1 = vmul.f32 1.442695, %v963_v44  ;;  %v966_v51 = vsub.f32 %v3290_v31, %v947_v38  ;;  %v1821_v44 = vld [vmem:[#allocation2 + $0x28] sm:$0xff]  ;;  %v1820_v38 = vld [vmem:[#allocation2 + $0x20] sm:$0xff] }
 0x698   :  { %v1067_v4 = vpack.c.bf16 %v1053_v61, %v1052_v53  ;;  %v3386_v53 = vpack.c.bf16 %v1821_v44, %v1820_v38 }
 0x699   :  { %2642 = vpow2.f32 %v988_v1  ;;  %v994_v5 = vmul.f32 1.442695, %v966_v51 }
 0x69a   :  { %1111 = vmatmul.bf16.gmra.mxu0 %v1067_v4 }
 0x69b   :  { %2644 = vpow2.f32 %v994_v5 }
 0x69c   :  { %v943_v22 = vpop.xlane.xlu2 %942 }
 0x69d   :  { %v964_v43 = vsub.f32 %v908_v62, %v943_v22 }
 0x69e   :  { %v1017_v17 = vpop.xlane.xlu1 %1016 }
 0x69f   :  { %v3319_v55 = vpop.eup %2642  ;;  %v990_v58 = vmul.f32 1.442695, %v964_v43 }
 0x6a0   :  { %1020 = vadd.xlane.f32.xlu2 %v3319_v55 }
 0x6a1   :  { %2646 = vpow2.f32 %v990_v58  ;;  %v3323_v2 = vpop.eup %2644 }
 0x6a2   :  { %2648 = vrcp.f32 %v1013_v54  ;;  %v1282_v54 = vld [vmem:[#allocation2 + $0x10] sm:$0xff] }
 0x6a3   :  { %v3372_v41 = vpack.c.bf16 %v1283_v46, %v1282_v54 }
 0x6a4   :  { %v1011_v49 = vpop.xlane.xlu2 %1010 }
 0x6a5   :  { %2650 = vrcp.f32 %v1011_v49 }
 0x6a6   :  { %2652 = vpow2.f32 %v1000_v63 }
 0x6a7   :  { %v3325_v50 = vpop.eup %2646  ;;  %2654 = vrcp.f32 %v1017_v17 }
 0x6a8   :  { %1022 = vadd.xlane.f32.xlu0 %v3325_v50  ;;  %1026 = vadd.xlane.f32.xlu2 %v3323_v2  ;;  %v2649_v0 = vpop.eup %2648 }
 0x6a9   :  { %v1055_v10 = vmul.f32 %v2649_v0, %v3276_v7 }
 0x6ab   :  { %v2651_v12 = vpop.eup %2650 }
 0x6ac   :  { %v949_v13 = vpop.xlane.xlu2 %948  ;;  %v1054_v16 = vmul.f32 %v2651_v12, %v3297_v20  ;;  %v3332_v3 = vpop.eup %2652 }
 0x6ad   :  { %v967_v57 = vsub.f32 %v3300_v23, %v949_v13  ;;  %v2655_v19 = vpop.eup %2654 }
 0x6ae   :  { %v1068_v45 = vpack.c.bf16 %v1055_v10, %v1054_v16  ;;  %v1057_v21 = vmul.f32 %v2655_v19, %v3294_v56  ;;  %v1289_v56 = vld [vmem:[#allocation2 + $0x48] sm:$0xff] }
 0x6af   :  { %v996_v31 = vmul.f32 1.442695, %v967_v57  ;;  %v3356_v8 = vpack.c.bf16 %v1289_v56, %v1288_v33 }
 0x6b0   :  { %1116 = vmatmul.bf16.gmra.mxu0 %v1068_v45  ;;  %1032 = vadd.xlane.f32.xlu2 %v3332_v3 }
 0x6b1   :  { %2656 = vpow2.f32 %v996_v31 }
 0x6b2   :  { %2658 = vrcp.f32 %v1015_v40 }
 0x6b4   :  { %v951_v6 = vpop.xlane.xlu2 %950 }
 0x6b5   :  { %v968_v18 = vsub.f32 %v3303_v24, %v951_v6  ;;  %v1292_v24 = vld [vmem:[#allocation2 + $0x60] sm:$0xff] }
 0x6b6   :  { %v3344_v27 = vpack.c.bf16 %v1293_v26, %v1292_v24 }
 0x6b7   :  { %v3336_v62 = vpop.eup %2656  ;;  %v998_v7 = vmul.f32 1.442695, %v968_v18 }
 0x6b8   :  { %1028 = vadd.xlane.f32.xlu0 %v3336_v62  ;;  %v2659_v20 = vpop.eup %2658 }
 0x6b9   :  { %2660 = vpow2.f32 %v998_v7  ;;  %v1056_v23 = vmul.f32 %v2659_v20, %v3279_v59  ;;  %v1171_v59 = vld [vmem:[%s3955_s4 + $0x4] sm:$0xf] }
 0x6ba   :  { %v1197_v15 = vsel %vm659_vm3, %v1171_v59, 0 }
 0x6bb   :  { %v1069_v11 = vpack.c.bf16 %v1057_v21, %v1056_v23  ;;  %1206 = vmatpush.bf16.msra.mxu2 %v1197_v15 }
 0x6bf   :  { %v3341_v25 = vpop.eup %2660 }
 0x6c0   :  { %1030 = vadd.xlane.f32.xlu1 %v3341_v25  ;;  %1121 = vmatmul.bf16.gmra.mxu0 %v1069_v11 }
 0x6c1   :  { %v1019_v51 = vpop.xlane.xlu1 %1018 }
 0x6c2   :  { %2662 = vrcp.f32 %v1019_v51 }
 0x6c8   :  { %1357 = vrot.lane.b32.xlu2 %v3344_v27, %s2841_s29  ;;  %v2663_v22 = vpop.eup %2662 }
 0x6c9   :  { %v1058_v52 = vmul.f32 %v2663_v22, %v3307_v28 }
 0x6cc   :  { %1359 = vrot.lane.b32.xlu0 %v3348_v14, %s2841_s29 }
 0x6d0   :  { %1353 = vrot.lane.b32.xlu2 %v3356_v8, %s2841_s29 }
 0x6d4   :  { %1893 = vrot.lane.b32.xlu0 %v3344_v27, %s2842_s8 }
 0x6d8   :  { %1887 = vrot.lane.b32.xlu2 %v3362_v34, %s2842_s8 }
 0x6d9   :  { %1895 = vrot.lane.b32.xlu1 %v3348_v14, %s2842_s8 }
 0x6dc   :  { %1891 = vrot.lane.b32.xlu0 %v3368_v42, %s2842_s8 }
 0x6e0   :  { %1347 = vrot.lane.b32.xlu2 %v3372_v41, %s2841_s29 }
 0x6e1   :  { %1355 = vrot.lane.b32.xlu1 %v3368_v42, %s2841_s29 }
 0x6e4   :  { %1351 = vrot.lane.b32.xlu0 %v3362_v34, %s2841_s29  ;;  %v1107_v40 = vpop.f32.mrf.mxu0 }
 0x6e8   :  { %1881 = vrot.lane.b32.xlu2 %v3380_v60, %s2842_s8 }
 0x6e9   :  { %1889 = vrot.lane.b32.xlu1 %v3356_v8, %s2842_s8 }
 0x6ea   :  { %v1025_v63 = vpop.xlane.xlu1 %1024 }
 0x6ec   :  { %1885 = vrot.lane.b32.xlu0 %v3386_v53, %s2842_s8  ;;  %v1109_v61 = vpop.f32.mrf.mxu0 }
 0x6ed   :  { %v1163_v1 = vpack.c.bf16 %v1109_v61, %v1107_v40 }
 0x6ef   :  { %2481 = vmatmul.msk.bf16.vlgmr.msra.gmra.mxu2 %vm287_vm2, %v1163_v1 }
 0x6f0   :  { %1331 = vrot.lane.b32.xlu2 %v3372_v41, %s2843_s3 }
 0x6f1   :  { %1349 = vrot.lane.b32.xlu1 %v3386_v53, %s2841_s29 }
 0x6f4   :  { %1345 = vrot.lane.b32.xlu0 %v3380_v60, %s2841_s29 }
 0x6f8   :  { %1869 = vrot.lane.b32.xlu2 %v3386_v53, %s2844_s9 }
 0x6f9   :  { %1883 = vrot.lane.b32.xlu1 %v3372_v41, %s2842_s8 }
 0x6fc   :  { %1865 = vrot.lane.b32.xlu0 %v3380_v60, %s2844_s9 }
 0x700   :  { %1337 = vrot.lane.b32.xlu2 %v3356_v8, %s2843_s3 }
 0x701   :  { %1329 = vrot.lane.b32.xlu1 %v3380_v60, %s2843_s3 }
 0x704   :  { %1333 = vrot.lane.b32.xlu0 %v3386_v53, %s2843_s3 }
 0x708   :  { %1875 = vrot.lane.b32.xlu2 %v3368_v42, %s2844_s9 }
 0x709   :  { %1867 = vrot.lane.b32.xlu1 %v3372_v41, %s2844_s9 }
 0x70c   :  { %1871 = vrot.lane.b32.xlu0 %v3362_v34, %s2844_s9 }
 0x710   :  { %1343 = vrot.lane.b32.xlu2 %v3348_v14, %s2843_s3 }
 0x711   :  { %1335 = vrot.lane.b32.xlu1 %v3362_v34, %s2843_s3 }
 0x713   :  { %v1021_v4 = vpop.xlane.xlu2 %1020 }
 0x714   :  { %2664 = vrcp.f32 %v1021_v4  ;;  %1339 = vrot.lane.b32.xlu0 %v3368_v42, %s2843_s3 }
 0x717   :  { %v1112_v5 = vpop.f32.mrf.mxu0 }
 0x719   :  { %1873 = vrot.lane.b32.xlu1 %v3356_v8, %s2844_s9 }
 0x71a   :  { %v2665_v43 = vpop.eup %2664 }
 0x71b   :  { %v1059_v58 = vmul.f32 %v2665_v43, %v3319_v55  ;;  %v1023_v9 = vpop.xlane.xlu0 %1022  ;;  %v1027_v45 = vpop.xlane.xlu2 %1026 }
 0x71c   :  { %1877 = vrot.lane.b32.xlu0 %v3344_v27, %s2844_s9  ;;  %2666 = vrcp.f32 %v1023_v9 }
 0x71d   :  { %v1070_v49 = vpack.c.bf16 %v1059_v58, %v1058_v52  ;;  %2668 = vrcp.f32 %v1025_v63  ;;  %v1147_v52 = vld [vmem:[#allocation3] sm:$0xff] }
 0x71f   :  { %v1114_v0 = vpop.f32.mrf.mxu0  ;;  %1126 = vmatmul.bf16.gmra.mxu0 %v1070_v49 }
 0x720   :  { %v1164_v12 = vpack.c.bf16 %v1114_v0, %v1112_v5 }
 0x721   :  { %1341 = vrot.lane.b32.xlu1 %v3344_v27, %s2843_s3 }
 0x722   :  { %2482 = vmatmul.msk.bf16.gmra.mxu2 %vm287_vm2, %v1164_v12  ;;  %v2667_v13 = vpop.eup %2666 }
 0x723   :  { %v2669_v28 = vpop.eup %2668  ;;  %v1060_v55 = vmul.f32 %v2667_v13, %v3325_v50  ;;  %v1033_v20 = vpop.xlane.xlu2 %1032  ;;  %v1148_v13 = vld [vmem:[#allocation3 + $0x8] sm:$0xff] }
 0x724   :  { %v1061_v16 = vmul.f32 %v2669_v28, %v3313_v48 }
 0x726   :  { %v1071_v57 = vpack.c.bf16 %v1061_v16, %v1060_v55 }
 0x729   :  { %1879 = vrot.lane.b32.xlu1 %v3348_v14, %s2844_s9 }
 0x72b   :  { %v1029_v10 = vpop.xlane.xlu0 %1028  ;;  %v1358_v24 = vpop.permute.xlu2 %1357 }
 0x72c   :  { %2670 = vrcp.f32 %v1029_v10  ;;  %v1404_v59 = vsel %vm287_vm2, %v1358_v24, 0 }
 0x72d   :  { %v1117_v17 = vpop.f32.mrf.mxu0  ;;  %2672 = vrcp.f32 %v1027_v45 }
 0x72f   :  { %1131 = vmatmul.bf16.gmra.mxu0 %v1071_v57 }
 0x732   :  { %v2671_v6 = vpop.eup %2670 }
 0x733   :  { %v2673_v19 = vpop.eup %2672  ;;  %v1063_v7 = vmul.f32 %v2671_v6, %v3336_v62  ;;  %v1031_v21 = vpop.xlane.xlu1 %1030 }
 0x734   :  { %v1062_v50 = vmul.f32 %v2673_v19, %v3323_v2  ;;  %2674 = vrcp.f32 %v1031_v21  ;;  %v1354_v40 = vpop.permute.xlu2 %1353 }
 0x735   :  { %v1119_v31 = vpop.f32.mrf.mxu0  ;;  %2676 = vrcp.f32 %v1033_v20  ;;  %v1398_v47 = vsel %vm287_vm2, %v1354_v40, 0 }
 0x736   :  { %v1165_v18 = vpack.c.bf16 %v1119_v31, %v1117_v17  ;;  %v1072_v23 = vpack.c.bf16 %v1063_v7, %v1062_v50  ;;  %v1149_v50 = vld [vmem:[#allocation3 + $0x10] sm:$0xff] }
 0x738   :  { %2483 = vmatmul.msk.bf16.gmra.mxu2 %vm287_vm2, %v1165_v18 }
 0x73a   :  { %v2675_v32 = vpop.eup %2674 }
 0x73b   :  { %v2677_v62 = vpop.eup %2676  ;;  %v1064_v2 = vmul.f32 %v2675_v32, %v3341_v25 }
 0x73c   :  { %v1065_v33 = vmul.f32 %v2677_v62, %v3332_v3  ;;  %v1888_v1 = vpop.permute.xlu2 %1887 }
 0x73d   :  { %v1122_v48 = vpop.f32.mrf.mxu0  ;;  %v1931_v4 = vsel %vm287_vm2, %v1888_v1, 0 }
 0x73e   :  { %v1360_v11 = vpop.permute.xlu0 %1359  ;;  %v1073_v39 = vpack.c.bf16 %v1065_v33, %v1064_v2  ;;  %v1151_v2 = vld [vmem:[#allocation3 + $0x20] sm:$0xff] }
 0x73f   :  { %1136 = vmatmul.bf16.gmra.mxu0 %v1072_v23  ;;  %v1407_v26 = vsel %vm287_vm2, %v1360_v11, 0 }
 0x740   :  { %1409 = vmatpush.bf16.xpose.msrb.mxu1 %v1407_v26  ;;  %v1150_v26 = vld [vmem:[#allocation3 + $0x18] sm:$0xff] }
 0x744   :  { %v1348_v43 = vpop.permute.xlu2 %1347 }
 0x745   :  { %v1124_v30 = vpop.f32.mrf.mxu0  ;;  %v1389_v63 = vsel %vm287_vm2, %v1348_v43, 0 }
 0x746   :  { %v1166_v56 = vpack.c.bf16 %v1124_v30, %v1122_v48  ;;  %v1894_v37 = vpop.permute.xlu0 %1893 }
 0x747   :  { %v1940_v46 = vsel %vm287_vm2, %v1894_v37, 0 }
 0x748   :  { %2484 = vmatmul.msk.bf16.gmra.mxu2 %vm287_vm2, %v1166_v56  ;;  %1410 = vmatpush.bf16.xpose.msrb.mxu1 %v1404_v59 }
 0x74b   :  { %v1896_v15 = vpop.permute.xlu1 %1895 }
 0x74c   :  { %v1943_v35 = vsel %vm287_vm2, %v1896_v15, 0  ;;  %v1882_v17 = vpop.permute.xlu2 %1881 }
 0x74d   :  { %1945 = vmatpush.bf16.xpose.msrb.mxu2 %v1943_v35  ;;  %v1922_v45 = vsel %vm287_vm2, %v1882_v17, 0 }
 0x74e   :  { %v1892_v36 = vpop.permute.xlu0 %1891 }
 0x74f   :  { %1141 = vmatmul.bf16.gmra.mxu0 %v1073_v39  ;;  %v1937_v25 = vsel %vm287_vm2, %v1892_v36, 0  ;;  %v1152_v39 = vld [vmem:[#allocation3 + $0x28] sm:$0xff] }
 0x753   :  { %v1356_v29 = vpop.permute.xlu1 %1355 }
 0x754   :  { %v1401_v54 = vsel %vm287_vm2, %v1356_v29, 0  ;;  %v1332_v31 = vpop.permute.xlu2 %1331 }
 0x755   :  { %1411 = vmatpush.bf16.xpose.msrb.mxu1 %v1401_v54  ;;  %1946 = vmatpush.bf16.xpose.msrb.mxu2 %v1940_v46 }
 0x756   :  { %v1352_v44 = vpop.permute.xlu0 %1351 }
 0x757   :  { %v1395_v61 = vsel %vm287_vm2, %v1352_v44, 0 }
 0x75b   :  { %v1890_v3 = vpop.permute.xlu1 %1889 }
 0x75c   :  { %v1934_v38 = vsel %vm287_vm2, %v1890_v3, 0  ;;  %v1870_v62 = vpop.permute.xlu2 %1869 }
 0x75d   :  { %1412 = vmatpush.bf16.xpose.msrb.mxu1 %v1398_v47  ;;  %1947 = vmatpush.bf16.xpose.msrb.mxu2 %v1937_v25  ;;  %v1153_v25 = vld [vmem:[#allocation3 + $0x30] sm:$0xff] }
 0x75e   :  { %v1886_v22 = vpop.permute.xlu0 %1885 }
 0x75f   :  { %v1928_v49 = vsel %vm287_vm2, %v1886_v22, 0 }
 0x763   :  { %v1350_v51 = vpop.permute.xlu1 %1349 }
 0x764   :  { %v1392_v5 = vsel %vm287_vm2, %v1350_v51, 0  ;;  %v1338_v37 = vpop.permute.xlu2 %1337 }
 0x765   :  { %1413 = vmatpush.bf16.xpose.msrb.mxu1 %v1395_v61  ;;  %1948 = vmatpush.bf16.xpose.msrb.mxu2 %v1934_v38  ;;  %v1154_v61 = vld [vmem:[#allocation3 + $0x38] sm:$0xff] }
 0x766   :  { %v1346_v0 = vpop.permute.xlu0 %1345 }
 0x767   :  { %v1386_v10 = vsel %vm287_vm2, %v1346_v0, 0  ;;  %v1306_v0 = vld [vmem:[#allocation4 + $0x108] sm:$0xff] }
 0x76b   :  { %v1884_v12 = vpop.permute.xlu1 %1883 }
 0x76c   :  { %v1925_v16 = vsel %vm287_vm2, %v1884_v12, 0 }
 0x76d   :  { %1414 = vmatpush.bf16.xpose.msrb.mxu1 %v1392_v5  ;;  %1949 = vmatpush.bf16.xpose.msrb.mxu2 %v1931_v4 }
 0x76e   :  { %v1866_v6 = vpop.permute.xlu0 %1865 }
 0x772   :  { %v1208_v58 = vpop.f32.mrf.mxu2 }
 0x773   :  { %v1248_v9 = vadd.f32 %v1208_v58, %v1147_v52  ;;  %v1330_v57 = vpop.permute.xlu1 %1329  ;;  %v1876_v52 = vpop.permute.xlu2 %1875 }
 0x775   :  { %1264 = vst.msk [vmem:[#allocation3] sm:$0xff] %vm116_vm0, %v1248_v9  ;;  %1415 = vmatpush.bf16.xpose.msrb.mxu1 %v1389_v63  ;;  %1950 = vmatpush.bf16.xpose.msrb.mxu2 %v1928_v49  ;;  %v1305_v9 = vld [vmem:[#allocation4 + $0x100] sm:$0xff] }
 0x776   :  { %v1334_v19 = vpop.permute.xlu0 %1333 }
 0x77a   :  { %v1210_v28 = vpop.f32.mrf.mxu2 }
 0x77b   :  { %v1249_v55 = vadd.f32 %v1210_v28, %v1148_v13  ;;  %v1868_v23 = vpop.permute.xlu1 %1867  ;;  %v1344_v58 = vpop.permute.xlu2 %1343  ;;  %v1307_v28 = vld [vmem:[#allocation4 + $0x110] sm:$0xff] }
 0x77d   :  { %1265 = vst.msk [vmem:[#allocation3 + $0x8] sm:$0xff] %vm116_vm0, %v1249_v55  ;;  %1416 = vmatpush.bf16.xpose.msrb.mxu1 %v1386_v10  ;;  %1951 = vmatpush.bf16.xpose.msrb.mxu2 %v1925_v16  ;;  %v1308_v10 = vld [vmem:[#allocation4 + $0x118] sm:$0xff] }
 0x77e   :  { %v1872_v40 = vpop.permute.xlu0 %1871 }
 0x783   :  { %v1336_v32 = vpop.permute.xlu1 %1335 }
 0x784   :  { %2489 = vmatmul.msk.bf16.vlgmr.msrb.gmra.mxu1 %vm287_vm2, %v1330_v57 }
 0x785   :  { %1952 = vmatpush.bf16.xpose.msrb.mxu2 %v1922_v45  ;;  %v1309_v45 = vld [vmem:[#allocation4 + $0x120] sm:$0xff] }
 0x786   :  { %v1340_v38 = vpop.permute.xlu0 %1339 }
 0x78b   :  { %v1874_v22 = vpop.permute.xlu1 %1873 }
 0x793   :  { %v1342_v43 = vpop.permute.xlu1 %1341 }
 0x794   :  { %2490 = vmatmul.msk.bf16.gmra.mxu1 %vm287_vm2, %v1332_v31 }
 0x79c   :  { %v1127_v18 = vpop.f32.mrf.mxu0 }
 0x7a4   :  { %v1129_v7 = vpop.f32.mrf.mxu0  ;;  %2491 = vmatmul.msk.bf16.gmra.mxu1 %vm287_vm2, %v1334_v19 }
 0x7a5   :  { %v1167_v20 = vpack.c.bf16 %v1129_v7, %v1127_v18  ;;  %v1213_v21 = vpop.f32.mrf.mxu2  ;;  %v1310_v18 = vld [vmem:[#allocation4 + $0x128] sm:$0xff]  ;;  %v1155_v7 = vld [vmem:[#allocation3 + $0x40] sm:$0xff] }
 0x7a6   :  { %v1250_v48 = vadd.f32 %v1213_v21, %v1149_v50 }
 0x7a7   :  { %2485 = vmatmul.msk.bf16.gmra.mxu2 %vm287_vm2, %v1167_v20 }
 0x7a8   :  { %1266 = vst.msk [vmem:[#allocation3 + $0x10] sm:$0xff] %vm116_vm0, %v1250_v48  ;;  %v1156_v48 = vld [vmem:[#allocation3 + $0x48] sm:$0xff] }
 0x7ac   :  { %v1132_v11 = vpop.f32.mrf.mxu0 }
 0x7ad   :  { %v1215_v24 = vpop.f32.mrf.mxu2 }
 0x7ae   :  { %v1251_v30 = vadd.f32 %v1215_v24, %v1150_v26  ;;  %v1157_v26 = vld [vmem:[#allocation3 + $0x50] sm:$0xff] }
 0x7b0   :  { %1267 = vst.msk [vmem:[#allocation3 + $0x18] sm:$0xff] %vm116_vm0, %v1251_v30 }
 0x7b4   :  { %v1134_v56 = vpop.f32.mrf.mxu0  ;;  %2492 = vmatmul.msk.bf16.gmra.mxu1 %vm287_vm2, %v1336_v32  ;;  %v1158_v32 = vld [vmem:[#allocation3 + $0x58] sm:$0xff] }
 0x7b5   :  { %v1168_v59 = vpack.c.bf16 %v1134_v56, %v1132_v11 }
 0x7b7   :  { %2486 = vmatmul.msk.bf16.gmra.mxu2 %vm287_vm2, %v1168_v59 }
 0x7bb   :  { %v1218_v15 = vpop.f32.mrf.mxu2 }
 0x7bc   :  { %v1252_v33 = vadd.f32 %v1218_v15, %v1151_v2  ;;  %v1137_v35 = vpop.f32.mrf.mxu0  ;;  %v1159_v15 = vld [vmem:[#allocation3 + $0x60] sm:$0xff] }
 0x7be   :  { %1268 = vst.msk [vmem:[#allocation3 + $0x20] sm:$0xff] %vm116_vm0, %v1252_v33 }
 0x7c3   :  { %v1220_v29 = vpop.f32.mrf.mxu2 }
 0x7c4   :  { %v1253_v46 = vadd.f32 %v1220_v29, %v1152_v39  ;;  %v1139_v54 = vpop.f32.mrf.mxu0  ;;  %2493 = vmatmul.msk.bf16.gmra.mxu1 %vm287_vm2, %v1338_v37  ;;  %v1312_v39 = vld [vmem:[#allocation4 + $0x138] sm:$0xff]  ;;  %v1160_v29 = vld [vmem:[#allocation3 + $0x68] sm:$0xff] }
 0x7c5   :  { %v1169_v36 = vpack.c.bf16 %v1139_v54, %v1137_v35 }
 0x7c6   :  { %1269 = vst.msk [vmem:[#allocation3 + $0x28] sm:$0xff] %vm116_vm0, %v1253_v46 }
 0x7c7   :  { %2487 = vmatmul.msk.bf16.gmra.mxu2 %vm287_vm2, %v1169_v36  ;;  %v1880_v36 = vpop.permute.xlu1 %1879 }
 0x7cb   :  { %v1223_v47 = vpop.f32.mrf.mxu2 }
 0x7cc   :  { %v1254_v3 = vadd.f32 %v1223_v47, %v1153_v25  ;;  %v1142_v44 = vpop.f32.mrf.mxu0 }
 0x7ce   :  { %1270 = vst.msk [vmem:[#allocation3 + $0x30] sm:$0xff] %vm116_vm0, %v1254_v3  ;;  %v1162_v3 = vld [vmem:[#allocation3 + $0x78] sm:$0xff] }
 0x7d3   :  { %v1225_v1 = vpop.f32.mrf.mxu2 }
 0x7d4   :  { %v1255_v51 = vadd.f32 %v1225_v1, %v1154_v61  ;;  %v1144_v4 = vpop.f32.mrf.mxu0  ;;  %2494 = vmatmul.msk.bf16.gmra.mxu1 %vm287_vm2, %v1340_v38  ;;  %v1311_v1 = vld [vmem:[#allocation4 + $0x130] sm:$0xff] }
 0x7d5   :  { %v1170_v5 = vpack.c.bf16 %v1144_v4, %v1142_v44 }
 0x7d6   :  { %1271 = vst.msk [vmem:[#allocation3 + $0x38] sm:$0xff] %vm116_vm0, %v1255_v51 }
 0x7d7   :  { %2488 = vmatmul.msk.bf16.gmra.mxu2 %vm287_vm2, %v1170_v5 }
 0x7e4   :  { %2495 = vmatmul.msk.bf16.gmra.mxu1 %vm287_vm2, %v1342_v43 }
 0x7e7   :  { %2505 = vmatmul.msk.bf16.vlgmr.msrb.gmra.mxu2 %vm287_vm2, %v1866_v6 }
 0x7f4   :  { %2496 = vmatmul.msk.bf16.gmra.mxu1 %vm287_vm2, %v1344_v58 }
 0x7f7   :  { %2506 = vmatmul.msk.bf16.gmra.mxu2 %vm287_vm2, %v1868_v23 }
 0x801   :  { %v1418_v49 = vpop.f32.mrf.mxu1 }
 0x802   :  { %v3478_v63 = vadd.f32 %v1418_v49, %v1305_v9 }
 0x804   :  { %1458 = vmax.xlane.f32.xlu0 %v3478_v63 }
 0x807   :  { %2507 = vmatmul.msk.bf16.gmra.mxu2 %vm287_vm2, %v1870_v62  ;;  %v1878_v62 = vpop.permute.xlu0 %1877 }
 0x809   :  { %v1420_v12 = vpop.f32.mrf.mxu1 }
 0x80a   :  { %v3482_v13 = vadd.f32 %v1420_v12, %v1306_v0 }
 0x80c   :  { %1460 = vmax.xlane.f32.xlu2 %v3482_v13 }
 0x811   :  { %v1423_v55 = vpop.f32.mrf.mxu1 }
 0x812   :  { %v3485_v16 = vadd.f32 %v1423_v55, %v1307_v28 }
 0x814   :  { %1462 = vmax.xlane.f32.xlu2 %v3485_v16 }
 0x817   :  { %2508 = vmatmul.msk.bf16.gmra.mxu2 %vm287_vm2, %v1872_v40  ;;  %v1161_v40 = vld [vmem:[#allocation3 + $0x70] sm:$0xff] }
 0x819   :  { %v1425_v17 = vpop.f32.mrf.mxu1 }
 0x81a   :  { %v3489_v57 = vadd.f32 %v1425_v17, %v1308_v10  ;;  %v1844_v10 = vld [vmem:[#allocation4 + $0x198] sm:$0xff] }
 0x81c   :  { %1464 = vmax.xlane.f32.xlu1 %v3489_v57 }
 0x821   :  { %v1428_v31 = vpop.f32.mrf.mxu1 }
 0x822   :  { %v3492_v6 = vadd.f32 %v1428_v31, %v1309_v45 }
 0x824   :  { %1466 = vmax.xlane.f32.xlu1 %v3492_v6 }
 0x827   :  { %2509 = vmatmul.msk.bf16.gmra.mxu2 %vm287_vm2, %v1874_v22 }
 0x829   :  { %v1430_v19 = vpop.f32.mrf.mxu1 }
 0x82a   :  { %v1228_v20 = vpop.f32.mrf.mxu2  ;;  %v3496_v50 = vadd.f32 %v1430_v19, %v1310_v18 }
 0x82b   :  { %v1256_v21 = vadd.f32 %v1228_v20, %v1155_v7  ;;  %v1845_v7 = vld [vmem:[#allocation4 + $0x1a0] sm:$0xff] }
 0x82c   :  { %1624 = vrot.lane.b32.xlu2 %v3348_v14, %s2845_s10  ;;  %1468 = vmax.xlane.f32.xlu0 %v3496_v50 }
 0x82d   :  { %1272 = vst.msk [vmem:[#allocation3 + $0x40] sm:$0xff] %vm116_vm0, %v1256_v21  ;;  %v1842_v21 = vld [vmem:[#allocation4 + $0x188] sm:$0xff] }
 0x831   :  { %v1433_v2 = vpop.f32.mrf.mxu1 }
 0x832   :  { %v1230_v23 = vpop.f32.mrf.mxu2  ;;  %v3532_v4 = vadd.f32 %v1433_v2, %v1311_v1  ;;  %v1850_v1 = vld [vmem:[#allocation4 + $0x1c8] sm:$0xff] }
 0x833   :  { %v1257_v11 = vadd.f32 %v1230_v23, %v1156_v48 }
 0x835   :  { %1273 = vst.msk [vmem:[#allocation3 + $0x48] sm:$0xff] %vm116_vm0, %v1257_v11 }
 0x837   :  { %2510 = vmatmul.msk.bf16.gmra.mxu2 %vm287_vm2, %v1876_v52 }
 0x839   :  { %v1435_v37 = vpop.f32.mrf.mxu1 }
 0x83a   :  { %v1233_v24 = vpop.f32.mrf.mxu2  ;;  %v3518_v54 = vadd.f32 %v1435_v37, %v1312_v39  ;;  %v1314_v39 = vld [vmem:[#allocation4 + $0x148] sm:$0xff] }
 0x83b   :  { %v1258_v30 = vadd.f32 %v1233_v24, %v1157_v26 }
 0x83d   :  { %1274 = vst.msk [vmem:[#allocation3 + $0x50] sm:$0xff] %vm116_vm0, %v1258_v30  ;;  %1622 = vrot.lane.b32.xlu1 %v3344_v27, %s2845_s10 }
 0x840   :  { %1620 = vrot.lane.b32.xlu0 %v3368_v42, %s2845_s10 }
 0x841   :  { %v1438_v11 = vpop.f32.mrf.mxu1 }
 0x842   :  { %v1235_v56 = vpop.f32.mrf.mxu2 }
 0x843   :  { %v1259_v59 = vadd.f32 %v1235_v56, %v1158_v32  ;;  %v1313_v32 = vld [vmem:[#allocation4 + $0x140] sm:$0xff]  ;;  %v1847_v56 = vld [vmem:[#allocation4 + $0x1b0] sm:$0xff] }
 0x845   :  { %1275 = vst.msk [vmem:[#allocation3 + $0x58] sm:$0xff] %vm116_vm0, %v1259_v59  ;;  %2160 = vrot.lane.b32.xlu1 %v3348_v14, %s2846_s11  ;;  %v3575_v59 = vadd.f32 %v1438_v11, %v1313_v32 }
 0x847   :  { %2511 = vmatmul.msk.bf16.gmra.mxu2 %vm287_vm2, %v1878_v62  ;;  %v1843_v62 = vld [vmem:[#allocation4 + $0x190] sm:$0xff] }
 0x848   :  { %1616 = vrot.lane.b32.xlu0 %v3362_v34, %s2845_s10 }
 0x84a   :  { %v1238_v33 = vpop.f32.mrf.mxu2 }
 0x84b   :  { %v1260_v35 = vadd.f32 %v1238_v33, %v1159_v15 }
 0x84d   :  { %1276 = vst.msk [vmem:[#allocation3 + $0x60] sm:$0xff] %vm116_vm0, %v1260_v35  ;;  %1618 = vrot.lane.b32.xlu1 %v3356_v8, %s2845_s10 }
 0x852   :  { %v1240_v46 = vpop.f32.mrf.mxu2 }
 0x853   :  { %v1261_v14 = vadd.f32 %v1240_v46, %v1160_v29  ;;  %v1440_v29 = vpop.f32.mrf.mxu1 }
 0x855   :  { %1277 = vst.msk [vmem:[#allocation3 + $0x68] sm:$0xff] %vm116_vm0, %v1261_v14  ;;  %2158 = vrot.lane.b32.xlu1 %v3344_v27, %s2846_s11  ;;  %1472 = vmax.xlane.f32.xlu2 %v3518_v54  ;;  %v3585_v14 = vadd.f32 %v1440_v29, %v1314_v39 }
 0x857   :  { %2512 = vmatmul.msk.bf16.gmra.mxu2 %vm287_vm2, %v1880_v36  ;;  %v1846_v36 = vld [vmem:[#allocation4 + $0x1a8] sm:$0xff] }
 0x85a   :  { %v1243_v25 = vpop.f32.mrf.mxu2 }
 0x85b   :  { %v1262_v47 = vadd.f32 %v1243_v25, %v1161_v40 }
 0x85d   :  { %1278 = vst.msk [vmem:[#allocation3 + $0x70] sm:$0xff] %vm116_vm0, %v1262_v47  ;;  %v1849_v47 = vld [vmem:[#allocation4 + $0x1c0] sm:$0xff] }
 0x862   :  { %v1245_v44 = vpop.f32.mrf.mxu2 }
 0x863   :  { %v1263_v38 = vadd.f32 %v1245_v44, %v1162_v3 }
 0x865   :  { %1279 = vst.msk [vmem:[#allocation3 + $0x78] sm:$0xff] %vm116_vm0, %v1263_v38 }
 0x86a   :  { %v3545_v9 = vpop.f32.mrf.mxu2 }
 0x86d   :  { %2156 = vrot.lane.b32.xlu2 %v3368_v42, %s2846_s11 }
 0x875   :  { %1614 = vrot.lane.b32.xlu2 %v3386_v53, %s2845_s10 }
 0x877   :  { %v1459_v27 = vpop.xlane.xlu0 %1458 }
 0x878   :  { %v1490_v61 = vsub.f32 %v3478_v63, %v1459_v27  ;;  %v1956_v63 = vpop.f32.mrf.mxu2  ;;  %v1841_v27 = vld [vmem:[#allocation4 + $0x180] sm:$0xff] }
 0x879   :  { %v3570_v26 = vadd.f32 %v1956_v63, %v1842_v21 }
 0x87a   :  { %v1506_v51 = vmul.f32 1.442695, %v1490_v61  ;;  %v3598_v61 = vadd.f32 %v3545_v9, %v1841_v27 }
 0x87c   :  { %2678 = vpow2.f32 %v1506_v51 }
 0x87d   :  { %1612 = vrot.lane.b32.xlu2 %v3372_v41, %s2845_s10 }
 0x87f   :  { %v1461_v5 = vpop.xlane.xlu2 %1460  ;;  %1470 = vmax.xlane.f32.xlu1 %v3532_v4 }
 0x880   :  { %v1491_v22 = vsub.f32 %v3482_v13, %v1461_v5  ;;  %v1959_v12 = vpop.f32.mrf.mxu2 }
 0x881   :  { %v3581_v15 = vadd.f32 %v1959_v12, %v1843_v62  ;;  %v1853_v62 = vld [vmem:[#allocation4 + $0x1e0] sm:$0xff] }
 0x882   :  { %v3538_v42 = vpop.eup %2678  ;;  %v1508_v43 = vmul.f32 1.442695, %v1491_v22  ;;  %v1848_v22 = vld [vmem:[#allocation4 + $0x1b8] sm:$0xff] }
 0x883   :  { %1538 = vadd.xlane.f32.xlu0 %v3538_v42 }
 0x884   :  { %2680 = vpow2.f32 %v1508_v43 }
 0x885   :  { %2150 = vrot.lane.b32.xlu2 %v3386_v53, %s2846_s11 }
 0x887   :  { %v1463_v52 = vpop.xlane.xlu2 %1462 }
 0x888   :  { %v1961_v13 = vpop.f32.mrf.mxu2  ;;  %v1492_v33 = vsub.f32 %v3485_v16, %v1463_v52 }
 0x889   :  { %v3561_v31 = vadd.f32 %v1961_v13, %v1844_v10 }
 0x88a   :  { %v3543_v58 = vpop.eup %2680  ;;  %v1510_v46 = vmul.f32 1.442695, %v1492_v33 }
 0x88b   :  { %1540 = vadd.xlane.f32.xlu1 %v3543_v58 }
 0x88d   :  { %2148 = vrot.lane.b32.xlu2 %v3372_v41, %s2846_s11 }
 0x88f   :  { %v1625_v49 = vpop.permute.xlu2 %1624  ;;  %v1465_v0 = vpop.xlane.xlu1 %1464 }
 0x890   :  { %1634 = vmatpush.bf16.msra.mxu3 %v1625_v49  ;;  %v1493_v41 = vsub.f32 %v3489_v57, %v1465_v0  ;;  %v1964_v17 = vpop.f32.mrf.mxu2 }
 0x891   :  { %v3567_v48 = vadd.f32 %v1964_v17, %v1845_v7 }
 0x892   :  { %v1512_v45 = vmul.f32 1.442695, %v1493_v41 }
 0x894   :  { %2682 = vpow2.f32 %v1512_v45  ;;  %v1443_v45 = vpop.f32.mrf.mxu1 }
 0x895   :  { %2684 = vpow2.f32 %v1510_v46 }
 0x897   :  { %2152 = vrot.lane.b32.xlu0 %v3362_v34, %s2846_s11  ;;  %v3556_v53 = vpop.xlane.xlu1 %1466 }
 0x898   :  { %v1966_v18 = vpop.f32.mrf.mxu2 }
 0x899   :  { %v3588_v40 = vadd.f32 %v1966_v18, %v1846_v36 }
 0x89a   :  { %v3564_v19 = vpop.eup %2682 }
 0x89b   :  { %v3591_v3 = vpop.eup %2684 }
 0x89f   :  { %1610 = vrot.lane.b32.xlu0 %v3380_v60, %s2845_s10  ;;  %v3558_v28 = vpop.xlane.xlu0 %1468 }
 0x8a0   :  { %v1969_v23 = vpop.f32.mrf.mxu2 }
 0x8a1   :  { %v3577_v2 = vadd.f32 %v1969_v23, %v1847_v56  ;;  %v1318_v23 = vld [vmem:[#allocation4 + $0x168] sm:$0xff] }
 0x8a4   :  { %2154 = vrot.lane.b32.xlu1 %v3356_v8, %s2846_s11 }
 0x8a8   :  { %v1971_v35 = vpop.f32.mrf.mxu2 }
 0x8a9   :  { %v3604_v43 = vadd.f32 %v1971_v35, %v1848_v22 }
 0x8af   :  { %v1623_v55 = vpop.permute.xlu1 %1622 }
 0x8b0   :  { %1635 = vmatpush.bf16.msra.mxu3 %v1623_v55  ;;  %v1974_v16 = vpop.f32.mrf.mxu2 }
 0x8b1   :  { %v3594_v44 = vadd.f32 %v1974_v16, %v1849_v47 }
 0x8b2   :  { %v1621_v34 = vpop.permute.xlu0 %1620 }
 0x8b4   :  { %1636 = vmatpush.bf16.msra.mxu3 %v1621_v34 }
 0x8b6   :  { %2000 = vmax.xlane.f32.xlu2 %v3561_v31 }
 0x8b7   :  { %v2161_v8 = vpop.permute.xlu1 %2160 }
 0x8b8   :  { %2170 = vmatpush.bf16.msra.mxu1 %v2161_v8  ;;  %v1976_v51 = vpop.f32.mrf.mxu2 }
 0x8b9   :  { %v3601_v5 = vadd.f32 %v1976_v51, %v1850_v1  ;;  %v1495_v51 = vsub.f32 %v3496_v50, %v3558_v28 }
 0x8ba   :  { %v1617_v20 = vpop.permute.xlu0 %1616 }
 0x8be   :  { %1544 = vadd.xlane.f32.xlu2 %v3564_v19 }
 0x8bf   :  { %v1619_v57 = vpop.permute.xlu1 %1618 }
 0x8c0   :  { %1637 = vmatpush.bf16.msra.mxu3 %v1619_v57  ;;  %v3614_v7 = vpop.f32.mrf.mxu2 }
 0x8c4   :  { %1638 = vmatpush.bf16.msra.mxu3 %v1617_v20 }
 0x8c6   :  { %2002 = vmax.xlane.f32.xlu2 %v3567_v48 }
 0x8c7   :  { %v2159_v24 = vpop.permute.xlu1 %2158 }
 0x8c8   :  { %v3572_v30 = vpop.xlane.xlu2 %1472  ;;  %2171 = vmatpush.bf16.msra.mxu1 %v2159_v24  ;;  %v3621_v21 = vpop.f32.mrf.mxu2 }
 0x8c9   :  { %1996 = vmax.xlane.f32.xlu0 %v3570_v26 }
 0x8ce   :  { %1474 = vmax.xlane.f32.xlu1 %v3575_v59  ;;  %2006 = vmax.xlane.f32.xlu2 %v3577_v2 }
 0x8d0   :  { %v2157_v37 = vpop.permute.xlu2 %2156  ;;  %v1984_v33 = vpop.f32.mrf.mxu2 }
 0x8d1   :  { %1998 = vmax.xlane.f32.xlu0 %v3581_v15  ;;  %2172 = vmatpush.bf16.msra.mxu1 %v2157_v37  ;;  %v3627_v37 = vadd.f32 %v1984_v33, %v1853_v62  ;;  %v1856_v62 = vld [vmem:[#allocation4 + $0x1f8] sm:$0xff] }
 0x8d6   :  { %1476 = vmax.xlane.f32.xlu1 %v3585_v14 }
 0x8d8   :  { %v1615_v25 = vpop.permute.xlu2 %1614 }
 0x8d9   :  { %2004 = vmax.xlane.f32.xlu0 %v3588_v40  ;;  %1639 = vmatpush.bf16.msra.mxu3 %v1615_v25 }
 0x8de   :  { %1542 = vadd.xlane.f32.xlu1 %v3591_v3 }
 0x8e0   :  { %v1613_v38 = vpop.permute.xlu2 %1612 }
 0x8e1   :  { %2010 = vmax.xlane.f32.xlu0 %v3594_v44  ;;  %1640 = vmatpush.bf16.msra.mxu3 %v1613_v38  ;;  %v1315_v38 = vld [vmem:[#allocation4 + $0x150] sm:$0xff] }
 0x8e2   :  { %v3639_v27 = vadd.f32 %v1443_v45, %v1315_v38 }
 0x8e6   :  { %1994 = vmax.xlane.f32.xlu1 %v3598_v61 }
 0x8e8   :  { %v2151_v34 = vpop.permute.xlu2 %2150 }
 0x8e9   :  { %2012 = vmax.xlane.f32.xlu0 %v3601_v5 }
 0x8ee   :  { %2008 = vmax.xlane.f32.xlu1 %v3604_v43 }
 0x8f0   :  { %v2149_v8 = vpop.permute.xlu2 %2148 }
 0x8f2   :  { %v3607_v52 = vpop.xlane.xlu1 %1470 }
 0x8f6   :  { %v1539_v49 = vpop.xlane.xlu0 %1538 }
 0x8fe   :  { %v1541_v63 = vpop.xlane.xlu1 %1540 }
 0x8ff   :  { %2686 = vrcp.f32 %v1541_v63 }
 0x900   :  { %2688 = vrcp.f32 %v1539_v49 }
 0x905   :  { %v2687_v0 = vpop.eup %2686 }
 0x906   :  { %v2689_v12 = vpop.eup %2688  ;;  %v1587_v13 = vmul.f32 %v2687_v0, %v3543_v58  ;;  %v1316_v0 = vld [vmem:[#allocation4 + $0x158] sm:$0xff] }
 0x907   :  { %2146 = vrot.lane.b32.xlu1 %v3380_v60, %s2846_s11  ;;  %v1586_v41 = vmul.f32 %v2689_v12, %v3538_v42  ;;  %v1445_v60 = vpop.f32.mrf.mxu1 }
 0x909   :  { %v2153_v9 = vpop.permute.xlu0 %2152  ;;  %v1602_v10 = vpack.c.bf16 %v1587_v13, %v1586_v41  ;;  %v1494_v41 = vsub.f32 %v3492_v6, %v3556_v53 }
 0x90b   :  { %v1514_v50 = vmul.f32 1.442695, %v1494_v41 }
 0x90f   :  { %v3616_v42 = vpop.f32.mrf.mxu1 }
 0x911   :  { %v1611_v55 = vpop.permute.xlu0 %1610 }
 0x912   :  { %1641 = vmatpush.bf16.msra.mxu3 %v1611_v55  ;;  %v1516_v55 = vmul.f32 1.442695, %v1495_v51  ;;  %v1319_v51 = vld [vmem:[#allocation4 + $0x170] sm:$0xff] }
 0x915   :  { %1642 = vmatmul.bf16.vlgmr.msra.gmra.mxu3 %v1602_v10  ;;  %v3649_v10 = vadd.f32 %v1445_v60, %v1316_v0 }
 0x916   :  { %v2155_v17 = vpop.permute.xlu1 %2154 }
 0x917   :  { %2173 = vmatpush.bf16.msra.mxu1 %v2155_v17  ;;  %v1450_v11 = vpop.f32.mrf.mxu1 }
 0x918   :  { %v3623_v24 = vadd.f32 %v1450_v11, %v1318_v23  ;;  %v1851_v23 = vld [vmem:[#allocation4 + $0x1d0] sm:$0xff] }
 0x91b   :  { %2174 = vmatpush.bf16.msra.mxu1 %v2153_v9 }
 0x91f   :  { %2175 = vmatpush.bf16.msra.mxu1 %v2151_v34  ;;  %v1496_v34 = vsub.f32 %v3532_v4, %v3607_v52  ;;  %v3676_v52 = vadd.f32 %v3614_v7, %v1851_v23 }
 0x923   :  { %2176 = vmatpush.bf16.msra.mxu1 %v2149_v8 }
 0x929   :  { %v2001_v18 = vpop.xlane.xlu2 %2000 }
 0x92a   :  { %v2029_v57 = vsub.f32 %v3561_v31, %v2001_v18  ;;  %v1518_v18 = vmul.f32 1.442695, %v1496_v34 }
 0x92c   :  { %v2048_v58 = vmul.f32 1.442695, %v2029_v57 }
 0x92e   :  { %2690 = vpow2.f32 %v2048_v58 }
 0x931   :  { %v1545_v25 = vpop.xlane.xlu2 %1544 }
 0x934   :  { %v3618_v20 = vpop.eup %2690 }
 0x935   :  { %2080 = vadd.xlane.f32.xlu1 %v3618_v20 }
 0x93c   :  { %v1997_v32 = vpop.xlane.xlu0 %1996 }
 0x93d   :  { %v2027_v56 = vsub.f32 %v3570_v26, %v1997_v32  ;;  %1484 = vmax.xlane.f32.xlu1 %v3623_v24 }
 0x93f   :  { %v2044_v31 = vmul.f32 1.442695, %v2027_v56 }
 0x941   :  { %2692 = vpow2.f32 %v2044_v31  ;;  %v1475_v35 = vpop.xlane.xlu1 %1474  ;;  %v1317_v31 = vld [vmem:[#allocation4 + $0x160] sm:$0xff] }
 0x942   :  { %v1498_v6 = vsub.f32 %v3575_v59, %v1475_v35  ;;  %v3688_v35 = vadd.f32 %v3616_v42, %v1317_v31 }
 0x944   :  { %v1999_v39 = vpop.xlane.xlu0 %1998  ;;  %v1522_v45 = vmul.f32 1.442695, %v1498_v6  ;;  %v1855_v6 = vld [vmem:[#allocation4 + $0x1f0] sm:$0xff] }
 0x945   :  { %v2028_v29 = vsub.f32 %v3581_v15, %v1999_v39  ;;  %2018 = vmax.xlane.f32.xlu1 %v3627_v37 }
 0x947   :  { %v3631_v46 = vpop.eup %2692  ;;  %v2046_v36 = vmul.f32 1.442695, %v2028_v29  ;;  %v2003_v29 = vpop.xlane.xlu2 %2002 }
 0x948   :  { %2076 = vadd.xlane.f32.xlu0 %v3631_v46 }
 0x949   :  { %2694 = vpow2.f32 %v2046_v36  ;;  %v3634_v26 = vpop.xlane.xlu1 %1476  ;;  %v1707_v36 = vld [vmem:[%s3955_s4 + $0x8] sm:$0xf] }
 0x94a   :  { %2696 = vrcp.f32 %v1545_v25  ;;  %v1733_v42 = vsel %vm659_vm3, %v1707_v36, 0 }
 0x94b   :  { %1742 = vmatpush.bf16.msrb.mxu0 %v1733_v42 }
 0x94c   :  { %v2005_v58 = vpop.xlane.xlu0 %2004 }
 0x94d   :  { %v2031_v4 = vsub.f32 %v3588_v40, %v2005_v58 }
 0x94f   :  { %v3636_v16 = vpop.eup %2694  ;;  %v2052_v32 = vmul.f32 1.442695, %v2031_v4 }
 0x950   :  { %2078 = vadd.xlane.f32.xlu0 %v3636_v16  ;;  %v2697_v15 = vpop.eup %2696 }
 0x951   :  { %v1543_v47 = vpop.xlane.xlu1 %1542  ;;  %v1589_v63 = vmul.f32 %v2697_v15, %v3564_v19  ;;  %v1453_v15 = vpop.f32.mrf.mxu1 }
 0x952   :  { %2698 = vrcp.f32 %v1543_v47  ;;  %v1854_v47 = vld [vmem:[#allocation4 + $0x1e8] sm:$0xff] }
 0x958   :  { %v2699_v1 = vpop.eup %2698  ;;  %1478 = vmax.xlane.f32.xlu0 %v3639_v27 }
 0x959   :  { %v1995_v22 = vpop.xlane.xlu1 %1994  ;;  %v1588_v49 = vmul.f32 %v2699_v1, %v3591_v3  ;;  %v1455_v41 = vpop.f32.mrf.mxu1 }
 0x95a   :  { %v2026_v9 = vsub.f32 %v3598_v61, %v1995_v22  ;;  %v1986_v61 = vpop.f32.mrf.mxu2  ;;  %v2007_v22 = vpop.xlane.xlu2 %2006 }
 0x95b   :  { %v1603_v12 = vpack.c.bf16 %v1589_v63, %v1588_v49  ;;  %v3705_v1 = vadd.f32 %v1986_v61, %v1854_v47  ;;  %v2032_v0 = vsub.f32 %v3577_v2, %v2007_v22 }
 0x95c   :  { %v2042_v13 = vmul.f32 1.442695, %v2026_v9  ;;  %v3713_v9 = vadd.f32 %v1453_v15, %v1319_v51 }
 0x95d   :  { %1647 = vmatmul.bf16.gmra.mxu3 %v1603_v12  ;;  %v2011_v12 = vpop.xlane.xlu0 %2010 }
 0x95e   :  { %2700 = vpow2.f32 %v2042_v13  ;;  %v1320_v13 = vld [vmem:[#allocation4 + $0x178] sm:$0xff] }
 0x95f   :  { %2702 = vpow2.f32 %v1516_v55  ;;  %v2034_v55 = vsub.f32 %v3594_v44, %v2011_v12 }
 0x960   :  { %1480 = vmax.xlane.f32.xlu0 %v3649_v10  ;;  %2704 = vpow2.f32 %v1514_v50 }
 0x961   :  { %v2009_v28 = vpop.xlane.xlu1 %2008  ;;  %v2058_v50 = vmul.f32 1.442695, %v2034_v55 }
 0x962   :  { %v2033_v19 = vsub.f32 %v3604_v43, %v2009_v28  ;;  %v1852_v43 = vld [vmem:[#allocation4 + $0x1d8] sm:$0xff]  ;;  %v3671_v57 = vpop.f32.mrf.mxu2 }
 0x963   :  { %v3669_v59 = vadd.f32 %v3621_v21, %v1852_v43  ;;  %v1497_v21 = vsub.f32 %v3518_v54, %v3572_v30  ;;  %v2030_v54 = vsub.f32 %v3567_v48, %v2003_v29  ;;  %v1499_v48 = vsub.f32 %v3585_v14, %v3634_v26 }
 0x964   :  { %v3653_v3 = vpop.eup %2700  ;;  %v2056_v17 = vmul.f32 1.442695, %v2033_v19  ;;  %v2054_v14 = vmul.f32 1.442695, %v2032_v0  ;;  %v3718_v26 = vadd.f32 %v1455_v41, %v1320_v13 }
 0x965   :  { %2074 = vadd.xlane.f32.xlu2 %v3653_v3  ;;  %v3657_v53 = vpop.eup %2702  ;;  %v1520_v7 = vmul.f32 1.442695, %v1497_v21  ;;  %v2050_v25 = vmul.f32 1.442695, %v2030_v54  ;;  %v1524_v63 = vmul.f32 1.442695, %v1499_v48  ;;  %v2013_v2 = vpop.xlane.xlu0 %2012 }
 0x966   :  { %2706 = vpow2.f32 %v2056_v17  ;;  %v3662_v8 = vpop.eup %2704  ;;  %v2035_v44 = vsub.f32 %v3601_v5, %v2013_v2 }
 0x967   :  { %2708 = vpow2.f32 %v1522_v45 }
 0x968   :  { %1548 = vadd.xlane.f32.xlu0 %v3657_v53  ;;  %2710 = vpow2.f32 %v1518_v18  ;;  %v2060_v43 = vmul.f32 1.442695, %v2035_v44  ;;  %v3732_v18 = vadd.f32 %v3671_v57, %v1855_v6 }
 0x969   :  { %2712 = vpow2.f32 %v2052_v32 }
 0x96a   :  { %v1991_v33 = vpop.f32.mrf.mxu2  ;;  %2714 = vpow2.f32 %v1520_v7 }
 0x96b   :  { %v3690_v39 = vadd.f32 %v1991_v33, %v1856_v62  ;;  %2716 = vpow2.f32 %v2050_v25 }
 0x96c   :  { %v3664_v60 = vpop.eup %2706  ;;  %2718 = vpow2.f32 %v1524_v63 }
 0x96d   :  { %1546 = vadd.xlane.f32.xlu2 %v3662_v8  ;;  %2088 = vadd.xlane.f32.xlu1 %v3664_v60  ;;  %v3678_v11 = vpop.eup %2708  ;;  %2720 = vpow2.f32 %v2054_v14 }
 0x96e   :  { %v3684_v56 = vpop.eup %2710  ;;  %2722 = vpow2.f32 %v2058_v50 }
 0x96f   :  { %v3695_v30 = vpop.eup %2712  ;;  %2724 = vpow2.f32 %v2060_v43 }
 0x970   :  { %2016 = vmax.xlane.f32.xlu0 %v3669_v59  ;;  %v3702_v38 = vpop.eup %2714 }
 0x971   :  { %v3710_v49 = vpop.eup %2716 }
 0x972   :  { %v3721_v28 = vpop.eup %2718 }
 0x973   :  { %v3724_v61 = vpop.eup %2720 }
 0x974   :  { %v3728_v17 = vpop.eup %2722 }
 0x975   :  { %2014 = vmax.xlane.f32.xlu2 %v3676_v52  ;;  %1554 = vadd.xlane.f32.xlu1 %v3678_v11  ;;  %v3736_v58 = vpop.eup %2724 }
 0x978   :  { %1550 = vadd.xlane.f32.xlu0 %v3684_v56 }
 0x979   :  { %v2147_v40 = vpop.permute.xlu1 %2146 }
 0x97a   :  { %2177 = vmatpush.bf16.msra.mxu1 %v2147_v40 }
 0x97d   :  { %1482 = vmax.xlane.f32.xlu2 %v3688_v35  ;;  %2024 = vmax.xlane.f32.xlu1 %v3690_v39 }
 0x980   :  { %2084 = vadd.xlane.f32.xlu0 %v3695_v30 }
 0x985   :  { %1552 = vadd.xlane.f32.xlu2 %v3702_v38 }
 0x988   :  { %2020 = vmax.xlane.f32.xlu0 %v3705_v1 }
 0x98d   :  { %2082 = vadd.xlane.f32.xlu2 %v3710_v49 }
 0x990   :  { %1486 = vmax.xlane.f32.xlu0 %v3713_v9 }
 0x995   :  { %1488 = vmax.xlane.f32.xlu2 %v3718_v26 }
 0x998   :  { %v1643_v19 = vpop.f32.mrf.mxu3  ;;  %1556 = vadd.xlane.f32.xlu0 %v3721_v28 }
 0x99d   :  { %2086 = vadd.xlane.f32.xlu2 %v3724_v61 }
 0x9a0   :  { %v1645_v34 = vpop.f32.mrf.mxu3  ;;  %2090 = vadd.xlane.f32.xlu0 %v3728_v17 }
 0x9a1   :  { %v1699_v45 = vpack.c.bf16 %v1645_v34, %v1643_v19 }
 0x9a3   :  { %2497 = vmatmul.msk.bf16.vlgmr.msrb.gmra.mxu0 %vm287_vm2, %v1699_v45 }
 0x9a5   :  { %2022 = vmax.xlane.f32.xlu2 %v3732_v18 }
 0x9a8   :  { %v2081_v31 = vpop.xlane.xlu1 %2080 }
 0x9ad   :  { %2092 = vadd.xlane.f32.xlu2 %v3736_v58 }
 0x9b0   :  { %v1485_v29 = vpop.xlane.xlu1 %1484 }
 0x9b1   :  { %v1503_v34 = vsub.f32 %v3623_v24, %v1485_v29 }
 0x9b8   :  { %v2019_v0 = vpop.xlane.xlu1 %2018 }
 0x9b9   :  { %v2038_v41 = vsub.f32 %v3627_v37, %v2019_v0 }
 0x9bb   :  { %v2077_v5 = vpop.xlane.xlu0 %2076  ;;  %v2066_v45 = vmul.f32 1.442695, %v2038_v41 }
 0x9c3   :  { %v2079_v23 = vpop.xlane.xlu0 %2078 }
 0x9cb   :  { %v1479_v4 = vpop.xlane.xlu0 %1478 }
 0x9cc   :  { %v1500_v32 = vsub.f32 %v3639_v27, %v1479_v4 }
 0x9ce   :  { %v1526_v21 = vmul.f32 1.442695, %v1500_v32 }
 0x9d0   :  { %2726 = vpow2.f32 %v1526_v21 }
 0x9d1   :  { %2728 = vrcp.f32 %v2077_v5 }
 0x9d3   :  { %v1481_v62 = vpop.xlane.xlu0 %1480 }
 0x9d4   :  { %v1501_v57 = vsub.f32 %v3649_v10, %v1481_v62 }
 0x9d6   :  { %v3741_v33 = vpop.eup %2726  ;;  %v1528_v40 = vmul.f32 1.442695, %v1501_v57 }
 0x9d7   :  { %1558 = vadd.xlane.f32.xlu1 %v3741_v33  ;;  %v2729_v36 = vpop.eup %2728 }
 0x9d8   :  { %2730 = vpow2.f32 %v1528_v40  ;;  %v2075_v7 = vpop.xlane.xlu2 %2074  ;;  %v2123_v10 = vmul.f32 %v2729_v36, %v3631_v46 }
 0x9d9   :  { %2732 = vrcp.f32 %v2075_v7 }
 0x9db   :  { %v1549_v54 = vpop.xlane.xlu0 %1548 }
 0x9dc   :  { %2734 = vrcp.f32 %v1549_v54 }
 0x9de   :  { %v3744_v42 = vpop.eup %2730 }
 0x9df   :  { %v2733_v27 = vpop.eup %2732  ;;  %1560 = vadd.xlane.f32.xlu0 %v3744_v42 }
 0x9e0   :  { %v2122_v25 = vmul.f32 %v2733_v27, %v3653_v3  ;;  %v1648_v47 = vpop.f32.mrf.mxu3  ;;  %v1547_v15 = vpop.xlane.xlu2 %1546 }
 0x9e1   :  { %2736 = vrcp.f32 %v1547_v15 }
 0x9e2   :  { %v2138_v48 = vpack.c.bf16 %v2123_v10, %v2122_v25  ;;  %v2735_v63 = vpop.eup %2734  ;;  %2738 = vrcp.f32 %v2079_v23  ;;  %v2089_v23 = vpop.xlane.xlu1 %2088 }
 0x9e3   :  { %v2017_v51 = vpop.xlane.xlu0 %2016  ;;  %2740 = vrcp.f32 %v2081_v31  ;;  %v1591_v14 = vmul.f32 %v2735_v63, %v3657_v53  ;;  %v1532_v53 = vmul.f32 1.442695, %v1503_v34 }
 0x9e4   :  { %v2037_v22 = vsub.f32 %v3669_v59, %v2017_v51  ;;  %2178 = vmatmul.bf16.vlgmr.msra.gmra.mxu1 %v2138_v48 }
 0x9e6   :  { %v2064_v12 = vmul.f32 1.442695, %v2037_v22 }
 0x9e7   :  { %v2737_v13 = vpop.eup %2736 }
 0x9e8   :  { %2742 = vpow2.f32 %v2064_v12  ;;  %v1650_v46 = vpop.f32.mrf.mxu3  ;;  %v2015_v55 = vpop.xlane.xlu2 %2014  ;;  %v1590_v3 = vmul.f32 %v2737_v13, %v3662_v8 }
 0x9e9   :  { %v1700_v50 = vpack.c.bf16 %v1650_v46, %v1648_v47  ;;  %v2036_v19 = vsub.f32 %v3676_v52, %v2015_v55  ;;  %v2739_v2 = vpop.eup %2738 }
 0x9ea   :  { %v1604_v59 = vpack.c.bf16 %v1591_v14, %v1590_v3  ;;  %v2741_v37 = vpop.eup %2740  ;;  %v2124_v8 = vmul.f32 %v2739_v2, %v3636_v16  ;;  %v1555_v57 = vpop.xlane.xlu1 %1554 }
 0x9eb   :  { %v2062_v44 = vmul.f32 1.442695, %v2036_v19  ;;  %v1551_v6 = vpop.xlane.xlu0 %1550  ;;  %2498 = vmatmul.msk.bf16.gmra.mxu0 %vm287_vm2, %v1700_v50  ;;  %v2125_v5 = vmul.f32 %v2741_v37, %v3618_v20 }
 0x9ec   :  { %1652 = vmatmul.bf16.gmra.mxu3 %v1604_v59 }
 0x9ed   :  { %2744 = vpow2.f32 %v2062_v44  ;;  %v2139_v32 = vpack.c.bf16 %v2125_v5, %v2124_v8 }
 0x9ee   :  { %v3756_v43 = vpop.eup %2742  ;;  %2746 = vpow2.f32 %v2066_v45 }
 0x9ef   :  { %2096 = vadd.xlane.f32.xlu1 %v3756_v43  ;;  %2748 = vpow2.f32 %v1532_v53 }
 0x9f0   :  { %v1483_v52 = vpop.xlane.xlu2 %1482 }
 0x9f1   :  { %v1502_v4 = vsub.f32 %v3688_v35, %v1483_v52  ;;  %v1683_v52 = vld [vmem:[#allocation3] sm:$0xff] }
 0x9f2   :  { %v2025_v51 = vpop.xlane.xlu1 %2024 }
 0x9f3   :  { %v3762_v24 = vpop.eup %2744  ;;  %v1530_v21 = vmul.f32 1.442695, %v1502_v4  ;;  %v2085_v31 = vpop.xlane.xlu0 %2084  ;;  %v2041_v12 = vsub.f32 %v3690_v39, %v2025_v51 }
 0x9f4   :  { %2094 = vadd.xlane.f32.xlu2 %v3762_v24  ;;  %2183 = vmatmul.bf16.gmra.mxu1 %v2139_v32  ;;  %v3765_v16 = vpop.eup %2746 }
 0x9f5   :  { %2750 = vpow2.f32 %v1530_v21  ;;  %v3768_v20 = vpop.eup %2748  ;;  %v2072_v3 = vmul.f32 1.442695, %v2041_v12 }
 0x9f6   :  { %2752 = vrcp.f32 %v1551_v6 }
 0x9f7   :  { %2098 = vadd.xlane.f32.xlu1 %v3765_v16 }
 0x9f8   :  { %v1553_v62 = vpop.xlane.xlu2 %1552 }
 0x9f9   :  { %2754 = vrcp.f32 %v1553_v62 }
 0x9fa   :  { %2756 = vrcp.f32 %v2085_v31 }
 0x9fb   :  { %v3770_v35 = vpop.eup %2750  ;;  %v2021_v40 = vpop.xlane.xlu0 %2020 }
 0x9fc   :  { %v2039_v7 = vsub.f32 %v3705_v1, %v2021_v40  ;;  %1562 = vadd.xlane.f32.xlu0 %v3770_v35  ;;  %1564 = vadd.xlane.f32.xlu2 %v3768_v20  ;;  %v2753_v29 = vpop.eup %2752 }
 0x9fd   :  { %v1592_v10 = vmul.f32 %v2753_v29, %v3684_v56 }
 0x9fe   :  { %v2068_v54 = vmul.f32 1.442695, %v2039_v7 }
 0x9ff   :  { %v2755_v36 = vpop.eup %2754 }
 0xa00   :  { %2758 = vpow2.f32 %v2068_v54  ;;  %v2083_v27 = vpop.xlane.xlu2 %2082  ;;  %v1593_v25 = vmul.f32 %v2755_v36, %v3702_v38  ;;  %v2757_v1 = vpop.eup %2756  ;;  %v2243_v36 = vld [vmem:[%s3955_s4 + $0xc] sm:$0xf] }
 0xa01   :  { %2760 = vrcp.f32 %v2083_v27  ;;  %v2127_v13 = vmul.f32 %v2757_v1, %v3695_v30 }
 0xa02   :  { %v1605_v47 = vpack.c.bf16 %v1593_v25, %v1592_v10  ;;  %v2269_v10 = vsel %vm659_vm3, %v2243_v36, 0 }
 0xa03   :  { %v1487_v15 = vpop.xlane.xlu0 %1486  ;;  %2278 = vmatpush.bf16.msrb.mxu3 %v2269_v10 }
 0xa04   :  { %v1504_v48 = vsub.f32 %v3713_v9, %v1487_v15  ;;  %1657 = vmatmul.bf16.gmra.mxu3 %v1605_v47 }
 0xa06   :  { %v3778_v22 = vpop.eup %2758  ;;  %v1534_v63 = vmul.f32 1.442695, %v1504_v48  ;;  %v1685_v48 = vld [vmem:[#allocation3 + $0x10] sm:$0xff] }
 0xa07   :  { %v2761_v0 = vpop.eup %2760  ;;  %2100 = vadd.xlane.f32.xlu0 %v3778_v22 }
 0xa08   :  { %2762 = vpow2.f32 %v1534_v63  ;;  %v1489_v56 = vpop.xlane.xlu2 %1488  ;;  %v2126_v38 = vmul.f32 %v2761_v0, %v3710_v49 }
 0xa09   :  { %v1505_v41 = vsub.f32 %v3718_v26, %v1489_v56  ;;  %2764 = vrcp.f32 %v1555_v57 }
 0xa0a   :  { %v2140_v9 = vpack.c.bf16 %v2127_v13, %v2126_v38  ;;  %v1686_v13 = vld [vmem:[#allocation3 + $0x18] sm:$0xff] }
 0xa0b   :  { %v1536_v46 = vmul.f32 1.442695, %v1505_v41  ;;  %v1557_v55 = vpop.xlane.xlu0 %1556 }
 0xa0c   :  { %2766 = vrcp.f32 %v1557_v55  ;;  %2188 = vmatmul.bf16.gmra.mxu1 %v2140_v9 }
 0xa0d   :  { %2768 = vpow2.f32 %v1536_v46 }
 0xa0e   :  { %v3785_v14 = vpop.eup %2762  ;;  %2770 = vrcp.f32 %v2089_v23 }
 0xa0f   :  { %1566 = vadd.xlane.f32.xlu2 %v3785_v14  ;;  %v2765_v39 = vpop.eup %2764  ;;  %2772 = vpow2.f32 %v2072_v3 }
 0xa10   :  { %v2087_v49 = vpop.xlane.xlu2 %2086  ;;  %v1594_v26 = vmul.f32 %v2765_v39, %v3678_v11 }
 0xa11   :  { %2774 = vrcp.f32 %v2087_v49 }
 0xa12   :  { %v2767_v30 = vpop.eup %2766 }
 0xa13   :  { %v3788_v50 = vpop.eup %2768  ;;  %v1595_v19 = vmul.f32 %v2767_v30, %v3721_v28  ;;  %v2091_v28 = vpop.xlane.xlu0 %2090 }
 0xa14   :  { %1568 = vadd.xlane.f32.xlu1 %v3788_v50  ;;  %v2771_v59 = vpop.eup %2770 }
 0xa15   :  { %v1606_v2 = vpack.c.bf16 %v1595_v19, %v1594_v26  ;;  %v3793_v44 = vpop.eup %2772  ;;  %v2129_v37 = vmul.f32 %v2771_v59, %v3664_v60 }
 0xa17   :  { %v2775_v6 = vpop.eup %2774  ;;  %1662 = vmatmul.bf16.gmra.mxu3 %v1606_v2  ;;  %2104 = vadd.xlane.f32.xlu2 %v3793_v44 }
 0xa18   :  { %v2023_v34 = vpop.xlane.xlu2 %2022  ;;  %v2128_v45 = vmul.f32 %v2775_v6, %v3724_v61 }
 0xa19   :  { %v2040_v8 = vsub.f32 %v3732_v18, %v2023_v34  ;;  %v1684_v18 = vld [vmem:[#allocation3 + $0x8] sm:$0xff] }
 0xa1a   :  { %v2141_v11 = vpack.c.bf16 %v2129_v37, %v2128_v45 }
 0xa1b   :  { %v2070_v53 = vmul.f32 1.442695, %v2040_v8 }
 0xa1c   :  { %2193 = vmatmul.bf16.gmra.mxu1 %v2141_v11 }
 0xa1d   :  { %2776 = vpow2.f32 %v2070_v53 }
 0xa1e   :  { %2778 = vrcp.f32 %v2091_v28 }
 0xa20   :  { %v1744_v5 = vpop.f32.mrf.mxu0  ;;  %v2093_v23 = vpop.xlane.xlu2 %2092 }
 0xa21   :  { %v1784_v4 = vadd.f32 %v1744_v5, %v1683_v52  ;;  %2780 = vrcp.f32 %v2093_v23 }
 0xa23   :  { %v3799_v32 = vpop.eup %2776  ;;  %1800 = vst.msk [vmem:[#allocation3] sm:$0xff] %vm116_vm0, %v1784_v4 }
 0xa24   :  { %2102 = vadd.xlane.f32.xlu0 %v3799_v32  ;;  %v2779_v60 = vpop.eup %2778 }
 0xa25   :  { %v2130_v31 = vmul.f32 %v2779_v60, %v3728_v17 }
 0xa27   :  { %v2781_v61 = vpop.eup %2780 }
 0xa28   :  { %v1746_v21 = vpop.f32.mrf.mxu0  ;;  %v2131_v62 = vmul.f32 %v2781_v61, %v3736_v58 }
 0xa29   :  { %v1785_v57 = vadd.f32 %v1746_v21, %v1684_v18 }
 0xa2a   :  { %v2142_v40 = vpack.c.bf16 %v2131_v62, %v2130_v31 }
 0xa2b   :  { %1801 = vst.msk [vmem:[#allocation3 + $0x8] sm:$0xff] %vm116_vm0, %v1785_v57 }
 0xa2c   :  { %2198 = vmatmul.bf16.gmra.mxu1 %v2142_v40 }
 0xa4a   :  { %v1559_v7 = vpop.xlane.xlu1 %1558 }
 0xa4b   :  { %2782 = vrcp.f32 %v1559_v7 }
 0xa51   :  { %v2783_v54 = vpop.eup %2782 }
 0xa52   :  { %v1561_v29 = vpop.xlane.xlu0 %1560  ;;  %v1596_v17 = vmul.f32 %v2783_v54, %v3741_v33 }
 0xa53   :  { %2784 = vrcp.f32 %v1561_v29 }
 0xa59   :  { %v2785_v27 = vpop.eup %2784 }
 0xa5a   :  { %v1597_v58 = vmul.f32 %v2785_v27, %v3744_v42 }
 0xa5c   :  { %v1607_v25 = vpack.c.bf16 %v1597_v58, %v1596_v17 }
 0xa5e   :  { %1667 = vmatmul.bf16.gmra.mxu3 %v1607_v25 }
 0xa61   :  { %v2179_v8 = vpop.f32.mrf.mxu1 }
 0xa62   :  { %v2097_v47 = vpop.xlane.xlu1 %2096 }
 0xa63   :  { %2786 = vrcp.f32 %v2097_v47 }
 0xa67   :  { %v2095_v15 = vpop.xlane.xlu2 %2094 }
 0xa68   :  { %2788 = vrcp.f32 %v2095_v15  ;;  %v1749_v1 = vpop.f32.mrf.mxu0 }
 0xa69   :  { %v1786_v51 = vadd.f32 %v1749_v1, %v1685_v48  ;;  %v2787_v63 = vpop.eup %2786  ;;  %v2181_v23 = vpop.f32.mrf.mxu1 }
 0xa6a   :  { %v2133_v42 = vmul.f32 %v2787_v63, %v3756_v43  ;;  %v2099_v3 = vpop.xlane.xlu1 %2098  ;;  %v2235_v57 = vpack.c.bf16 %v2181_v23, %v2179_v8  ;;  %v1687_v63 = vld [vmem:[#allocation3 + $0x20] sm:$0xff] }
 0xa6b   :  { %1802 = vst.msk [vmem:[#allocation3 + $0x10] sm:$0xff] %vm116_vm0, %v1786_v51 }
 0xa6e   :  { %v2789_v0 = vpop.eup %2788 }
 0xa6f   :  { %v1653_v12 = vpop.f32.mrf.mxu3  ;;  %v1563_v56 = vpop.xlane.xlu0 %1562  ;;  %v2132_v33 = vmul.f32 %v2789_v0, %v3762_v24 }
 0xa70   :  { %2790 = vrcp.f32 %v1563_v56  ;;  %v1565_v38 = vpop.xlane.xlu2 %1564  ;;  %v1751_v41 = vpop.f32.mrf.mxu0 }
 0xa71   :  { %2792 = vrcp.f32 %v1565_v38  ;;  %v1787_v9 = vadd.f32 %v1751_v41, %v1686_v13  ;;  %v2143_v46 = vpack.c.bf16 %v2133_v42, %v2132_v33  ;;  %v2184_v61 = vpop.f32.mrf.mxu1  ;;  %v1688_v38 = vld [vmem:[#allocation3 + $0x28] sm:$0xff] }
 0xa72   :  { %2794 = vrcp.f32 %v2099_v3 }
 0xa73   :  { %1803 = vst.msk [vmem:[#allocation3 + $0x18] sm:$0xff] %vm116_vm0, %v1787_v9  ;;  %2203 = vmatmul.bf16.gmra.mxu1 %v2143_v46 }
 0xa76   :  { %v2791_v55 = vpop.eup %2790 }
 0xa77   :  { %v2793_v39 = vpop.eup %2792  ;;  %v1655_v49 = vpop.f32.mrf.mxu3  ;;  %v1598_v30 = vmul.f32 %v2791_v55, %v3770_v35 }
 0xa78   :  { %v1701_v26 = vpack.c.bf16 %v1655_v49, %v1653_v12  ;;  %v1599_v24 = vmul.f32 %v2793_v39, %v3768_v20  ;;  %v2795_v59 = vpop.eup %2794  ;;  %v1689_v49 = vld [vmem:[#allocation3 + $0x30] sm:$0xff] }
 0xa79   :  { %v2134_v6 = vmul.f32 %v2795_v59, %v3765_v16  ;;  %v2186_v29 = vpop.f32.mrf.mxu1 }
 0xa7a   :  { %2499 = vmatmul.msk.bf16.gmra.mxu0 %vm287_vm2, %v1701_v26  ;;  %v2101_v43 = vpop.xlane.xlu0 %2100  ;;  %v1608_v19 = vpack.c.bf16 %v1599_v24, %v1598_v30  ;;  %v2236_v36 = vpack.c.bf16 %v2186_v29, %v2184_v61 }
 0xa7b   :  { %2796 = vrcp.f32 %v2101_v43  ;;  %v1690_v43 = vld [vmem:[#allocation3 + $0x38] sm:$0xff] }
 0xa7c   :  { %1672 = vmatmul.bf16.gmra.mxu3 %v1608_v19 }
 0xa81   :  { %v2797_v2 = vpop.eup %2796 }
 0xa82   :  { %v2135_v34 = vmul.f32 %v2797_v2, %v3778_v22  ;;  %v1567_v45 = vpop.xlane.xlu2 %1566 }
 0xa83   :  { %2798 = vrcp.f32 %v1567_v45  ;;  %v1691_v45 = vld [vmem:[#allocation3 + $0x40] sm:$0xff] }
 0xa84   :  { %v2144_v37 = vpack.c.bf16 %v2135_v34, %v2134_v6 }
 0xa86   :  { %2208 = vmatmul.bf16.gmra.mxu1 %v2144_v37 }
 0xa87   :  { %v1658_v35 = vpop.f32.mrf.mxu3  ;;  %v1569_v20 = vpop.xlane.xlu1 %1568 }
 0xa88   :  { %2800 = vrcp.f32 %v1569_v20 }
 0xa89   :  { %v2799_v11 = vpop.eup %2798  ;;  %v2189_v54 = vpop.f32.mrf.mxu1 }
 0xa8a   :  { %v1600_v52 = vmul.f32 %v2799_v11, %v3785_v14  ;;  %v2105_v22 = vpop.xlane.xlu2 %2104 }
 0xa8b   :  { %2802 = vrcp.f32 %v2105_v22 }
 0xa8e   :  { %v2801_v53 = vpop.eup %2800 }
 0xa8f   :  { %v1660_v28 = vpop.f32.mrf.mxu3  ;;  %v1601_v5 = vmul.f32 %v2801_v53, %v3788_v50 }
 0xa90   :  { %v1702_v4 = vpack.c.bf16 %v1660_v28, %v1658_v35  ;;  %v2219_v35 = vld [vmem:[#allocation3] sm:$0xff] }
 0xa91   :  { %v1609_v16 = vpack.c.bf16 %v1601_v5, %v1600_v52  ;;  %v2803_v21 = vpop.eup %2802  ;;  %v2191_v27 = vpop.f32.mrf.mxu1  ;;  %v1692_v52 = vld [vmem:[#allocation3 + $0x48] sm:$0xff] }
 0xa92   :  { %2500 = vmatmul.msk.bf16.gmra.mxu0 %vm287_vm2, %v1702_v4  ;;  %v2137_v14 = vmul.f32 %v2803_v21, %v3793_v44  ;;  %v2237_v17 = vpack.c.bf16 %v2191_v27, %v2189_v54  ;;  %v3847_v4 = vld [vmem:[%s3956_s5] ss:$0 sm:$0xff]  ;;  %v2221_v21 = vld [vmem:[#allocation3 + $0x10] sm:$0xff] }
 0xa93   :  { %1677 = vmatmul.bf16.gmra.mxu3 %v1609_v16  ;;  %v2220_v16 = vld [vmem:[#allocation3 + $0x8] sm:$0xff] }
 0xa97   :  { %v2103_v60 = vpop.xlane.xlu0 %2102 }
 0xa98   :  { %2804 = vrcp.f32 %v2103_v60 }
 0xa99   :  { %v2194_v10 = vpop.f32.mrf.mxu1 }
 0xa9a   :  { %v1663_v18 = vpop.f32.mrf.mxu3 }
 0xa9e   :  { %v2805_v31 = vpop.eup %2804 }
 0xa9f   :  { %v2136_v62 = vmul.f32 %v2805_v31, %v3799_v32 }
 0xaa1   :  { %v2145_v50 = vpack.c.bf16 %v2137_v14, %v2136_v62  ;;  %v2196_v44 = vpop.f32.mrf.mxu1 }
 0xaa2   :  { %v1665_v40 = vpop.f32.mrf.mxu3  ;;  %v2238_v32 = vpack.c.bf16 %v2196_v44, %v2194_v10 }
 0xaa3   :  { %v1703_v7 = vpack.c.bf16 %v1665_v40, %v1663_v18  ;;  %2213 = vmatmul.bf16.gmra.mxu1 %v2145_v50  ;;  %2513 = vmatmul.msk.bf16.vlgmr.msrb.gmra.mxu3 %vm287_vm2, %v2235_v57  ;;  %v2222_v50 = vld [vmem:[#allocation3 + $0x18] sm:$0xff] }
 0xaa5   :  { %2501 = vmatmul.msk.bf16.gmra.mxu0 %vm287_vm2, %v1703_v7 }
 0xaa9   :  { %v2199_v58 = vpop.f32.mrf.mxu1 }
 0xab1   :  { %v2201_v25 = vpop.f32.mrf.mxu1 }
 0xab2   :  { %v2239_v47 = vpack.c.bf16 %v2201_v25, %v2199_v58 }
 0xab3   :  { %2514 = vmatmul.msk.bf16.gmra.mxu3 %vm287_vm2, %v2236_v36 }
 0xac3   :  { %2515 = vmatmul.msk.bf16.gmra.mxu3 %vm287_vm2, %v2237_v17 }
 0xad3   :  { %2516 = vmatmul.msk.bf16.gmra.mxu3 %vm287_vm2, %v2238_v32 }
 0xae1   :  { %v1668_v15 = vpop.f32.mrf.mxu3 }
 0xae3   :  { %2517 = vmatmul.msk.bf16.gmra.mxu3 %vm287_vm2, %v2239_v47 }
 0xae9   :  { %v1670_v48 = vpop.f32.mrf.mxu3 }
 0xaea   :  { %v1704_v1 = vpack.c.bf16 %v1670_v48, %v1668_v15 }
 0xaec   :  { %2502 = vmatmul.msk.bf16.gmra.mxu0 %vm287_vm2, %v1704_v1 }
 0xaf0   :  { %v2204_v51 = vpop.f32.mrf.mxu1 }
 0xaf7   :  { %v1754_v0 = vpop.f32.mrf.mxu0 }
 0xaf8   :  { %v1788_v12 = vadd.f32 %v1754_v0, %v1687_v63  ;;  %v2206_v56 = vpop.f32.mrf.mxu1 }
 0xaf9   :  { %v2240_v33 = vpack.c.bf16 %v2206_v56, %v2204_v51 }
 0xafa   :  { %1804 = vst.msk [vmem:[#allocation3 + $0x20] sm:$0xff] %vm116_vm0, %v1788_v12 }
 0xafb   :  { %2518 = vmatmul.msk.bf16.gmra.mxu3 %vm287_vm2, %v2240_v33 }
 0xaff   :  { %v1673_v42 = vpop.f32.mrf.mxu3  ;;  %v1756_v13 = vpop.f32.mrf.mxu0 }
 0xb00   :  { %v1789_v41 = vadd.f32 %v1756_v13, %v1688_v38 }
 0xb01   :  { %v2223_v36 = vld [vmem:[#allocation3 + $0x20] sm:$0xff] }
 0xb02   :  { %1805 = vst.msk [vmem:[#allocation3 + $0x28] sm:$0xff] %vm116_vm0, %v1789_v41 }
 0xb03   :  { %v2209_v9 = vpop.f32.mrf.mxu1 }
 0xb07   :  { %v1675_v46 = vpop.f32.mrf.mxu3 }
 0xb08   :  { %v1705_v55 = vpack.c.bf16 %v1675_v46, %v1673_v42 }
 0xb09   :  { %v2224_v32 = vld [vmem:[#allocation3 + $0x28] sm:$0xff] }
 0xb0a   :  { %2503 = vmatmul.msk.bf16.gmra.mxu0 %vm287_vm2, %v1705_v55 }
 0xb0b   :  { %v2211_v3 = vpop.f32.mrf.mxu1 }
 0xb0c   :  { %v2241_v39 = vpack.c.bf16 %v2211_v3, %v2209_v9  ;;  %v1693_v3 = vld [vmem:[#allocation3 + $0x50] sm:$0xff] }
 0xb0e   :  { %2519 = vmatmul.msk.bf16.gmra.mxu3 %vm287_vm2, %v2241_v39 }
 0xb0f   :  { %v1759_v30 = vpop.f32.mrf.mxu0 }
 0xb10   :  { %v1790_v26 = vadd.f32 %v1759_v30, %v1689_v49 }
 0xb12   :  { %1806 = vst.msk [vmem:[#allocation3 + $0x30] sm:$0xff] %vm116_vm0, %v1790_v26 }
 0xb16   :  { %v1678_v24 = vpop.f32.mrf.mxu3 }
 0xb17   :  { %v1761_v19 = vpop.f32.mrf.mxu0 }
 0xb18   :  { %v1791_v59 = vadd.f32 %v1761_v19, %v1690_v43 }
 0xb19   :  { %v2225_v48 = vld [vmem:[#allocation3 + $0x30] sm:$0xff] }
 0xb1a   :  { %1807 = vst.msk [vmem:[#allocation3 + $0x38] sm:$0xff] %vm116_vm0, %v1791_v59  ;;  %v1694_v59 = vld [vmem:[#allocation3 + $0x58] sm:$0xff] }
 0xb1e   :  { %v1680_v2 = vpop.f32.mrf.mxu3 }
 0xb1f   :  { %v1706_v6 = vpack.c.bf16 %v1680_v2, %v1678_v24 }
 0xb20   :  { %v2214_v34 = vpop.f32.mrf.mxu1 }
 0xb21   :  { %2504 = vmatmul.msk.bf16.gmra.mxu0 %vm287_vm2, %v1706_v6  ;;  %v2226_v12 = vld [vmem:[#allocation3 + $0x38] sm:$0xff] }
 0xb22   :  { %v1764_v37 = vpop.f32.mrf.mxu0 }
 0xb23   :  { %v1792_v8 = vadd.f32 %v1764_v37, %v1691_v45 }
 0xb25   :  { %1808 = vst.msk [vmem:[#allocation3 + $0x40] sm:$0xff] %vm116_vm0, %v1792_v8 }
 0xb26   :  { %v2280_v20 = vpop.f32.mrf.mxu3 }
 0xb27   :  { %v2320_v11 = vadd.f32 %v2280_v20, %v2219_v35 }
 0xb28   :  { %v2216_v53 = vpop.f32.mrf.mxu1 }
 0xb29   :  { %2336 = vst.msk [vmem:[#allocation3] sm:$0xff] %vm116_vm0, %v2320_v11  ;;  %v2242_v28 = vpack.c.bf16 %v2216_v53, %v2214_v34  ;;  %v1695_v53 = vld [vmem:[#allocation3 + $0x60] sm:$0xff] }
 0xb2a   :  { %v1766_v5 = vpop.f32.mrf.mxu0 }
 0xb2b   :  { %v1793_v23 = vadd.f32 %v1766_v5, %v1692_v52  ;;  %2520 = vmatmul.msk.bf16.gmra.mxu3 %vm287_vm2, %v2242_v28 }
 0xb2c   :  { %v2227_v13 = vld [vmem:[#allocation3 + $0x40] sm:$0xff] }
 0xb2d   :  { %1809 = vst.msk [vmem:[#allocation3 + $0x48] sm:$0xff] %vm116_vm0, %v1793_v23 }
 0xb2e   :  { %v2282_v22 = vpop.f32.mrf.mxu3 }
 0xb2f   :  { %v2321_v60 = vadd.f32 %v2282_v22, %v2220_v16  ;;  %v1696_v22 = vld [vmem:[#allocation3 + $0x68] sm:$0xff] }
 0xb30   :  { %v2352_v61 = vld [vmem:[#allocation3] sm:$0xff] }
 0xb31   :  { %v2372_v18 = vadd.f32 %v3847_v4, %v2352_v61  ;;  %2337 = vst.msk [vmem:[#allocation3 + $0x8] sm:$0xff] %vm116_vm0, %v2321_v60 }
 0xb33   :  { %2388 = vst.msk [vmem:[%s3957_s6] sm:$0xff] %vm116_vm0, %v2372_v18 }
 0xb34   :  { %v2228_v30 = vld [vmem:[#allocation3 + $0x48] sm:$0xff] }
 0xb36   :  { %v2285_v31 = vpop.f32.mrf.mxu3 }
 0xb37   :  { %v2322_v62 = vadd.f32 %v2285_v31, %v2221_v21 }
 0xb38   :  { %v2353_v14 = vld [vmem:[#allocation3 + $0x8] sm:$0xff] }
 0xb39   :  { %v2373_v57 = vadd.f32 %v3847_v4, %v2353_v14  ;;  %2338 = vst.msk [vmem:[#allocation3 + $0x10] sm:$0xff] %vm116_vm0, %v2322_v62 }
 0xb3b   :  { %2389 = vst.msk [vmem:[%s3957_s6 + $0x8] sm:$0xff] %vm116_vm0, %v2373_v57 }
 0xb3e   :  { %v2287_v40 = vpop.f32.mrf.mxu3 }
 0xb3f   :  { %v2323_v7 = vadd.f32 %v2287_v40, %v2222_v50 }
 0xb40   :  { %v2354_v29 = vld [vmem:[#allocation3 + $0x10] sm:$0xff] }
 0xb41   :  { %v2374_v54 = vadd.f32 %v3847_v4, %v2354_v29  ;;  %2339 = vst.msk [vmem:[#allocation3 + $0x18] sm:$0xff] %vm116_vm0, %v2323_v7 }
 0xb43   :  { %2390 = vst.msk [vmem:[%s3957_s6 + $0x10] sm:$0xff] %vm116_vm0, %v2374_v54  ;;  %v1697_v54 = vld [vmem:[#allocation3 + $0x70] sm:$0xff] }
 0xb46   :  { %v2290_v27 = vpop.f32.mrf.mxu3 }
 0xb47   :  { %v2324_v10 = vadd.f32 %v2290_v27, %v2223_v36 }
 0xb48   :  { %v2355_v17 = vld [vmem:[#allocation3 + $0x18] sm:$0xff] }
 0xb49   :  { %v2375_v44 = vadd.f32 %v3847_v4, %v2355_v17  ;;  %2340 = vst.msk [vmem:[#allocation3 + $0x20] sm:$0xff] %vm116_vm0, %v2324_v10 }
 0xb4b   :  { %2391 = vst.msk [vmem:[%s3957_s6 + $0x18] sm:$0xff] %vm116_vm0, %v2375_v44  ;;  %v1698_v44 = vld [vmem:[#allocation3 + $0x78] sm:$0xff] }
 0xb4e   :  { %v2292_v58 = vpop.f32.mrf.mxu3 }
 0xb4f   :  { %v2325_v25 = vadd.f32 %v2292_v58, %v2224_v32 }
 0xb50   :  { %v2356_v47 = vld [vmem:[#allocation3 + $0x20] sm:$0xff] }
 0xb51   :  { %v2376_v15 = vadd.f32 %v3847_v4, %v2356_v47  ;;  %2341 = vst.msk [vmem:[#allocation3 + $0x28] sm:$0xff] %vm116_vm0, %v2325_v25 }
 0xb53   :  { %2392 = vst.msk [vmem:[%s3957_s6 + $0x20] sm:$0xff] %vm116_vm0, %v2376_v15 }
 0xb56   :  { %v2295_v1 = vpop.f32.mrf.mxu3 }
 0xb57   :  { %v2326_v51 = vadd.f32 %v2295_v1, %v2225_v48 }
 0xb58   :  { %v2357_v63 = vld [vmem:[#allocation3 + $0x28] sm:$0xff] }
 0xb59   :  { %v2377_v0 = vadd.f32 %v3847_v4, %v2357_v63  ;;  %2342 = vst.msk [vmem:[#allocation3 + $0x30] sm:$0xff] %vm116_vm0, %v2326_v51 }
 0xb5b   :  { %2393 = vst.msk [vmem:[%s3957_s6 + $0x28] sm:$0xff] %vm116_vm0, %v2377_v0 }
 0xb5e   :  { %v2297_v56 = vpop.f32.mrf.mxu3 }
 0xb5f   :  { %v2327_v33 = vadd.f32 %v2297_v56, %v2226_v12 }
 0xb60   :  { %v2358_v42 = vld [vmem:[#allocation3 + $0x30] sm:$0xff] }
 0xb61   :  { %v2378_v38 = vadd.f32 %v3847_v4, %v2358_v42  ;;  %2343 = vst.msk [vmem:[#allocation3 + $0x38] sm:$0xff] %vm116_vm0, %v2327_v33 }
 0xb63   :  { %2394 = vst.msk [vmem:[%s3957_s6 + $0x30] sm:$0xff] %vm116_vm0, %v2378_v38 }
 0xb66   :  { %v2300_v41 = vpop.f32.mrf.mxu3 }
 0xb67   :  { %v2328_v9 = vadd.f32 %v2300_v41, %v2227_v13 }
 0xb68   :  { %v2359_v46 = vld [vmem:[#allocation3 + $0x38] sm:$0xff] }
 0xb69   :  { %v2379_v55 = vadd.f32 %v3847_v4, %v2359_v46  ;;  %2344 = vst.msk [vmem:[#allocation3 + $0x40] sm:$0xff] %vm116_vm0, %v2328_v9  ;;  %v1769_v39 = vpop.f32.mrf.mxu0 }
 0xb6a   :  { %v1794_v49 = vadd.f32 %v1769_v39, %v1693_v3 }
 0xb6b   :  { %2395 = vst.msk [vmem:[%s3957_s6 + $0x38] sm:$0xff] %vm116_vm0, %v2379_v55 }
 0xb6c   :  { %1810 = vst.msk [vmem:[#allocation3 + $0x50] sm:$0xff] %vm116_vm0, %v1794_v49 }
 0xb6e   :  { %v2302_v26 = vpop.f32.mrf.mxu3 }
 0xb6f   :  { %v2329_v24 = vadd.f32 %v2302_v26, %v2228_v30 }
 0xb70   :  { %v2360_v43 = vld [vmem:[#allocation3 + $0x40] sm:$0xff] }
 0xb71   :  { %v2380_v19 = vadd.f32 %v3847_v4, %v2360_v43  ;;  %2345 = vst.msk [vmem:[#allocation3 + $0x48] sm:$0xff] %vm116_vm0, %v2329_v24  ;;  %v1771_v2 = vpop.f32.mrf.mxu0 }
 0xb72   :  { %v1795_v6 = vadd.f32 %v1771_v2, %v1694_v59 }
 0xb73   :  { %2396 = vst.msk [vmem:[%s3957_s6 + $0x40] sm:$0xff] %vm116_vm0, %v2380_v19  ;;  %v2229_v37 = vld [vmem:[#allocation3 + $0x50] sm:$0xff] }
 0xb74   :  { %1811 = vst.msk [vmem:[#allocation3 + $0x58] sm:$0xff] %vm116_vm0, %v1795_v6 }
 0xb78   :  { %v2361_v34 = vld [vmem:[#allocation3 + $0x48] sm:$0xff] }
 0xb79   :  { %v2381_v45 = vadd.f32 %v3847_v4, %v2361_v34 }
 0xb7b   :  { %2397 = vst.msk [vmem:[%s3957_s6 + $0x48] sm:$0xff] %vm116_vm0, %v2381_v45  ;;  %v2230_v20 = vld [vmem:[#allocation3 + $0x58] sm:$0xff] }
 0xb7e   :  { %v2305_v8 = vpop.f32.mrf.mxu3 }
 0xb7f   :  { %v2330_v35 = vadd.f32 %v2305_v8, %v2229_v37 }
 0xb81   :  { %2346 = vst.msk [vmem:[#allocation3 + $0x50] sm:$0xff] %vm116_vm0, %v2330_v35 }
 0xb86   :  { %v2307_v11 = vpop.f32.mrf.mxu3 }
 0xb87   :  { %v1774_v28 = vpop.f32.mrf.mxu0  ;;  %v2331_v52 = vadd.f32 %v2307_v11, %v2230_v20 }
 0xb88   :  { %v2362_v5 = vld [vmem:[#allocation3 + $0x50] sm:$0xff]  ;;  %v1796_v23 = vadd.f32 %v1774_v28, %v1695_v53 }
 0xb89   :  { %v2382_v16 = vadd.f32 %v3847_v4, %v2362_v5  ;;  %2347 = vst.msk [vmem:[#allocation3 + $0x58] sm:$0xff] %vm116_vm0, %v2331_v52 }
 0xb8a   :  { %1812 = vst.msk [vmem:[#allocation3 + $0x60] sm:$0xff] %vm116_vm0, %v1796_v23 }
 0xb8b   :  { %2398 = vst.msk [vmem:[%s3957_s6 + $0x50] sm:$0xff] %vm116_vm0, %v2382_v16 }
 0xb8f   :  { %v1776_v60 = vpop.f32.mrf.mxu0 }
 0xb90   :  { %v2363_v61 = vld [vmem:[#allocation3 + $0x58] sm:$0xff]  ;;  %v1797_v18 = vadd.f32 %v1776_v60, %v1696_v22 }
 0xb91   :  { %v2383_v21 = vadd.f32 %v3847_v4, %v2363_v61  ;;  %v2231_v31 = vld [vmem:[#allocation3 + $0x60] sm:$0xff]  ;;  %v2310_v62 = vpop.f32.mrf.mxu3 }
 0xb92   :  { %1813 = vst.msk [vmem:[#allocation3 + $0x68] sm:$0xff] %vm116_vm0, %v1797_v18  ;;  %v2332_v14 = vadd.f32 %v2310_v62, %v2231_v31 }
 0xb93   :  { %2399 = vst.msk [vmem:[%s3957_s6 + $0x58] sm:$0xff] %vm116_vm0, %v2383_v21 }
 0xb94   :  { %2348 = vst.msk [vmem:[#allocation3 + $0x60] sm:$0xff] %vm116_vm0, %v2332_v14 }
 0xb99   :  { %v2232_v57 = vld [vmem:[#allocation3 + $0x68] sm:$0xff]  ;;  %v2312_v50 = vpop.f32.mrf.mxu3 }
 0xb9a   :  { %v2333_v40 = vadd.f32 %v2312_v50, %v2232_v57 }
 0xb9b   :  { %v2364_v7 = vld [vmem:[#allocation3 + $0x60] sm:$0xff] }
 0xb9c   :  { %v2384_v29 = vadd.f32 %v3847_v4, %v2364_v7  ;;  %2349 = vst.msk [vmem:[#allocation3 + $0x68] sm:$0xff] %vm116_vm0, %v2333_v40 }
 0xb9e   :  { %2400 = vst.msk [vmem:[%s3957_s6 + $0x60] sm:$0xff] %vm116_vm0, %v2384_v29  ;;  %v1779_v36 = vpop.f32.mrf.mxu0 }
 0xb9f   :  { %v1798_v27 = vadd.f32 %v1779_v36, %v1697_v54 }
 0xba1   :  { %1814 = vst.msk [vmem:[#allocation3 + $0x70] sm:$0xff] %vm116_vm0, %v1798_v27 }
 0xba3   :  { %v2365_v10 = vld [vmem:[#allocation3 + $0x68] sm:$0xff] }
 0xba4   :  { %v2385_v17 = vadd.f32 %v3847_v4, %v2365_v10 }
 0xba6   :  { %2401 = vst.msk [vmem:[%s3957_s6 + $0x68] sm:$0xff] %vm116_vm0, %v2385_v17  ;;  %v1781_v32 = vpop.f32.mrf.mxu0 }
 0xba7   :  { %v1799_v58 = vadd.f32 %v1781_v32, %v1698_v44 }
 0xba8   :  { %v2233_v25 = vld [vmem:[#allocation3 + $0x70] sm:$0xff] }
 0xba9   :  { %1815 = vst.msk [vmem:[#allocation3 + $0x78] sm:$0xff] %vm116_vm0, %v1799_v58 }
 0xbae   :  { %v2315_v47 = vpop.f32.mrf.mxu3 }
 0xbaf   :  { %v2334_v15 = vadd.f32 %v2315_v47, %v2233_v25 }
 0xbb0   :  { %v2234_v48 = vld [vmem:[#allocation3 + $0x78] sm:$0xff] }
 0xbb1   :  { %2350 = vst.msk [vmem:[#allocation3 + $0x70] sm:$0xff] %vm116_vm0, %v2334_v15 }
 0xbb6   :  { %v2317_v1 = vpop.f32.mrf.mxu3 }
 0xbb7   :  { %v2335_v51 = vadd.f32 %v2317_v1, %v2234_v48 }
 0xbb8   :  { %v2366_v63 = vld [vmem:[#allocation3 + $0x70] sm:$0xff] }
 0xbb9   :  { %v2386_v0 = vadd.f32 %v3847_v4, %v2366_v63  ;;  %2351 = vst.msk [vmem:[#allocation3 + $0x78] sm:$0xff] %vm116_vm0, %v2335_v51 }
 0xbbb   :  { %2402 = vst.msk [vmem:[%s3957_s6 + $0x70] sm:$0xff] %vm116_vm0, %v2386_v0 }
 0xbc0   :  { %v2367_v12 = vld [vmem:[#allocation3 + $0x78] sm:$0xff] }
 0xbc1   :  { %v2387_v56 = vadd.f32 %v3847_v4, %v2367_v12 }
 0xbc3   :  { %2403 = vst.msk [vmem:[%s3957_s6 + $0x78] sm:$0xff] %vm116_vm0, %v2387_v56 }
 0xbc4   :  { %2408 = vsyncpa [#allocation5], 1 }

</bundles_post_ra>
